<compile_context>
chip_gen: v6e
topology: v6e:2x2x1
jax: 0.10.0
libtpu: 0.0.40
codegen_flags: <defaults>
</compile_context>

<pallas_src>
import functools

import jax
import jax.numpy as jnp
from jax.experimental import pallas as pl
from jax.experimental.pallas import tpu as pltpu

# Small config consistent with the module's __init__
LATENT_DIM = 32
SPATIAL = 16
FLAT = SPATIAL * SPATIAL * 2      # 512
H1, H2 = 1024, 2048
BATCH = 2

TK = 1024                         # reduction tile over the H2 axis (2 grid steps)
assert H2 % TK == 0, "reduction tile must divide H2 or part of the sum is dropped"
K_STEPS = H2 // TK


def decoder_mlp_kernel(x_ref, w1_ref, b1_ref, w2_ref, b2_ref, w3_ref, b3_ref,
                       o_ref, h1_ref, acc_ref):
    """One k grid step: stream an (H1,TK) slice of W2 and a (TK,FLAT) slice of
    W3, accumulate the partial x@W1..W3 product; finalize with +b3 on the last
    step. Output stays resident in VMEM across the reduction axis."""
    k = pl.program_id(0)

    @pl.when(k == 0)
    def _init():
        # Layer 1 computed once (tiny: 32x1024 weights), kept in bf16 scratch.
        h1 = jnp.dot(x_ref[...], w1_ref[...], preferred_element_type=jnp.float32)
        h1 = jnp.maximum(h1 + b1_ref[...], 0.0)
        h1_ref[...] = h1.astype(h1_ref.dtype)
        acc_ref[...] = jnp.zeros_like(acc_ref)

    # Layer 2 chunk: (B, TK), bias + ReLU done once per chunk.
    h2 = jnp.dot(h1_ref[...], w2_ref[...], preferred_element_type=jnp.float32)
    h2 = jnp.maximum(h2 + b2_ref[...], 0.0)
    # Layer 3 partial accumulation (f32 accumulator, bf16 MXU inputs).
    acc_ref[...] += jnp.dot(h2.astype(w3_ref.dtype), w3_ref[...],
                            preferred_element_type=jnp.float32)

    @pl.when(k == pl.num_programs(0) - 1)
    def _finalize():
        o_ref[...] = (acc_ref[...] + b3_ref[...]).astype(o_ref.dtype)


def init_params(key):
    """Deterministic synthetic init matching nn.Linear's default U(-1/sqrt(fan_in)).
    Weights are stored transposed (in, out) and in bfloat16 (halves HBM traffic);
    biases stay f32. Kernel computes x @ W + b, equivalent to torch's x @ W.T + b."""
    ks = jax.random.split(key, 6)

    def lin(kw, kb, fan_in, fan_out):
        bound = 1.0 / jnp.sqrt(fan_in)
        w = jax.random.uniform(kw, (fan_in, fan_out), jnp.float32, -bound, bound)
        b = jax.random.uniform(kb, (1, fan_out), jnp.float32, -bound, bound)
        return w.astype(jnp.bfloat16), b

    w1, b1 = lin(ks[0], ks[1], LATENT_DIM, H1)
    w2, b2 = lin(ks[2], ks[3], H1, H2)
    w3, b3 = lin(ks[4], ks[5], H2, FLAT)
    return (w1, b1, w2, b2, w3, b3)


def _cost_estimate(batch_padded):
    flops = 2 * batch_padded * (LATENT_DIM * H1 + H1 * H2 + H2 * FLAT)
    weight_bytes = 2 * (LATENT_DIM * H1 + H1 * H2 + H2 * FLAT)      # bf16 weights
    bias_bytes = 4 * (H1 + H2 + FLAT)
    io_bytes = 2 * batch_padded * LATENT_DIM + 4 * batch_padded * FLAT
    return pl.CostEstimate(flops=flops, transcendentals=0,
                           bytes_accessed=weight_bytes + bias_bytes + io_bytes)


@functools.partial(jax.jit, static_argnums=())
def decoder_forward(x, params):
    w1, b1, w2, b2, w3, b3 = params
    B = x.shape[0]
    Bp = ((B + 7) // 8) * 8                       # pad batch to one sublane
    x_p = jnp.zeros((Bp, LATENT_DIM), jnp.bfloat16).at[:B].set(x.astype(jnp.bfloat16))

    out = pl.pallas_call(
        decoder_mlp_kernel,
        out_shape=jax.ShapeDtypeStruct((Bp, FLAT), jnp.float32),
        grid=(K_STEPS,),
        in_specs=[
            pl.BlockSpec((Bp, LATENT_DIM), lambda k: (0, 0)),
            pl.BlockSpec((LATENT_DIM, H1), lambda k: (0, 0)),
            pl.BlockSpec((1, H1), lambda k: (0, 0)),
            pl.BlockSpec((H1, TK), lambda k: (0, k)),
            pl.BlockSpec((1, TK), lambda k: (0, k)),
            pl.BlockSpec((TK, FLAT), lambda k: (k, 0)),
            pl.BlockSpec((1, FLAT), lambda k: (0, 0)),
        ],
        out_specs=pl.BlockSpec((Bp, FLAT), lambda k: (0, 0)),
        scratch_shapes=[
            pltpu.VMEM((Bp, H1), jnp.bfloat16),   # h1 (computed once at k==0)
            pltpu.VMEM((Bp, FLAT), jnp.float32),  # f32 accumulator
        ],
        compiler_params=pltpu.CompilerParams(
            dimension_semantics=("arbitrary",),   # reduction axis (output resident)
            vmem_limit_bytes=16 << 20,
        ),
        cost_estimate=_cost_estimate(Bp),
    )(x_p, w1, b1, w2, b2, w3, b3)

    # Drop batch padding (padded rows contain relu(bias)-driven garbage — keep this slice!).
    out = out[:B]

    # nn.Unflatten(1, (2, spatial, spatial)) -> NCHW
    x4 = out.reshape(B, 2, SPATIAL, SPATIAL)
    # PyTorch: if x.shape[-1] != 166: x = x[:, :, :166, :166]
    # (for spatial <= 166 the slice is a no-op, identical to torch semantics)
    if x4.shape[-1] != 166:
        x4 = x4[:, :, :166, :166]
    return x4


def decoder_forward_ref(x, params):
    """Pure-JAX reference (same bf16 weights, f32 accumulation) for correctness."""
    w1, b1, w2, b2, w3, b3 = params
    xb = x.astype(jnp.bfloat16)
    h = jnp.maximum(jnp.dot(xb, w1, preferred_element_type=jnp.float32) + b1, 0.0)
    h = jnp.maximum(jnp.dot(h.astype(jnp.bfloat16), w2,
                            preferred_element_type=jnp.float32) + b2, 0.0)
    o = jnp.dot(h.astype(jnp.bfloat16), w3, preferred_element_type=jnp.float32) + b3
    o = o.reshape(x.shape[0], 2, SPATIAL, SPATIAL)
    if o.shape[-1] != 166:
        o = o[:, :, :166, :166]
    return o


if __name__ == "__main__":
    key = jax.random.PRNGKey(0)
    kx, kp = jax.random.split(key)
    x = jax.random.normal(kx, (BATCH, LATENT_DIM), dtype=jnp.float32)
    params = init_params(kp)

    out = decoder_forward(x, params)
    out = jax.block_until_ready(out)

    ref = decoder_forward_ref(x, params)
    assert out.shape == (BATCH, 2, SPATIAL, SPATIAL), out.shape
    assert jnp.allclose(out, ref, atol=1e-2, rtol=1e-2), "mismatch vs reference"

    # TODO(synk): the 'conv' branch (ConvTranspose2d + BatchNorm2d + LeakyReLU) is not
    # implemented here; this script implements the 'linear' decoding method.
    print("KERNEL_OK")
</pallas_src>

<mosaic_0001>
module attributes {stable_mosaic.version = 11 : i64} {
  func.func @decoder_mlp_kernel(%arg0: i32, %arg1: memref<8x32xbf16, #tpu.memory_space<vmem>>, %arg2: memref<32x1024xbf16, #tpu.memory_space<vmem>>, %arg3: memref<1x1024xf32, #tpu.memory_space<vmem>>, %arg4: memref<1024x1024xbf16, #tpu.memory_space<vmem>>, %arg5: memref<1x1024xf32, #tpu.memory_space<vmem>>, %arg6: memref<1024x512xbf16, #tpu.memory_space<vmem>>, %arg7: memref<1x512xf32, #tpu.memory_space<vmem>>, %arg8: memref<8x512xf32, #tpu.memory_space<vmem>>, %arg9: memref<8x1024xbf16, #tpu.memory_space<vmem>>, %arg10: memref<8x512xf32, #tpu.memory_space<vmem>>) attributes {dimension_semantics = [#tpu.dimension_semantics<arbitrary>], iteration_bounds = array<i64: 2>, scalar_prefetch = 0 : i64, scratch_operands = 2 : i64, tpu.core_type = #tpu.core_type<tc>, window_params = [{pipeline_mode = #tpu.pipeline_mode<synchronous>, transform_indices = @transform_0, window_bounds = array<i64: 8, 32>}, {pipeline_mode = #tpu.pipeline_mode<synchronous>, transform_indices = @transform_1, window_bounds = array<i64: 32, 1024>}, {pipeline_mode = #tpu.pipeline_mode<synchronous>, transform_indices = @transform_2, window_bounds = array<i64: 1, 1024>}, {transform_indices = @transform_3, window_bounds = array<i64: 1024, 1024>}, {transform_indices = @transform_4, window_bounds = array<i64: 1, 1024>}, {transform_indices = @transform_5, window_bounds = array<i64: 1024, 512>}, {pipeline_mode = #tpu.pipeline_mode<synchronous>, transform_indices = @transform_6, window_bounds = array<i64: 1, 512>}, {pipeline_mode = #tpu.pipeline_mode<synchronous>, transform_indices = @transform_7, window_bounds = array<i64: 8, 512>}]} {
    %c0_i32 = arith.constant 0 : i32
    %0 = arith.cmpi eq, %arg0, %c0_i32 : i32
    %1 = arith.extui %0 : i1 to i32
    %c0_i32_0 = arith.constant 0 : i32
    %2 = arith.cmpi ne, %1, %c0_i32_0 : i32
    scf.if %2 {
      %c0_15 = arith.constant 0 : index
      %c0_16 = arith.constant 0 : index
      %20 = vector.load %arg1[%c0_15, %c0_16] : memref<8x32xbf16, #tpu.memory_space<vmem>>, vector<8x32xbf16>
      %c0_17 = arith.constant 0 : index
      %c0_18 = arith.constant 0 : index
      %21 = vector.load %arg2[%c0_17, %c0_18] : memref<32x1024xbf16, #tpu.memory_space<vmem>>, vector<32x1024xbf16>
      %cst_19 = arith.constant dense<0.000000e+00> : vector<8x1024xf32>
      %22 = tpu.matmul %20, %21, %cst_19 {dimension_numbers = #tpu.dot_dimension_numbers<[1], [0], [0], [1], [0, 0, 1, 1], [], []>} : vector<8x32xbf16>, vector<32x1024xbf16>, vector<8x1024xf32> -> vector<8x1024xf32>
      %c0_20 = arith.constant 0 : index
      %c0_21 = arith.constant 0 : index
      %23 = vector.load %arg3[%c0_20, %c0_21] : memref<1x1024xf32, #tpu.memory_space<vmem>>, vector<1x1024xf32>
      %24 = vector.broadcast %23 : vector<1x1024xf32> to vector<8x1024xf32>
      %25 = arith.addf %22, %24 : vector<8x1024xf32>
      %cst_22 = arith.constant 0.000000e+00 : f32
      %26 = vector.broadcast %cst_22 : f32 to vector<8x1024xf32>
      %27 = arith.maximumf %25, %26 : vector<8x1024xf32>
      %28 = arith.truncf %27 : vector<8x1024xf32> to vector<8x1024xbf16>
      %c0_23 = arith.constant 0 : index
      %c0_24 = arith.constant 0 : index
      %29 = vector.load %arg9[%c0_23, %c0_24] : memref<8x1024xbf16, #tpu.memory_space<vmem>>, vector<8x1024xbf16>
      tpu.vector_store %arg9[%c0_23, %c0_24], %28 {strides = array<i32>} : memref<8x1024xbf16, #tpu.memory_space<vmem>>, vector<8x1024xbf16>,
      %cst_25 = arith.constant 0.000000e+00 : f32
      %30 = vector.broadcast %cst_25 : f32 to vector<8x512xf32>
      %c0_26 = arith.constant 0 : index
      %c0_27 = arith.constant 0 : index
      %31 = vector.load %arg10[%c0_26, %c0_27] : memref<8x512xf32, #tpu.memory_space<vmem>>, vector<8x512xf32>
      tpu.vector_store %arg10[%c0_26, %c0_27], %30 {strides = array<i32>} : memref<8x512xf32, #tpu.memory_space<vmem>>, vector<8x512xf32>,
    } else {
    }
    %c0 = arith.constant 0 : index
    %c0_1 = arith.constant 0 : index
    %3 = vector.load %arg9[%c0, %c0_1] : memref<8x1024xbf16, #tpu.memory_space<vmem>>, vector<8x1024xbf16>
    %c0_2 = arith.constant 0 : index
    %c0_3 = arith.constant 0 : index
    %4 = vector.load %arg4[%c0_2, %c0_3] : memref<1024x1024xbf16, #tpu.memory_space<vmem>>, vector<1024x1024xbf16>
    %cst = arith.constant dense<0.000000e+00> : vector<8x1024xf32>
    %5 = tpu.matmul %3, %4, %cst {dimension_numbers = #tpu.dot_dimension_numbers<[1], [0], [0], [1], [0, 0, 1, 1], [], []>} : vector<8x1024xbf16>, vector<1024x1024xbf16>, vector<8x1024xf32> -> vector<8x1024xf32>
    %c0_4 = arith.constant 0 : index
    %c0_5 = arith.constant 0 : index
    %6 = vector.load %arg5[%c0_4, %c0_5] : memref<1x1024xf32, #tpu.memory_space<vmem>>, vector<1x1024xf32>
    %7 = vector.broadcast %6 : vector<1x1024xf32> to vector<8x1024xf32>
    %8 = arith.addf %5, %7 : vector<8x1024xf32>
    %cst_6 = arith.constant 0.000000e+00 : f32
    %9 = vector.broadcast %cst_6 : f32 to vector<8x1024xf32>
    %10 = arith.maximumf %8, %9 : vector<8x1024xf32>
    %c0_7 = arith.constant 0 : index
    %c0_8 = arith.constant 0 : index
    %11 = vector.load %arg10[%c0_7, %c0_8] : memref<8x512xf32, #tpu.memory_space<vmem>>, vector<8x512xf32>
    %12 = arith.truncf %10 : vector<8x1024xf32> to vector<8x1024xbf16>
    %c0_9 = arith.constant 0 : index
    %c0_10 = arith.constant 0 : index
    %13 = vector.load %arg6[%c0_9, %c0_10] : memref<1024x512xbf16, #tpu.memory_space<vmem>>, vector<1024x512xbf16>
    %cst_11 = arith.constant dense<0.000000e+00> : vector<8x512xf32>
    %14 = tpu.matmul %12, %13, %cst_11 {dimension_numbers = #tpu.dot_dimension_numbers<[1], [0], [0], [1], [0, 0, 1, 1], [], []>} : vector<8x1024xbf16>, vector<1024x512xbf16>, vector<8x512xf32> -> vector<8x512xf32>
    %15 = arith.addf %11, %14 : vector<8x512xf32>
    %c0_12 = arith.constant 0 : index
    %c0_13 = arith.constant 0 : index
    %16 = vector.load %arg10[%c0_12, %c0_13] : memref<8x512xf32, #tpu.memory_space<vmem>>, vector<8x512xf32>
    tpu.vector_store %arg10[%c0_12, %c0_13], %15 {strides = array<i32>} : memref<8x512xf32, #tpu.memory_space<vmem>>, vector<8x512xf32>,
    %c1_i32 = arith.constant 1 : i32
    %17 = arith.cmpi eq, %arg0, %c1_i32 : i32
    %18 = arith.extui %17 : i1 to i32
    %c0_i32_14 = arith.constant 0 : i32
    %19 = arith.cmpi ne, %18, %c0_i32_14 : i32
    scf.if %19 {
      %c0_15 = arith.constant 0 : index
      %c0_16 = arith.constant 0 : index
      %20 = vector.load %arg10[%c0_15, %c0_16] : memref<8x512xf32, #tpu.memory_space<vmem>>, vector<8x512xf32>
      %c0_17 = arith.constant 0 : index
      %c0_18 = arith.constant 0 : index
      %21 = vector.load %arg7[%c0_17, %c0_18] : memref<1x512xf32, #tpu.memory_space<vmem>>, vector<1x512xf32>
      %22 = vector.broadcast %21 : vector<1x512xf32> to vector<8x512xf32>
      %23 = arith.addf %20, %22 : vector<8x512xf32>
      %c0_19 = arith.constant 0 : index
      %c0_20 = arith.constant 0 : index
      %24 = vector.load %arg8[%c0_19, %c0_20] : memref<8x512xf32, #tpu.memory_space<vmem>>, vector<8x512xf32>
      tpu.vector_store %arg8[%c0_19, %c0_20], %23 {strides = array<i32>} : memref<8x512xf32, #tpu.memory_space<vmem>>, vector<8x512xf32>,
    } else {
    }
    return
  }
  func.func @transform_0(%arg0: i32) -> (i32, i32) {
    %c0_i32 = arith.constant 0 : i32
    %c0_i32_0 = arith.constant 0 : i32
    %c0_i32_1 = arith.constant 0 : i32
    return %c0_i32, %c0_i32_0 : i32, i32
  }
  func.func @transform_1(%arg0: i32) -> (i32, i32) {
    %c0_i32 = arith.constant 0 : i32
    %c0_i32_0 = arith.constant 0 : i32
    %c0_i32_1 = arith.constant 0 : i32
    return %c0_i32, %c0_i32_0 : i32, i32
  }
  func.func @transform_2(%arg0: i32) -> (i32, i32) {
    %c0_i32 = arith.constant 0 : i32
    %c0_i32_0 = arith.constant 0 : i32
    %c0_i32_1 = arith.constant 0 : i32
    return %c0_i32, %c0_i32_0 : i32, i32
  }
  func.func @transform_3(%arg0: i32) -> (i32, i32) {
    %c0_i32 = arith.constant 0 : i32
    %c0_i32_0 = arith.constant 0 : i32
    return %c0_i32, %arg0 : i32, i32
  }
  func.func @transform_4(%arg0: i32) -> (i32, i32) {
    %c0_i32 = arith.constant 0 : i32
    %c0_i32_0 = arith.constant 0 : i32
    return %c0_i32, %arg0 : i32, i32
  }
  func.func @transform_5(%arg0: i32) -> (i32, i32) {
    %c0_i32 = arith.constant 0 : i32
    %c0_i32_0 = arith.constant 0 : i32
    return %arg0, %c0_i32 : i32, i32
  }
  func.func @transform_6(%arg0: i32) -> (i32, i32) {
    %c0_i32 = arith.constant 0 : i32
    %c0_i32_0 = arith.constant 0 : i32
    %c0_i32_1 = arith.constant 0 : i32
    return %c0_i32, %c0_i32_0 : i32, i32
  }
  func.func @transform_7(%arg0: i32) -> (i32, i32) {
    %c0_i32 = arith.constant 0 : i32
    %c0_i32_0 = arith.constant 0 : i32
    %c0_i32_1 = arith.constant 0 : i32
    return %c0_i32, %c0_i32_0 : i32, i32
  }
}

</mosaic_0001>

<bundles_post_ra>
// kernel: decoder_forward.1
= control target key start
LH: loop header
LB: loop body
LE: loop exit
PB: predicated region body
PF: predicated region fallthrough
CT: control target
= control target key end

     0   :  { %s9395_s0 = inlined_call_operand.vmem [shape: bf16[8,32], index: 0, kind: input, shape index: {}]   ;;  %s9396_s1 = inlined_call_operand.hbm [shape: bf16[32,1024], index: 1, kind: input, shape index: {}]   ;;  %s9397_s2 = inlined_call_operand.hbm [shape: f32[1,1024], index: 2, kind: input, shape index: {}]   ;;  %s9398_s3 = inlined_call_operand.hbm [shape: bf16[1024,2048], index: 3, kind: input, shape index: {}]   ;;  %s9399_s4 = inlined_call_operand.hbm [shape: f32[1,2048], index: 4, kind: input, shape index: {}]   ;;  %s9400_s5 = inlined_call_operand.hbm [shape: bf16[2048,512], index: 5, kind: input, shape index: {}]   ;;  %s9401_s6 = inlined_call_operand.hbm [shape: f32[1,512], index: 6, kind: input, shape index: {}]   ;;  %s9402_s7 = inlined_call_operand.vmem [shape: f32[8,512], index: 7, kind: output, shape index: {}]  }
   0x1   :  { %9413 = sst [smem:[#allocation19_spill]] %s9396_s1 }
   0x2   :  { %12 = vsyncpa [#allocation5], 0 }
   0x3   :  { %13 = vsyncpa [#allocation7], 0  ;;  %s8174_s24 = smov 0   ;;  %s8176_s25 = smov 0  }
   0x4   :  { %s8178_s26 = smov 0   ;;  %s8180_s27 = smov 0  }
   0x5 LB: > { %9414 = sst [smem:[#allocation16_spill]] %s8115_s26  ;;  %s8193_s28 = sadd.s32 4294967295, %s8119_s27   ;;  %s8119_s27 = sphi %s8180_s27, %s9437_s27   ;;  %s8115_s26 = sphi %s8178_s26, %s9439_s26   ;;  %s8111_s25 = sphi %s8176_s25, %s9441_s25   ;;  %s8107_s24 = sphi %s8174_s24, %s9440_s24  }
   0x6   : > { %s8196_s29 = sadd.s32 1, %s8119_s27   ;;  %s89_s8 = sadd.s32 1, %s8115_s26 }
   0x7   : > { %9415 = sst [smem:[#allocation17_spill]] %s8196_s29  ;;  %s86_s30 = ssub.s32 %s8119_s27, %s8196_s29 }
   0x8   : > { %p87_p0 = scmp.eq.s32.totalorder %s86_s30, 0  ;;  %p96_p1 = scmp.ne.s32.totalorder %s8115_s26, %s8111_s25 }
   0x9   : > { %p97_p2 = scmp.eq.s32.totalorder %s8119_s27, 0  ;;  %p102_p3 = scmp.ne.s32.totalorder %s8111_s25, %s8107_s24 }
   0xa   : > { %s8206_s9 = scalar_select %p87_p0, %s8115_s26, %s89_s8  }
   0xb   : > { %p8208_p4 = por %p97_p2, %p96_p1  ;;  %p9403_p5 = scmp.eq.s32.totalorder %s8193_s28, 0 }
   0xc   : > { %9416 = sst [smem:[#allocation18_spill]] %s8206_s9  ;;  %p6597_p6 = scmp.ge.s32.totalorder %s8119_s27, 1 }
   0xd   : > { %p207_p7 = scmp.lt.s32.totalorder %s8119_s27, 3  ;;  %p8217_p8 = por %p9403_p5, %p102_p3 }
   0xe   : > { %s8121_s13 = smov [#allocation4]   ;;  %p7472_p13 = scmp.lt.s32.totalorder %s8119_s27, 2 }
   0xf   : > { %s9418_s11 = scalar_select %p8217_p8, 1, 0 }
  0x10   : > { %p8222_p10 = pnand %p6597_p6, %p207_p7  ;;  %s222_s14 = sshll.u32 %s8121_s13, 4  ;;  %s223_s14 = int_to_ptr.vmem [resolvable:$true] %s222_s14 }
  0x11   : > { %s258_s16 = sand.u32 1, %s8119_s27   ;;  %s8237_s17 = sand.u32 1, %s8115_s26  }
  0x12   : > { %s9419_s12 = scalar_select %p8222_p10, 1, 0 }
  0x13   : > { %p7449_p11 = pneg %p8222_p10  ;;  %p8241_p0 = pnand %p7472_p13, %p8208_p4 }
  0x14   : > { %s7922_s19 = scalar_lea.vmem %s223_s14, 2048  ;;  %p7930_p7 = scmp.lt.s32.totalorder %s223_s14, %s223_s14 }
  0x15   : > { %p8230_p12 = pnand %p7449_p11, %p9403_p5  ;;  %p7923_p2 = scmp.ne.s32.totalorder %s223_s14, %s7922_s19 }
  0x16   : > { %p7931_p11 = scmp.lt.s32.totalorder %s7922_s19, %s7922_s19 }
  0x17   : > { %s9420_s15 = scalar_select %p8230_p12, 1, 0 }
  0x18   : > { %p9407_p1 = pneg %p8230_p12  ;;  %p7932_p9 = por %p7931_p11, %p7930_p7 }
  0x1a   : > { %p7925_p3 = pnand %p7923_p2, %p9407_p1 }
  0x1c   : > { %p7926_p6 = pneg %p7925_p3 }
  0x1e   : > { %p7933_p5 = pnand %p7932_p9, %p7926_p6 }
  0x20   : > { %7936 = shalt.err (!%p7933_p5)
}
  0x21   : > { %s8122_s20 = smov 512   ;;  %s8123_s21 = smov 32  }
  0x22   : > { %s9422_s1 = sld [smem:[#allocation19_spill]]  ;;  %s6602_s24 = sshll.u32 %s8237_s17, 12 }
  0x23   : > { %s7423_s30 = sshll.u32 %s8119_s27, 9  ;;  %s262_s19 = scalar_lea.vmem [#allocation8], %s6602_s24 }
  0x24   : > { %s8263_s13 = scalar_lea.hbm %s9398_s3, %s7423_s30  ;;  %s269_s9 = sshll.u32 %s262_s19, 4  ;;  %s8265_s9 = int_to_ptr.vmem [resolvable:$true] %s269_s9 }
  0x25   : > { %s8267_s26 = scalar_lea.sflag [#allocation5], %s258_s16  ;;  %s7937_s29 = scalar_lea.hbm %s8263_s13, 65536 }
  0x26   : > { %p7938_p4 = scmp.ne.s32.totalorder %s8263_s13, %s7937_s29  ;;  %p8273_p5 = pneg %p8241_p0 }
  0x27   : > { %s7942_s24 = scalar_lea.hbm %s9398_s3, 131072  ;;  %p7943_p2 = scmp.lt.s32.totalorder %s8263_s13, %s9398_s3 }
  0x28   : > { %7452 = dma.hbm_to_vmem [thread:$0]  (!%p8230_p12), %s9422_s1, 2048, %s223_s14, [#allocation5], %s8122_s20, %s8122_s20, %s8123_s21  }
  0x29   : > { %p7940_p9 = pnand %p8273_p5, %p7938_p4  ;;  %p7944_p3 = scmp.lt.s32.totalorder %s7942_s24, %s7937_s29 }
  0x2b   : > { %p7941_p13 = pneg %p7940_p9  ;;  %p7945_p6 = por %p7944_p3, %p7943_p2 }
  0x2d   : > { %p7946_p7 = pnand %p7945_p6, %p7941_p13 }
  0x2f   : > { %7949 = shalt.err (!%p7946_p7)
}
  0x30   : > { %s7950_s16 = scalar_lea.vmem %s8265_s9, 65536  ;;  %s8124_s10 = smov [#allocation8]  }
  0x31   : > { %p7951_p11 = scmp.ne.s32.totalorder %s8265_s9, %s7950_s16  ;;  %s7955_s19 = sshll.u32 %s8124_s10, 4  ;;  %s7956_s19 = int_to_ptr.vmem [resolvable:$false] %s7955_s19 }
  0x32   : > { %s7957_s22 = scalar_lea.vmem %s7956_s19, 131072  ;;  %p7958_p1 = scmp.lt.s32.totalorder %s8265_s9, %s7956_s19 }
  0x33   : > { %p7953_p4 = pnand %p7951_p11, %p8273_p5  ;;  %p7959_p8 = scmp.lt.s32.totalorder %s7957_s22, %s7950_s16 }
  0x35   : > { %p7954_p9 = pneg %p7953_p4  ;;  %p7960_p10 = por %p7959_p8, %p7958_p1 }
  0x37   : > { %p7961_p12 = pnand %p7960_p10, %p7954_p9 }
  0x39   : > { %7964 = shalt.err (!%p7961_p12)
}
  0x3a   : > { %s8125_s29 = smov 1024   ;;  %s8126_s23 = smov [#allocation6]  }
  0x3b   : > { %7462 = dma.hbm_to_vmem [thread:$0]  (!%p8241_p0), %s8263_s13, 65536, %s8265_s9, %s8267_s26, %s8125_s29, %s8122_s20, %s8123_s21  }
  0x3c   : > { %s236_s24 = sshll.u32 %s8126_s23, 4  ;;  %s6605_s30 = sshll.u32 %s8237_s17, 3  ;;  %s237_s24 = int_to_ptr.vmem [resolvable:$true] %s236_s24 }
  0x3d   : > { %s7976_s8 = scalar_lea.vmem %s237_s24, 128  ;;  %p9424_p8 = scmp.ne.s32.totalorder %s9420_s15, 0 }
  0x3e   : > { %p7977_p13 = scmp.ne.s32.totalorder %s237_s24, %s7976_s8  ;;  %p7984_p2 = scmp.lt.s32.totalorder %s237_s24, %s237_s24 }
  0x3f   : > { %p9425_p10 = pneg %p9424_p8  ;;  %p7985_p3 = scmp.lt.s32.totalorder %s7976_s8, %s7976_s8 }
  0x41   : > { %p7979_p12 = pnand %p7977_p13, %p9425_p10  ;;  %p7986_p6 = por %p7985_p3, %p7984_p2 }
  0x43   : > { %p7980_p1 = pneg %p7979_p12 }
  0x45   : > { %p7987_p7 = pnand %p7986_p6, %p7980_p1 }
  0x47   : > { %7990 = shalt.err (!%p7987_p7)
}
  0x48   : > { %7455 = dma.hbm_to_vmem [thread:$0]  (!%p9424_p8), %s9397_s2, 128, %s237_s24, [#allocation7]  }
  0x49   : > { %s7424_s9 = sshll.u32 %s8119_s27, 7  ;;  %s283_s20 = scalar_lea.vmem [#allocation9], %s6605_s30 }
  0x4a   : > { %s291_s21 = sshll.u32 %s283_s20, 4  ;;  %s289_s22 = scalar_lea.hbm %s9399_s4, %s7424_s9  ;;  %s292_s21 = int_to_ptr.vmem [resolvable:$true] %s291_s21 }
  0x4b   : > { %s7991_s29 = scalar_lea.hbm %s289_s22, 128  ;;  %s7996_s16 = scalar_lea.hbm %s9399_s4, 256 }
  0x4c   : > { %p7992_p11 = scmp.ne.s32.totalorder %s289_s22, %s7991_s29  ;;  %p7997_p13 = scmp.lt.s32.totalorder %s289_s22, %s9399_s4 }
  0x4d   : > { %p7998_p10 = scmp.lt.s32.totalorder %s7996_s16, %s7991_s29 }
  0x4e   : > { %p7994_p4 = pnand %p7992_p11, %p8273_p5 }
  0x4f   : > { %p7999_p12 = por %p7998_p10, %p7997_p13 }
  0x50   : > { %p7995_p9 = pneg %p7994_p4 }
  0x52   : > { %p8000_p1 = pnand %p7999_p12, %p7995_p9 }
  0x54   : > { %8003 = shalt.err (!%p8000_p1)
}
  0x55   : > { %s8004_s24 = scalar_lea.vmem %s292_s21, 128  ;;  %s8127_s30 = smov [#allocation9]  }
  0x56   : > { %p8005_p2 = scmp.ne.s32.totalorder %s292_s21, %s8004_s24  ;;  %s8009_s9 = sshll.u32 %s8127_s30, 4  ;;  %s8010_s9 = int_to_ptr.vmem [resolvable:$false] %s8009_s9 }
  0x57   : > { %s8011_s20 = scalar_lea.vmem %s8010_s9, 256  ;;  %p8012_p7 = scmp.lt.s32.totalorder %s292_s21, %s8010_s9 }
  0x58   : > { %p8007_p3 = pnand %p8005_p2, %p8273_p5  ;;  %p8013_p11 = scmp.lt.s32.totalorder %s8011_s20, %s8004_s24 }
  0x5a   : > { %p8008_p6 = pneg %p8007_p3  ;;  %p8014_p4 = por %p8013_p11, %p8012_p7 }
  0x5c   : > { %p8015_p8 = pnand %p8014_p4, %p8008_p6 }
  0x5e   : > { %8018 = shalt.err (!%p8015_p8)
}
  0x5f   : > { %7465 = dma.hbm_to_vmem [thread:$0]  (!%p8241_p0), %s289_s22, 128, %s292_s21, %s8267_s26  }
  0x60   : > { %s6608_s1 = sshll.u32 %s8237_s17, 11  ;;  %s8128_s13 = smov [#allocation11]  }
  0x61   : > { %s247_s19 = sshll.u32 %s8128_s13, 4  ;;  %s7426_s29 = sshll.u32 %s8119_s27, 15  ;;  %s248_s19 = int_to_ptr.vmem [resolvable:$true] %s247_s19 }
  0x62   : > { %s8030_s23 = scalar_lea.vmem %s248_s19, 64  ;;  %p9426_p13 = scmp.ne.s32.totalorder %s9420_s15, 0 }
  0x63   : > { %p8031_p9 = scmp.ne.s32.totalorder %s248_s19, %s8030_s23  ;;  %p8038_p2 = scmp.lt.s32.totalorder %s248_s19, %s248_s19 }
  0x64   : > { %p9427_p10 = pneg %p9426_p13  ;;  %p8039_p8 = scmp.lt.s32.totalorder %s8030_s23, %s8030_s23 }
  0x66   : > { %p8033_p12 = pnand %p8031_p9, %p9427_p10  ;;  %p8040_p3 = por %p8039_p8, %p8038_p2 }
  0x68   : > { %p8034_p1 = pneg %p8033_p12 }
  0x6a   : > { %p8041_p6 = pnand %p8040_p3, %p8034_p1 }
  0x6c   : > { %8044 = shalt.err (!%p8041_p6)
}
  0x6d   : > { %7458 = dma.hbm_to_vmem [thread:$0]  (!%p9426_p13), %s9401_s6, 64, %s248_s19, [#allocation7]  }
  0x6e   : > { %s8337_s22 = scalar_lea.hbm %s9400_s5, %s7426_s29  ;;  %s302_s16 = scalar_lea.vmem [#allocation10], %s6608_s1 }
  0x6f   : > { %s310_s10 = sshll.u32 %s302_s16, 4  ;;  %s8045_s24 = scalar_lea.hbm %s8337_s22, 32768  ;;  %s8339_s10 = int_to_ptr.vmem [resolvable:$true] %s310_s10 }
  0x70   : > { %p8046_p7 = scmp.ne.s32.totalorder %s8337_s22, %s8045_s24  ;;  %s8050_s9 = scalar_lea.hbm %s9400_s5, 65536 }
  0x71   : > { %p8051_p9 = scmp.lt.s32.totalorder %s8337_s22, %s9400_s5  ;;  %p8052_p13 = scmp.lt.s32.totalorder %s8050_s9, %s8045_s24 }
  0x72   : > { %p8048_p11 = pnand %p8046_p7, %p8273_p5 }
  0x73   : > { %p8053_p10 = por %p8052_p13, %p8051_p9 }
  0x74   : > { %p8049_p4 = pneg %p8048_p11 }
  0x76   : > { %p8054_p12 = pnand %p8053_p10, %p8049_p4 }
  0x78   : > { %8057 = shalt.err (!%p8054_p12)
}
  0x79   : > { %s8058_s1 = scalar_lea.vmem %s8339_s10, 32768  ;;  %s8129_s19 = smov [#allocation10]  }
  0x7a   : > { %p8059_p1 = scmp.ne.s32.totalorder %s8339_s10, %s8058_s1  ;;  %s8063_s29 = sshll.u32 %s8129_s19, 4  ;;  %s8064_s29 = int_to_ptr.vmem [resolvable:$false] %s8063_s29 }
  0x7b   : > { %s8065_s23 = scalar_lea.vmem %s8064_s29, 65536  ;;  %p8066_p3 = scmp.lt.s32.totalorder %s8339_s10, %s8064_s29 }
  0x7c   : > { %p8061_p2 = pnand %p8059_p1, %p8273_p5  ;;  %p8067_p6 = scmp.lt.s32.totalorder %s8065_s23, %s8058_s1 }
  0x7e   : > { %p8062_p8 = pneg %p8061_p2  ;;  %p8068_p7 = por %p8067_p6, %p8066_p3 }
  0x80   : > { %p8069_p11 = pnand %p8068_p7, %p8062_p8 }
  0x82   : > { %8072 = shalt.err (!%p8069_p11)
}
  0x83   : > { %s8130_s8 = smov 256   ;;  %s8131_s21 = smov 16  }
  0x84   : > { %7468 = dma.hbm_to_vmem [thread:$0]  (!%p8241_p0), %s8337_s22, 32768, %s8339_s10, %s8267_s26, %s8130_s8, %s8130_s8, %s8131_s21  }
  0x85   : > { %p9428_p5 = scmp.ne.s32.totalorder %s9419_s12, 0 }
  0x86   : > { %p9429_p4 = scmp.eq.s32.totalorder (!%p9428_p5), %s8193_s28, 0 }
  0x87   : > { %322 = sbr.rel (%p9428_p5) target bundleno = 1442 (0x5a2), region = 48 }
  0x8c   : > { %8090 = dma.done.wait (%p9429_p4), [#allocation5], 2048   ;;  %p9430_p9 = pmov %p9429_p4 }
  0x8d   : > { %p9431_p13 = pmov %p9429_p4 }
  0x8e   : > { %8092 = vsyncadd (%p9430_p9), [#allocation5], 4294965248 }
  0x8f   : > { %8094 = dma.done.wait (%p9431_p13), [#allocation7], 128   ;;  %p9432_p10 = pmov %p9429_p4 }
  0x90   : > { %s332_s18 = sand.u32 1, %s8193_s28   ;;  %s334_s26 = sand.u32 1, %s8111_s25  }
  0x91   : > { %8096 = vsyncadd (%p9432_p10), [#allocation7], 4294967168  ;;  %s6615_s14 = sshll.u32 %s334_s26, 12  ;;  %s333_s12 = scalar_lea.sflag [#allocation5], %s332_s18 }
  0x92   : > { %s8374_s17 = scalar_lea.vmem [#allocation8], %s6615_s14  ;;  %p9433_p0 = scmp.ne.s32.totalorder %s9418_s11, 0 }
  0x94   : > { %8098 = dma.done.wait (%p9433_p0), %s333_s12, 98432  }
  0x95   : > { %8100 = vsyncadd (%p9433_p0), %s333_s12, 4294868864  ;;  %s6616_s27 = sshll.u32 %s334_s26, 3  ;;  %s6617_s22 = sshll.u32 %s334_s26, 11 }
  0x96   : > { %s8380_s16 = scalar_lea.vmem [#allocation9], %s6616_s27  ;;  %s8382_s10 = scalar_lea.vmem [#allocation10], %s6617_s22 }
  0x97   : > { %p9434_p12 = pmov %p9429_p4 }
  0x98   : > { %p9435_p1 = pmov %p9429_p4 }
  0x99   : > { %8102 = dma.done.wait (%p9434_p12), [#allocation7], 64  }
  0x9a   : > { %8104 = vsyncadd (%p9435_p1), [#allocation7], 4294967232  ;;  %p9436_p2 = scmp.ne.s32.totalorder %s8193_s28, 0 }
  0x9c   : > { %401 = sbr.rel (%p9436_p2) target bundleno = 383 (0x17f), region = 76 }
  0xa1   : > { %v411_v0 = vld [vmem:[#allocation4 + $0x40] sm:$0xff]  ;;  %v412_v2 = vld [vmem:[#allocation4 + $0x48] sm:$0xff]  ;;  %v8132_v8 = vmov 0   ;;  %v413_v15 = vld [vmem:[#allocation4 + $0x50] sm:$0xff]  ;;  %vm541_vm0 = vcmask 261120   ;;  %v8133_v34 = vmov 0.0   ;;  %v421_v35 = vlaneseq }
  0xa2   : > { %v415_v1 = vld [vmem:[#allocation4 + $0x60] sm:$0xff]  ;;  %v416_v4 = vld [vmem:[#allocation4 + $0x68] sm:$0xff]  ;;  %577 = vmatprep.mubr.bf16.mxu0 %v8132_v8  ;;  %618 = vmatprep.mubr.bf16.mxu1 %v8132_v8  ;;  %v417_v16 = vld [vmem:[#allocation4 + $0x70] sm:$0xff]  ;;  %753 = vst [vmem:[#allocation3] sm:$0xff] %v8133_v34 }
  0xa3   : > { %v6629_v3 = vcombine.high %v411_v0, %v415_v1  ;;  %v6628_v5 = vcombine.low %v411_v0, %v415_v1  ;;  %v403_v6 = vld [vmem:[#allocation4] sm:$0xff]  ;;  %v6631_v9 = vcombine.high %v412_v2, %v416_v4  ;;  %v6630_v10 = vcombine.low %v412_v2, %v416_v4  ;;  %v404_v12 = vld [vmem:[#allocation4 + $0x8] sm:$0xff]  ;;  %v414_v17 = vld [vmem:[#allocation4 + $0x58] sm:$0xff]  ;;  %754 = vst [vmem:[#allocation3 + $0x18] sm:$0xff] %v8133_v34 }
  0xa4   : > { %v407_v7 = vld [vmem:[#allocation4 + $0x20] sm:$0xff]  ;;  %v408_v13 = vld [vmem:[#allocation4 + $0x28] sm:$0xff]  ;;  %v418_v19 = vld [vmem:[#allocation4 + $0x78] sm:$0xff]  ;;  %v6633_v21 = vcombine.high %v413_v15, %v417_v16  ;;  %v6632_v28 = vcombine.low %v413_v15, %v417_v16  ;;  %755 = vst [vmem:[#allocation3 + $0x8] sm:$0xff] %v8133_v34  ;;  %v422_v36 = vshrl.u32 %v421_v35, 7 }
  0xa5   : > { %v6621_v11 = vcombine.high %v403_v6, %v407_v7  ;;  %557 = vmatprep.subr.bf16.mxu0 %v6629_v3  ;;  %v6623_v14 = vcombine.high %v404_v12, %v408_v13  ;;  %598 = vmatprep.subr.bf16.mxu1 %v6631_v9  ;;  %v6620_v18 = vcombine.low %v403_v6, %v407_v7  ;;  %v405_v23 = vld [vmem:[#allocation4 + $0x10] sm:$0xff]  ;;  %v406_v25 = vld [vmem:[#allocation4 + $0x18] sm:$0xff]  ;;  %v402_v27 = vld [vmem:[%s9395_s0] sm:$0xf] }
  0xa6   : > { %558 = vmatpush1.bf16.msra.mxu0 %v6628_v5  ;;  %599 = vmatpush1.bf16.msra.mxu1 %v6630_v10  ;;  %v6622_v20 = vcombine.low %v404_v12, %v408_v13  ;;  %v6635_v22 = vcombine.high %v414_v17, %v418_v19  ;;  %v409_v24 = vld [vmem:[#allocation4 + $0x30] sm:$0xff]  ;;  %v410_v26 = vld [vmem:[#allocation4 + $0x38] sm:$0xff]  ;;  %v6634_v29 = vcombine.low %v414_v17, %v418_v19  ;;  %v423_v37 = vsub.s32 0, %v422_v36  ;;  %v419_v38 = vld [vmem:[#allocation6] sm:$0xff] }
  0xa7   : > { %559 = vmatprep.subr.bf16.mxu0 %v6621_v11  ;;  %600 = vmatprep.subr.bf16.mxu1 %v6623_v14  ;;  %v6625_v30 = vcombine.high %v405_v23, %v409_v24  ;;  %v6627_v31 = vcombine.high %v406_v25, %v410_v26  ;;  %v6624_v32 = vcombine.low %v405_v23, %v409_v24  ;;  %v431_v39 = vsub.s32 2, %v422_v36 }
  0xa8   : > { %v6626_v33 = vcombine.low %v406_v25, %v410_v26  ;;  %756 = vst [vmem:[#allocation3 + $0x10] sm:$0xff] %v8133_v34  ;;  %v427_v40 = vsub.s32 1, %v422_v36  ;;  %v435_v41 = vsub.s32 3, %v422_v36  ;;  %v424_v42 = vrot.slane %v419_v38, %v423_v37 }
  0xa9   : > { %v432_v43 = vrot.slane %v419_v38, %v431_v39  ;;  %v439_v49 = vsub.s32 4, %v422_v36  ;;  %v447_v52 = vsub.s32 6, %v422_v36  ;;  %v443_v55 = vsub.s32 5, %v422_v36 }
  0xaa   : > { %560 = vmatpush1.bf16.msra.mxu0 %v6620_v18  ;;  %601 = vmatpush1.bf16.msra.mxu1 %v6622_v20  ;;  %v428_v44 = vrot.slane %v419_v38, %v427_v40  ;;  %v436_v46 = vrot.slane %v419_v38, %v435_v41  ;;  %v451_v58 = vsub.s32 7, %v422_v36 }
  0xab   : > { %639 = vmatprep.subr.bf16.mxu0 %v6633_v21  ;;  %680 = vmatprep.subr.bf16.mxu1 %v6635_v22  ;;  %v440_v62 = vrot.slane %v419_v38, %v439_v49  ;;  %v448_v2 = vrot.slane %v419_v38, %v447_v52  ;;  %v444_v5 = vrot.slane %v419_v38, %v443_v55 }
  0xad   : > { %6636 = vmatmul.mubr.msk.bf16.vlgmr.msra.gmra.mxu0 %vm541_vm0, %v402_v27  ;;  %6637 = vmatmul.mubr.msk.bf16.vlgmr.msra.gmra.mxu1 %vm541_vm0, %v402_v27 }
  0xae   : > { %640 = vmatpush1.bf16.msra.mxu0 %v6632_v28  ;;  %681 = vmatpush1.bf16.msra.mxu1 %v6634_v29 }
  0xaf   : > { %641 = vmatprep.subr.bf16.mxu0 %v6625_v30  ;;  %682 = vmatprep.subr.bf16.mxu1 %v6627_v31 }
  0xb0   : > { %659 = vmatprep.mubr.bf16.mxu0 %v8132_v8  ;;  %700 = vmatprep.mubr.bf16.mxu1 %v8132_v8  ;;  %v452_v8 = vrot.slane %v419_v38, %v451_v58 }
  0xb2   : > { %642 = vmatpush1.bf16.msra.mxu0 %v6624_v32  ;;  %683 = vmatpush1.bf16.msra.mxu1 %v6626_v33 }
  0xb5   : > { %6638 = vmatmul.mubr.msk.bf16.vlgmr.msra.gmra.mxu0 %vm541_vm0, %v402_v27  ;;  %6639 = vmatmul.mubr.msk.bf16.vlgmr.msra.gmra.mxu1 %vm541_vm0, %v402_v27 }
 0x16d   : > { %v579_v45 = vpop.f32.mrf.mxu0  ;;  %v620_v48 = vpop.f32.mrf.mxu1 }
 0x16e   : > { %v580_v47 = vadd.f32 %v579_v45, %v424_v42  ;;  %v621_v50 = vadd.f32 %v620_v48, %v432_v43 }
 0x16f   : > { %v581_v51 = vpop.f32.mrf.mxu0  ;;  %v622_v54 = vpop.f32.mrf.mxu1 }
 0x170   : > { %v582_v53 = vadd.f32 %v581_v51, %v428_v44  ;;  %v623_v56 = vadd.f32 %v622_v54, %v436_v46  ;;  %v709_v59 = vmax.f32 %v580_v47, 0.0  ;;  %v711_v63 = vmax.f32 %v621_v50, 0.0 }
 0x171   : > { %v583_v57 = vpop.f32.mrf.mxu0  ;;  %v624_v61 = vpop.f32.mrf.mxu1 }
 0x172   : > { %v710_v60 = vmax.f32 %v582_v53, 0.0  ;;  %v712_v0 = vmax.f32 %v623_v56, 0.0 }
 0x173   : > { %v584_v1 = vpop.f32.mrf.mxu0  ;;  %v625_v4 = vpop.f32.mrf.mxu1 }
 0x174   : > { %v7427_v3 = vpack.c.bf16 %v710_v60, %v709_v59  ;;  %v7428_v6 = vpack.c.bf16 %v712_v0, %v711_v63 }
 0x175   : > { %v661_v7 = vpop.f32.mrf.mxu0  ;;  %v702_v10 = vpop.f32.mrf.mxu1 }
 0x176   : > { %749 = vst [vmem:[#allocation2 + $0x10] sm:$0xff] %v7427_v3  ;;  %v662_v9 = vadd.f32 %v661_v7, %v440_v62  ;;  %750 = vst [vmem:[#allocation2] sm:$0xff] %v7428_v6  ;;  %v703_v11 = vadd.f32 %v702_v10, %v448_v2 }
 0x177   : > { %v663_v12 = vpop.f32.mrf.mxu0  ;;  %v704_v14 = vpop.f32.mrf.mxu1 }
 0x178   : > { %v664_v13 = vadd.f32 %v663_v12, %v444_v5  ;;  %v705_v15 = vadd.f32 %v704_v14, %v452_v8  ;;  %v713_v17 = vmax.f32 %v662_v9, 0.0  ;;  %v715_v20 = vmax.f32 %v703_v11, 0.0 }
 0x179   : > { %v665_v16 = vpop.f32.mrf.mxu0  ;;  %v706_v19 = vpop.f32.mrf.mxu1 }
 0x17a   : > { %v714_v18 = vmax.f32 %v664_v13, 0.0  ;;  %v716_v21 = vmax.f32 %v705_v15, 0.0 }
 0x17b   : > { %v666_v22 = vpop.f32.mrf.mxu0  ;;  %v707_v24 = vpop.f32.mrf.mxu1 }
 0x17c   : > { %v7429_v23 = vpack.c.bf16 %v714_v18, %v713_v17  ;;  %v7430_v25 = vpack.c.bf16 %v716_v21, %v715_v20 }
 0x17e   : > { %751 = vst [vmem:[#allocation2 + $0x18] sm:$0xff] %v7429_v23  ;;  %752 = vst [vmem:[#allocation2 + $0x8] sm:$0xff] %v7430_v25 }
 0x17f PF: > { %v817_v26 = vld [vmem:[%s8374_s17 + $0x1c0] sm:$0xff]  ;;  %v8425_v15 = vld [vmem:[#allocation2 + $0x10] sm:$0xff]  ;;  %v8427_v16 = vld [vmem:[#allocation2] sm:$0xff]  ;;  %p7420_p8 = scmp.ne.s32.totalorder %s8193_s28, 1 }
 0x180   : > { %v821_v27 = vld [vmem:[%s8374_s17 + $0x1e0] sm:$0xff]  ;;  %v8433_v20 = vcombine.high %v8425_v15, %v8425_v15  ;;  %v8437_v21 = vcombine.high %v8427_v16, %v8427_v16 }
 0x181   : > { %v945_v28 = vld [vmem:[%s8374_s17 + $0x5c0] sm:$0xff]  ;;  %v6709_v29 = vcombine.high %v817_v26, %v821_v27  ;;  %v6708_v31 = vcombine.low %v817_v26, %v821_v27 }
 0x182   : > { %v949_v30 = vld [vmem:[%s8374_s17 + $0x5e0] sm:$0xff]  ;;  %3935 = vmatprep.mubr.bf16.mxu0 %v8433_v20  ;;  %3976 = vmatprep.mubr.bf16.mxu1 %v8437_v21 }
 0x183   : > { %v809_v32 = vld [vmem:[%s8374_s17 + $0x180] sm:$0xff]  ;;  %v6837_v34 = vcombine.high %v945_v28, %v949_v30  ;;  %v6836_v35 = vcombine.low %v945_v28, %v949_v30  ;;  %3903 = vmatprep.subr.bf16.mxu0 %v6709_v29 }
 0x184   : > { %v813_v33 = vld [vmem:[%s8374_s17 + $0x1a0] sm:$0xff]  ;;  %3904 = vmatpush1.bf16.msra.mxu0 %v6708_v31 }
 0x185   : > { %v6701_v36 = vcombine.high %v809_v32, %v813_v33  ;;  %v937_v37 = vld [vmem:[%s8374_s17 + $0x580] sm:$0xff]  ;;  %3944 = vmatprep.subr.bf16.mxu1 %v6837_v34  ;;  %v6700_v44 = vcombine.low %v809_v32, %v813_v33 }
 0x186   : > { %v941_v38 = vld [vmem:[%s8374_s17 + $0x5a0] sm:$0xff]  ;;  %3945 = vmatpush1.bf16.msra.mxu1 %v6836_v35 }
 0x187   : > { %v801_v39 = vld [vmem:[%s8374_s17 + $0x140] sm:$0xff]  ;;  %v6829_v40 = vcombine.high %v937_v37, %v941_v38  ;;  %3905 = vmatprep.subr.bf16.mxu0 %v6701_v36  ;;  %v6828_v45 = vcombine.low %v937_v37, %v941_v38 }
 0x188   : > { %v805_v41 = vld [vmem:[%s8374_s17 + $0x160] sm:$0xff]  ;;  %3906 = vmatpush1.bf16.msra.mxu0 %v6700_v44 }
 0x189   : > { %v929_v42 = vld [vmem:[%s8374_s17 + $0x540] sm:$0xff]  ;;  %v6693_v46 = vcombine.high %v801_v39, %v805_v41  ;;  %3946 = vmatprep.subr.bf16.mxu1 %v6829_v40  ;;  %v6692_v52 = vcombine.low %v801_v39, %v805_v41 }
 0x18a   : > { %v933_v43 = vld [vmem:[%s8374_s17 + $0x560] sm:$0xff]  ;;  %3947 = vmatpush1.bf16.msra.mxu1 %v6828_v45 }
 0x18b   : > { %v6821_v47 = vcombine.high %v929_v42, %v933_v43  ;;  %v793_v48 = vld [vmem:[%s8374_s17 + $0x100] sm:$0xff]  ;;  %3907 = vmatprep.subr.bf16.mxu0 %v6693_v46  ;;  %v6820_v53 = vcombine.low %v929_v42, %v933_v43 }
 0x18c   : > { %v797_v49 = vld [vmem:[%s8374_s17 + $0x120] sm:$0xff]  ;;  %3908 = vmatpush1.bf16.msra.mxu0 %v6692_v52 }
 0x18d   : > { %v921_v50 = vld [vmem:[%s8374_s17 + $0x500] sm:$0xff]  ;;  %v6685_v54 = vcombine.high %v793_v48, %v797_v49  ;;  %3948 = vmatprep.subr.bf16.mxu1 %v6821_v47  ;;  %v6684_v60 = vcombine.low %v793_v48, %v797_v49 }
 0x18e   : > { %v925_v51 = vld [vmem:[%s8374_s17 + $0x520] sm:$0xff]  ;;  %3949 = vmatpush1.bf16.msra.mxu1 %v6820_v53 }
 0x18f   : > { %v6813_v55 = vcombine.high %v921_v50, %v925_v51  ;;  %v785_v56 = vld [vmem:[%s8374_s17 + $0xc0] sm:$0xff]  ;;  %3909 = vmatprep.subr.bf16.mxu0 %v6685_v54  ;;  %v6812_v61 = vcombine.low %v921_v50, %v925_v51 }
 0x190   : > { %v789_v57 = vld [vmem:[%s8374_s17 + $0xe0] sm:$0xff]  ;;  %3910 = vmatpush1.bf16.msra.mxu0 %v6684_v60 }
 0x191   : > { %v913_v58 = vld [vmem:[%s8374_s17 + $0x4c0] sm:$0xff]  ;;  %v6677_v62 = vcombine.high %v785_v56, %v789_v57  ;;  %3950 = vmatprep.subr.bf16.mxu1 %v6813_v55  ;;  %v6676_v4 = vcombine.low %v785_v56, %v789_v57 }
 0x192   : > { %v917_v59 = vld [vmem:[%s8374_s17 + $0x4e0] sm:$0xff]  ;;  %3951 = vmatpush1.bf16.msra.mxu1 %v6812_v61 }
 0x193   : > { %v6805_v63 = vcombine.high %v913_v58, %v917_v59  ;;  %v777_v0 = vld [vmem:[%s8374_s17 + $0x80] sm:$0xff]  ;;  %3911 = vmatprep.subr.bf16.mxu0 %v6677_v62  ;;  %v6804_v5 = vcombine.low %v913_v58, %v917_v59 }
 0x194   : > { %v781_v1 = vld [vmem:[%s8374_s17 + $0xa0] sm:$0xff]  ;;  %3912 = vmatpush1.bf16.msra.mxu0 %v6676_v4 }
 0x195   : > { %v905_v2 = vld [vmem:[%s8374_s17 + $0x480] sm:$0xff]  ;;  %v6669_v6 = vcombine.high %v777_v0, %v781_v1  ;;  %3952 = vmatprep.subr.bf16.mxu1 %v6805_v63  ;;  %v6668_v12 = vcombine.low %v777_v0, %v781_v1 }
 0x196   : > { %v909_v3 = vld [vmem:[%s8374_s17 + $0x4a0] sm:$0xff]  ;;  %3953 = vmatpush1.bf16.msra.mxu1 %v6804_v5 }
 0x197   : > { %v6797_v7 = vcombine.high %v905_v2, %v909_v3  ;;  %v769_v8 = vld [vmem:[%s8374_s17 + $0x40] sm:$0xff]  ;;  %3913 = vmatprep.subr.bf16.mxu0 %v6669_v6  ;;  %v6796_v13 = vcombine.low %v905_v2, %v909_v3 }
 0x198   : > { %v773_v9 = vld [vmem:[%s8374_s17 + $0x60] sm:$0xff]  ;;  %3914 = vmatpush1.bf16.msra.mxu0 %v6668_v12 }
 0x199   : > { %v897_v10 = vld [vmem:[%s8374_s17 + $0x440] sm:$0xff]  ;;  %v6661_v14 = vcombine.high %v769_v8, %v773_v9  ;;  %3954 = vmatprep.subr.bf16.mxu1 %v6797_v7  ;;  %v6660_v24 = vcombine.low %v769_v8, %v773_v9 }
 0x19a   : > { %v901_v11 = vld [vmem:[%s8374_s17 + $0x460] sm:$0xff]  ;;  %3955 = vmatpush1.bf16.msra.mxu1 %v6796_v13 }
 0x19b   : > { %v6789_v17 = vcombine.high %v897_v10, %v901_v11  ;;  %v761_v18 = vld [vmem:[%s8374_s17] sm:$0xff]  ;;  %3915 = vmatprep.subr.bf16.mxu0 %v6661_v14  ;;  %v6788_v25 = vcombine.low %v897_v10, %v901_v11 }
 0x19c   : > { %v765_v19 = vld [vmem:[%s8374_s17 + $0x20] sm:$0xff]  ;;  %3916 = vmatpush1.bf16.msra.mxu0 %v6660_v24 }
 0x19d   : > { %v889_v22 = vld [vmem:[%s8374_s17 + $0x400] sm:$0xff]  ;;  %v6653_v26 = vcombine.high %v761_v18, %v765_v19  ;;  %3956 = vmatprep.subr.bf16.mxu1 %v6789_v17  ;;  %v6652_v32 = vcombine.low %v761_v18, %v765_v19 }
 0x19e   : > { %v893_v23 = vld [vmem:[%s8374_s17 + $0x420] sm:$0xff]  ;;  %3957 = vmatpush1.bf16.msra.mxu1 %v6788_v25 }
 0x19f   : > { %v6781_v27 = vcombine.high %v889_v22, %v893_v23  ;;  %v881_v28 = vld [vmem:[%s8374_s17 + $0x3c0] sm:$0xff]  ;;  %3917 = vmatprep.subr.bf16.mxu0 %v6653_v26  ;;  %v6780_v33 = vcombine.low %v889_v22, %v893_v23 }
 0x1a0   : > { %v885_v29 = vld [vmem:[%s8374_s17 + $0x3e0] sm:$0xff]  ;;  %3918 = vmatpush1.bf16.msra.mxu0 %v6652_v32 }
 0x1a1   : > { %v1009_v30 = vld [vmem:[%s8374_s17 + $0x7c0] sm:$0xff]  ;;  %v6773_v34 = vcombine.high %v881_v28, %v885_v29  ;;  %3958 = vmatprep.subr.bf16.mxu1 %v6781_v27  ;;  %v6772_v40 = vcombine.low %v881_v28, %v885_v29 }
 0x1a2   : > { %v1013_v31 = vld [vmem:[%s8374_s17 + $0x7e0] sm:$0xff]  ;;  %3959 = vmatpush1.bf16.msra.mxu1 %v6780_v33 }
 0x1a3   : > { %v6901_v35 = vcombine.high %v1009_v30, %v1013_v31  ;;  %v873_v36 = vld [vmem:[%s8374_s17 + $0x380] sm:$0xff]  ;;  %3919 = vmatprep.subr.bf16.mxu0 %v6773_v34  ;;  %v6900_v41 = vcombine.low %v1009_v30, %v1013_v31 }
 0x1a4   : > { %v877_v37 = vld [vmem:[%s8374_s17 + $0x3a0] sm:$0xff]  ;;  %3920 = vmatpush2.bf16.msra.mxu0 %v6772_v40 }
 0x1a5   : > { %v1001_v38 = vld [vmem:[%s8374_s17 + $0x780] sm:$0xff]  ;;  %v6765_v42 = vcombine.high %v873_v36, %v877_v37  ;;  %3960 = vmatprep.subr.bf16.mxu1 %v6901_v35  ;;  %v6764_v48 = vcombine.low %v873_v36, %v877_v37 }
 0x1a6   : > { %v1005_v39 = vld [vmem:[%s8374_s17 + $0x7a0] sm:$0xff]  ;;  %3961 = vmatpush2.bf16.msra.mxu1 %v6900_v41 }
 0x1a7   : > { %v6893_v43 = vcombine.high %v1001_v38, %v1005_v39  ;;  %v865_v44 = vld [vmem:[%s8374_s17 + $0x340] sm:$0xff]  ;;  %3921 = vmatprep.subr.bf16.mxu0 %v6765_v42  ;;  %v6892_v49 = vcombine.low %v1001_v38, %v1005_v39  ;;  %v8483_v42 = vcombine.low %v8425_v15, %v8425_v15 }
 0x1a8   : > { %v869_v45 = vld [vmem:[%s8374_s17 + $0x360] sm:$0xff]  ;;  %3922 = vmatpush2.bf16.msra.mxu0 %v6764_v48 }
 0x1a9   : > { %v993_v46 = vld [vmem:[%s8374_s17 + $0x740] sm:$0xff]  ;;  %v6757_v50 = vcombine.high %v865_v44, %v869_v45  ;;  %3962 = vmatprep.subr.bf16.mxu1 %v6893_v43  ;;  %v6756_v56 = vcombine.low %v865_v44, %v869_v45  ;;  %v8487_v45 = vld [vmem:[#allocation2 + $0x18] sm:$0xff] }
 0x1aa   : > { %v997_v47 = vld [vmem:[%s8374_s17 + $0x760] sm:$0xff]  ;;  %3963 = vmatpush2.bf16.msra.mxu1 %v6892_v49 }
 0x1ab   : > { %v6885_v51 = vcombine.high %v993_v46, %v997_v47  ;;  %v857_v52 = vld [vmem:[%s8374_s17 + $0x300] sm:$0xff]  ;;  %3923 = vmatprep.subr.bf16.mxu0 %v6757_v50  ;;  %v6884_v57 = vcombine.low %v993_v46, %v997_v47  ;;  %v8491_v46 = vcombine.low %v8427_v16, %v8427_v16  ;;  %v8501_v16 = vcombine.high %v8487_v45, %v8487_v45 }
 0x1ac   : > { %v861_v53 = vld [vmem:[%s8374_s17 + $0x320] sm:$0xff]  ;;  %3924 = vmatpush2.bf16.msra.mxu0 %v6756_v56 }
 0x1ad   : > { %v985_v54 = vld [vmem:[%s8374_s17 + $0x700] sm:$0xff]  ;;  %v6749_v58 = vcombine.high %v857_v52, %v861_v53  ;;  %3964 = vmatprep.subr.bf16.mxu1 %v6885_v51  ;;  %v6748_v0 = vcombine.low %v857_v52, %v861_v53 }
 0x1ae   : > { %v989_v55 = vld [vmem:[%s8374_s17 + $0x720] sm:$0xff]  ;;  %3965 = vmatpush2.bf16.msra.mxu1 %v6884_v57 }
 0x1af   : > { %v6877_v59 = vcombine.high %v985_v54, %v989_v55  ;;  %v849_v60 = vld [vmem:[%s8374_s17 + $0x2c0] sm:$0xff]  ;;  %3925 = vmatprep.subr.bf16.mxu0 %v6749_v58  ;;  %v6876_v1 = vcombine.low %v985_v54, %v989_v55 }
 0x1b0   : > { %v853_v61 = vld [vmem:[%s8374_s17 + $0x2e0] sm:$0xff]  ;;  %3926 = vmatpush2.bf16.msra.mxu0 %v6748_v0 }
 0x1b1   : > { %v977_v62 = vld [vmem:[%s8374_s17 + $0x6c0] sm:$0xff]  ;;  %v6741_v2 = vcombine.high %v849_v60, %v853_v61  ;;  %3966 = vmatprep.subr.bf16.mxu1 %v6877_v59  ;;  %v6740_v8 = vcombine.low %v849_v60, %v853_v61 }
 0x1b2   : > { %v981_v63 = vld [vmem:[%s8374_s17 + $0x6e0] sm:$0xff]  ;;  %3967 = vmatpush2.bf16.msra.mxu1 %v6876_v1 }
 0x1b3   : > { %v6869_v3 = vcombine.high %v977_v62, %v981_v63  ;;  %v841_v4 = vld [vmem:[%s8374_s17 + $0x280] sm:$0xff]  ;;  %3927 = vmatprep.subr.bf16.mxu0 %v6741_v2  ;;  %v6868_v9 = vcombine.low %v977_v62, %v981_v63 }
 0x1b4   : > { %v845_v5 = vld [vmem:[%s8374_s17 + $0x2a0] sm:$0xff]  ;;  %3928 = vmatpush2.bf16.msra.mxu0 %v6740_v8 }
 0x1b5   : > { %v969_v6 = vld [vmem:[%s8374_s17 + $0x680] sm:$0xff]  ;;  %v6733_v10 = vcombine.high %v841_v4, %v845_v5  ;;  %3968 = vmatprep.subr.bf16.mxu1 %v6869_v3  ;;  %v6732_v18 = vcombine.low %v841_v4, %v845_v5 }
 0x1b6   : > { %v973_v7 = vld [vmem:[%s8374_s17 + $0x6a0] sm:$0xff]  ;;  %3969 = vmatpush2.bf16.msra.mxu1 %v6868_v9 }
 0x1b7   : > { %v6861_v11 = vcombine.high %v969_v6, %v973_v7  ;;  %v833_v12 = vld [vmem:[%s8374_s17 + $0x240] sm:$0xff]  ;;  %3929 = vmatprep.subr.bf16.mxu0 %v6733_v10  ;;  %v6860_v19 = vcombine.low %v969_v6, %v973_v7 }
 0x1b8   : > { %v837_v13 = vld [vmem:[%s8374_s17 + $0x260] sm:$0xff]  ;;  %3930 = vmatpush2.bf16.msra.mxu0 %v6732_v18 }
 0x1b9   : > { %v961_v14 = vld [vmem:[%s8374_s17 + $0x640] sm:$0xff]  ;;  %v6725_v22 = vcombine.high %v833_v12, %v837_v13  ;;  %3970 = vmatprep.subr.bf16.mxu1 %v6861_v11  ;;  %v6724_v28 = vcombine.low %v833_v12, %v837_v13 }
 0x1ba   : > { %v965_v17 = vld [vmem:[%s8374_s17 + $0x660] sm:$0xff]  ;;  %3971 = vmatpush2.bf16.msra.mxu1 %v6860_v19 }
 0x1bb   : > { %v6853_v23 = vcombine.high %v961_v14, %v965_v17  ;;  %v825_v24 = vld [vmem:[%s8374_s17 + $0x200] sm:$0xff]  ;;  %3931 = vmatprep.subr.bf16.mxu0 %v6725_v22  ;;  %v6852_v29 = vcombine.low %v961_v14, %v965_v17 }
 0x1bc   : > { %v829_v25 = vld [vmem:[%s8374_s17 + $0x220] sm:$0xff]  ;;  %3932 = vmatpush2.bf16.msra.mxu0 %v6724_v28 }
 0x1bd   : > { %v953_v26 = vld [vmem:[%s8374_s17 + $0x600] sm:$0xff]  ;;  %v6717_v30 = vcombine.high %v825_v24, %v829_v25  ;;  %3972 = vmatprep.subr.bf16.mxu1 %v6853_v23  ;;  %v6716_v36 = vcombine.low %v825_v24, %v829_v25 }
 0x1be   : > { %v957_v27 = vld [vmem:[%s8374_s17 + $0x620] sm:$0xff]  ;;  %3973 = vmatpush2.bf16.msra.mxu1 %v6852_v29 }
 0x1bf   : > { %v6845_v31 = vcombine.high %v953_v26, %v957_v27  ;;  %v1073_v32 = vld [vmem:[%s8374_s17 + $0x9c0] sm:$0xff]  ;;  %3933 = vmatprep.subr.bf16.mxu0 %v6717_v30  ;;  %v6844_v37 = vcombine.low %v953_v26, %v957_v27 }
 0x1c0   : > { %v1077_v33 = vld [vmem:[%s8374_s17 + $0x9e0] sm:$0xff]  ;;  %3934 = vmatpush2.bf16.msra.mxu0 %v6716_v36 }
 0x1c1   : > { %v1201_v34 = vld [vmem:[%s8374_s17 + $0xdc0] sm:$0xff]  ;;  %v6965_v38 = vcombine.high %v1073_v32, %v1077_v33  ;;  %3974 = vmatprep.subr.bf16.mxu1 %v6845_v31  ;;  %v6964_v47 = vcombine.low %v1073_v32, %v1077_v33 }
 0x1c2   : > { %v1205_v35 = vld [vmem:[%s8374_s17 + $0xde0] sm:$0xff]  ;;  %3975 = vmatpush2.bf16.msra.mxu1 %v6844_v37 }
 0x1c3   : > { %v7093_v39 = vcombine.high %v1201_v34, %v1205_v35  ;;  %v1065_v40 = vld [vmem:[%s8374_s17 + $0x980] sm:$0xff]  ;;  %3985 = vmatprep.subr.bf16.mxu0 %v6965_v38  ;;  %v7092_v49 = vcombine.low %v1201_v34, %v1205_v35  ;;  %3936 = vmatmul.mubr.bf16.vlgmr.msra.gmra.mxu0 %v8483_v42 }
 0x1c4   : > { %v1069_v41 = vld [vmem:[%s8374_s17 + $0x9a0] sm:$0xff]  ;;  %3986 = vmatpush1.bf16.msra.mxu0 %v6964_v47  ;;  %4017 = vmatprep.mubr.bf16.mxu0 %v8501_v16 }
 0x1c5   : > { %v1193_v43 = vld [vmem:[%s8374_s17 + $0xd80] sm:$0xff]  ;;  %v6957_v50 = vcombine.high %v1065_v40, %v1069_v41  ;;  %4026 = vmatprep.subr.bf16.mxu1 %v7093_v39  ;;  %3977 = vmatmul.mubr.bf16.vlgmr.msra.gmra.mxu1 %v8491_v46  ;;  %v6956_v56 = vcombine.low %v1065_v40, %v1069_v41 }
 0x1c6   : > { %v1197_v44 = vld [vmem:[%s8374_s17 + $0xda0] sm:$0xff]  ;;  %4027 = vmatpush1.bf16.msra.mxu1 %v7092_v49 }
 0x1c7   : > { %v8493_v48 = vld [vmem:[#allocation2 + $0x8] sm:$0xff]  ;;  %v7085_v52 = vcombine.high %v1193_v43, %v1197_v44  ;;  %3987 = vmatprep.subr.bf16.mxu0 %v6957_v50  ;;  %v7084_v57 = vcombine.low %v1193_v43, %v1197_v44 }
 0x1c8   : > { %v1057_v15 = vld [vmem:[%s8374_s17 + $0x940] sm:$0xff]  ;;  %v8506_v55 = vcombine.high %v8493_v48, %v8493_v48  ;;  %3988 = vmatpush1.bf16.msra.mxu0 %v6956_v56 }
 0x1c9   : > { %v1061_v51 = vld [vmem:[%s8374_s17 + $0x960] sm:$0xff]  ;;  %4028 = vmatprep.subr.bf16.mxu1 %v7085_v52 }
 0x1ca   : > { %v1185_v53 = vld [vmem:[%s8374_s17 + $0xd40] sm:$0xff]  ;;  %v6949_v58 = vcombine.high %v1057_v15, %v1061_v51  ;;  %4058 = vmatprep.mubr.bf16.mxu1 %v8506_v55  ;;  %v6948_v0 = vcombine.low %v1057_v15, %v1061_v51  ;;  %4029 = vmatpush1.bf16.msra.mxu1 %v7084_v57 }
 0x1cb   : > { %v1189_v54 = vld [vmem:[%s8374_s17 + $0xd60] sm:$0xff] }
 0x1cc   : > { %v1049_v59 = vld [vmem:[%s8374_s17 + $0x900] sm:$0xff]  ;;  %v7077_v62 = vcombine.high %v1185_v53, %v1189_v54  ;;  %3989 = vmatprep.subr.bf16.mxu0 %v6949_v58  ;;  %v7076_v1 = vcombine.low %v1185_v53, %v1189_v54 }
 0x1cd   : > { %v1053_v60 = vld [vmem:[%s8374_s17 + $0x920] sm:$0xff]  ;;  %3990 = vmatpush1.bf16.msra.mxu0 %v6948_v0 }
 0x1ce   : > { %v1177_v61 = vld [vmem:[%s8374_s17 + $0xd00] sm:$0xff]  ;;  %v6941_v2 = vcombine.high %v1049_v59, %v1053_v60  ;;  %4030 = vmatprep.subr.bf16.mxu1 %v7077_v62  ;;  %v6940_v8 = vcombine.low %v1049_v59, %v1053_v60 }
 0x1cf   : > { %v1181_v63 = vld [vmem:[%s8374_s17 + $0xd20] sm:$0xff]  ;;  %4031 = vmatpush1.bf16.msra.mxu1 %v7076_v1 }
 0x1d0   : > { %v1041_v3 = vld [vmem:[%s8374_s17 + $0x8c0] sm:$0xff]  ;;  %v7069_v6 = vcombine.high %v1177_v61, %v1181_v63  ;;  %3991 = vmatprep.subr.bf16.mxu0 %v6941_v2  ;;  %v7068_v9 = vcombine.low %v1177_v61, %v1181_v63 }
 0x1d1   : > { %v1045_v4 = vld [vmem:[%s8374_s17 + $0x8e0] sm:$0xff]  ;;  %3992 = vmatpush1.bf16.msra.mxu0 %v6940_v8 }
 0x1d2   : > { %v1169_v5 = vld [vmem:[%s8374_s17 + $0xcc0] sm:$0xff]  ;;  %v6933_v10 = vcombine.high %v1041_v3, %v1045_v4  ;;  %4032 = vmatprep.subr.bf16.mxu1 %v7069_v6  ;;  %v6932_v18 = vcombine.low %v1041_v3, %v1045_v4 }
 0x1d3   : > { %v1173_v7 = vld [vmem:[%s8374_s17 + $0xce0] sm:$0xff]  ;;  %4033 = vmatpush1.bf16.msra.mxu1 %v7068_v9 }
 0x1d4   : > { %v1033_v11 = vld [vmem:[%s8374_s17 + $0x880] sm:$0xff]  ;;  %v7061_v14 = vcombine.high %v1169_v5, %v1173_v7  ;;  %3993 = vmatprep.subr.bf16.mxu0 %v6933_v10  ;;  %v7060_v19 = vcombine.low %v1169_v5, %v1173_v7 }
 0x1d5   : > { %v1037_v12 = vld [vmem:[%s8374_s17 + $0x8a0] sm:$0xff]  ;;  %3994 = vmatpush1.bf16.msra.mxu0 %v6932_v18 }
 0x1d6   : > { %v1161_v13 = vld [vmem:[%s8374_s17 + $0xc80] sm:$0xff]  ;;  %v6925_v22 = vcombine.high %v1033_v11, %v1037_v12  ;;  %4034 = vmatprep.subr.bf16.mxu1 %v7061_v14  ;;  %v6924_v28 = vcombine.low %v1033_v11, %v1037_v12 }
 0x1d7   : > { %v1165_v17 = vld [vmem:[%s8374_s17 + $0xca0] sm:$0xff]  ;;  %4035 = vmatpush1.bf16.msra.mxu1 %v7060_v19 }
 0x1d8   : > { %v1025_v23 = vld [vmem:[%s8374_s17 + $0x840] sm:$0xff]  ;;  %v7053_v26 = vcombine.high %v1161_v13, %v1165_v17  ;;  %3995 = vmatprep.subr.bf16.mxu0 %v6925_v22  ;;  %v7052_v29 = vcombine.low %v1161_v13, %v1165_v17 }
 0x1d9   : > { %v1029_v24 = vld [vmem:[%s8374_s17 + $0x860] sm:$0xff]  ;;  %3996 = vmatpush1.bf16.msra.mxu0 %v6924_v28 }
 0x1da   : > { %v1153_v25 = vld [vmem:[%s8374_s17 + $0xc40] sm:$0xff]  ;;  %v6917_v30 = vcombine.high %v1025_v23, %v1029_v24  ;;  %4036 = vmatprep.subr.bf16.mxu1 %v7053_v26  ;;  %v6916_v36 = vcombine.low %v1025_v23, %v1029_v24 }
 0x1db   : > { %v1157_v27 = vld [vmem:[%s8374_s17 + $0xc60] sm:$0xff]  ;;  %4037 = vmatpush1.bf16.msra.mxu1 %v7052_v29 }
 0x1dc   : > { %v1017_v31 = vld [vmem:[%s8374_s17 + $0x800] sm:$0xff]  ;;  %v7045_v34 = vcombine.high %v1153_v25, %v1157_v27  ;;  %3997 = vmatprep.subr.bf16.mxu0 %v6917_v30  ;;  %v7044_v37 = vcombine.low %v1153_v25, %v1157_v27 }
 0x1dd   : > { %v1021_v32 = vld [vmem:[%s8374_s17 + $0x820] sm:$0xff]  ;;  %3998 = vmatpush1.bf16.msra.mxu0 %v6916_v36 }
 0x1de   : > { %v1145_v33 = vld [vmem:[%s8374_s17 + $0xc00] sm:$0xff]  ;;  %v6909_v38 = vcombine.high %v1017_v31, %v1021_v32  ;;  %4038 = vmatprep.subr.bf16.mxu1 %v7045_v34  ;;  %v6908_v47 = vcombine.low %v1017_v31, %v1021_v32 }
 0x1df   : > { %v1149_v35 = vld [vmem:[%s8374_s17 + $0xc20] sm:$0xff]  ;;  %4039 = vmatpush1.bf16.msra.mxu1 %v7044_v37 }
 0x1e0   : > { %v1137_v39 = vld [vmem:[%s8374_s17 + $0xbc0] sm:$0xff]  ;;  %v7037_v43 = vcombine.high %v1145_v33, %v1149_v35  ;;  %3999 = vmatprep.subr.bf16.mxu0 %v6909_v38  ;;  %v7036_v49 = vcombine.low %v1145_v33, %v1149_v35 }
 0x1e1   : > { %v1141_v40 = vld [vmem:[%s8374_s17 + $0xbe0] sm:$0xff]  ;;  %4000 = vmatpush1.bf16.msra.mxu0 %v6908_v47 }
 0x1e2   : > { %v1265_v41 = vld [vmem:[%s8374_s17 + $0xfc0] sm:$0xff]  ;;  %v7029_v50 = vcombine.high %v1137_v39, %v1141_v40  ;;  %4040 = vmatprep.subr.bf16.mxu1 %v7037_v43  ;;  %v7028_v56 = vcombine.low %v1137_v39, %v1141_v40 }
 0x1e3   : > { %v1269_v44 = vld [vmem:[%s8374_s17 + $0xfe0] sm:$0xff]  ;;  %4041 = vmatpush1.bf16.msra.mxu1 %v7036_v49 }
 0x1e4   : > { %v1129_v15 = vld [vmem:[%s8374_s17 + $0xb80] sm:$0xff]  ;;  %v7157_v53 = vcombine.high %v1265_v41, %v1269_v44  ;;  %4001 = vmatprep.subr.bf16.mxu0 %v7029_v50  ;;  %v7156_v57 = vcombine.low %v1265_v41, %v1269_v44 }
 0x1e5   : > { %v1133_v51 = vld [vmem:[%s8374_s17 + $0xba0] sm:$0xff]  ;;  %4002 = vmatpush2.bf16.msra.mxu0 %v7028_v56 }
 0x1e6   : > { %v1257_v52 = vld [vmem:[%s8374_s17 + $0xf80] sm:$0xff]  ;;  %v7021_v58 = vcombine.high %v1129_v15, %v1133_v51  ;;  %4042 = vmatprep.subr.bf16.mxu1 %v7157_v53  ;;  %v7020_v0 = vcombine.low %v1129_v15, %v1133_v51  ;;  %v818_v15 = vld [vmem:[%s8374_s17 + $0x1c8] sm:$0xff] }
 0x1e7   : > { %v1261_v54 = vld [vmem:[%s8374_s17 + $0xfa0] sm:$0xff]  ;;  %4043 = vmatpush2.bf16.msra.mxu1 %v7156_v57  ;;  %v822_v51 = vld [vmem:[%s8374_s17 + $0x1e8] sm:$0xff] }
 0x1e8   : > { %v1121_v59 = vld [vmem:[%s8374_s17 + $0xb40] sm:$0xff]  ;;  %v7149_v62 = vcombine.high %v1257_v52, %v1261_v54  ;;  %4003 = vmatprep.subr.bf16.mxu0 %v7021_v58  ;;  %v7148_v1 = vcombine.low %v1257_v52, %v1261_v54  ;;  %v946_v52 = vld [vmem:[%s8374_s17 + $0x5c8] sm:$0xff]  ;;  %v6711_v58 = vcombine.high %v818_v15, %v822_v51 }
 0x1e9   : > { %v1125_v60 = vld [vmem:[%s8374_s17 + $0xb60] sm:$0xff]  ;;  %4004 = vmatpush2.bf16.msra.mxu0 %v7020_v0  ;;  %v950_v54 = vld [vmem:[%s8374_s17 + $0x5e8] sm:$0xff]  ;;  %v8573_v0 = vcombine.low %v8487_v45, %v8487_v45 }
 0x1ea   : > { %v1249_v61 = vld [vmem:[%s8374_s17 + $0xf40] sm:$0xff]  ;;  %v7013_v2 = vcombine.high %v1121_v59, %v1125_v60  ;;  %4044 = vmatprep.subr.bf16.mxu1 %v7149_v62  ;;  %v7012_v8 = vcombine.low %v1121_v59, %v1125_v60  ;;  %v810_v59 = vld [vmem:[%s8374_s17 + $0x188] sm:$0xff]  ;;  %v6839_v62 = vcombine.high %v946_v52, %v950_v54 }
 0x1eb   : > { %v1253_v63 = vld [vmem:[%s8374_s17 + $0xf60] sm:$0xff]  ;;  %4045 = vmatpush2.bf16.msra.mxu1 %v7148_v1  ;;  %v814_v60 = vld [vmem:[%s8374_s17 + $0x1a8] sm:$0xff]  ;;  %v8577_v1 = vcombine.low %v8493_v48, %v8493_v48 }
 0x1ec   : > { %v1113_v3 = vld [vmem:[%s8374_s17 + $0xb00] sm:$0xff]  ;;  %v7141_v6 = vcombine.high %v1249_v61, %v1253_v63  ;;  %4005 = vmatprep.subr.bf16.mxu0 %v7013_v2  ;;  %v7140_v9 = vcombine.low %v1249_v61, %v1253_v63  ;;  %v938_v61 = vld [vmem:[%s8374_s17 + $0x588] sm:$0xff]  ;;  %v6710_v2 = vcombine.low %v818_v15, %v822_v51  ;;  %v6702_v48 = vcombine.low %v810_v59, %v814_v60 }
 0x1ed   : > { %v1117_v4 = vld [vmem:[%s8374_s17 + $0xb20] sm:$0xff]  ;;  %4006 = vmatpush2.bf16.msra.mxu0 %v7012_v8  ;;  %v942_v63 = vld [vmem:[%s8374_s17 + $0x5a8] sm:$0xff] }
 0x1ee   : > { %v1241_v5 = vld [vmem:[%s8374_s17 + $0xf00] sm:$0xff]  ;;  %v7005_v10 = vcombine.high %v1113_v3, %v1117_v4  ;;  %4046 = vmatprep.subr.bf16.mxu1 %v7141_v6  ;;  %v7004_v18 = vcombine.low %v1113_v3, %v1117_v4  ;;  %v6838_v3 = vcombine.low %v946_v52, %v950_v54  ;;  %v6703_v4 = vcombine.high %v810_v59, %v814_v60  ;;  %v806_v6 = vld [vmem:[%s8374_s17 + $0x168] sm:$0xff] }
 0x1ef   : > { %v1245_v7 = vld [vmem:[%s8374_s17 + $0xf20] sm:$0xff]  ;;  %4047 = vmatpush2.bf16.msra.mxu1 %v7140_v9  ;;  %v930_v45 = vld [vmem:[%s8374_s17 + $0x548] sm:$0xff]  ;;  %v6830_v9 = vcombine.low %v938_v61, %v942_v63 }
 0x1f0   : > { %v1105_v11 = vld [vmem:[%s8374_s17 + $0xac0] sm:$0xff]  ;;  %v7133_v14 = vcombine.high %v1241_v5, %v1245_v7  ;;  %4007 = vmatprep.subr.bf16.mxu0 %v7005_v10  ;;  %v7132_v19 = vcombine.low %v1241_v5, %v1245_v7  ;;  %v802_v5 = vld [vmem:[%s8374_s17 + $0x148] sm:$0xff]  ;;  %v6831_v7 = vcombine.high %v938_v61, %v942_v63 }
 0x1f1   : > { %v1109_v12 = vld [vmem:[%s8374_s17 + $0xae0] sm:$0xff]  ;;  %4008 = vmatpush2.bf16.msra.mxu0 %v7004_v18  ;;  %v934_v8 = vld [vmem:[%s8374_s17 + $0x568] sm:$0xff]  ;;  %v6695_v10 = vcombine.high %v802_v5, %v806_v6  ;;  %v6694_v18 = vcombine.low %v802_v5, %v806_v6 }
 0x1f2   : > { %v1233_v13 = vld [vmem:[%s8374_s17 + $0xec0] sm:$0xff]  ;;  %v6997_v22 = vcombine.high %v1105_v11, %v1109_v12  ;;  %4048 = vmatprep.subr.bf16.mxu1 %v7133_v14  ;;  %v6996_v28 = vcombine.low %v1105_v11, %v1109_v12  ;;  %v794_v11 = vld [vmem:[%s8374_s17 + $0x108] sm:$0xff]  ;;  %v6823_v14 = vcombine.high %v930_v45, %v934_v8 }
 0x1f3   : > { %v1237_v17 = vld [vmem:[%s8374_s17 + $0xee0] sm:$0xff]  ;;  %4049 = vmatpush2.bf16.msra.mxu1 %v7132_v19  ;;  %v798_v12 = vld [vmem:[%s8374_s17 + $0x128] sm:$0xff]  ;;  %v6822_v19 = vcombine.low %v930_v45, %v934_v8 }
 0x1f4   : > { %v1097_v23 = vld [vmem:[%s8374_s17 + $0xa80] sm:$0xff]  ;;  %v7125_v26 = vcombine.high %v1233_v13, %v1237_v17  ;;  %4009 = vmatprep.subr.bf16.mxu0 %v6997_v22  ;;  %v7124_v29 = vcombine.low %v1233_v13, %v1237_v17  ;;  %v922_v13 = vld [vmem:[%s8374_s17 + $0x508] sm:$0xff]  ;;  %v6687_v22 = vcombine.high %v794_v11, %v798_v12 }
 0x1f5   : > { %v1101_v24 = vld [vmem:[%s8374_s17 + $0xaa0] sm:$0xff]  ;;  %4010 = vmatpush2.bf16.msra.mxu0 %v6996_v28  ;;  %v926_v17 = vld [vmem:[%s8374_s17 + $0x528] sm:$0xff]  ;;  %v6686_v28 = vcombine.low %v794_v11, %v798_v12 }
 0x1f6   : > { %v1225_v25 = vld [vmem:[%s8374_s17 + $0xe80] sm:$0xff]  ;;  %v6989_v30 = vcombine.high %v1097_v23, %v1101_v24  ;;  %4050 = vmatprep.subr.bf16.mxu1 %v7125_v26  ;;  %v6988_v36 = vcombine.low %v1097_v23, %v1101_v24  ;;  %v786_v23 = vld [vmem:[%s8374_s17 + $0xc8] sm:$0xff]  ;;  %v6815_v26 = vcombine.high %v922_v13, %v926_v17 }
 0x1f7   : > { %v1229_v27 = vld [vmem:[%s8374_s17 + $0xea0] sm:$0xff]  ;;  %4051 = vmatpush2.bf16.msra.mxu1 %v7124_v29  ;;  %v790_v24 = vld [vmem:[%s8374_s17 + $0xe8] sm:$0xff]  ;;  %v6814_v29 = vcombine.low %v922_v13, %v926_v17 }
 0x1f8   : > { %v1089_v31 = vld [vmem:[%s8374_s17 + $0xa40] sm:$0xff]  ;;  %v7117_v34 = vcombine.high %v1225_v25, %v1229_v27  ;;  %4011 = vmatprep.subr.bf16.mxu0 %v6989_v30  ;;  %v7116_v37 = vcombine.low %v1225_v25, %v1229_v27  ;;  %v914_v25 = vld [vmem:[%s8374_s17 + $0x4c8] sm:$0xff]  ;;  %v6679_v30 = vcombine.high %v786_v23, %v790_v24 }
 0x1f9   : > { %v1093_v32 = vld [vmem:[%s8374_s17 + $0xa60] sm:$0xff]  ;;  %4012 = vmatpush2.bf16.msra.mxu0 %v6988_v36  ;;  %v918_v27 = vld [vmem:[%s8374_s17 + $0x4e8] sm:$0xff]  ;;  %v6678_v36 = vcombine.low %v786_v23, %v790_v24 }
 0x1fa   : > { %v1217_v33 = vld [vmem:[%s8374_s17 + $0xe40] sm:$0xff]  ;;  %v6981_v38 = vcombine.high %v1089_v31, %v1093_v32  ;;  %4052 = vmatprep.subr.bf16.mxu1 %v7117_v34  ;;  %v6980_v47 = vcombine.low %v1089_v31, %v1093_v32  ;;  %v778_v31 = vld [vmem:[%s8374_s17 + $0x88] sm:$0xff]  ;;  %v6807_v34 = vcombine.high %v914_v25, %v918_v27 }
 0x1fb   : > { %v1221_v35 = vld [vmem:[%s8374_s17 + $0xe60] sm:$0xff]  ;;  %4053 = vmatpush2.bf16.msra.mxu1 %v7116_v37  ;;  %v782_v32 = vld [vmem:[%s8374_s17 + $0xa8] sm:$0xff]  ;;  %v6806_v37 = vcombine.low %v914_v25, %v918_v27 }
 0x1fc   : > { %v1081_v39 = vld [vmem:[%s8374_s17 + $0xa00] sm:$0xff]  ;;  %v7109_v43 = vcombine.high %v1217_v33, %v1221_v35  ;;  %4013 = vmatprep.subr.bf16.mxu0 %v6981_v38  ;;  %v7108_v49 = vcombine.low %v1217_v33, %v1221_v35  ;;  %v906_v33 = vld [vmem:[%s8374_s17 + $0x488] sm:$0xff]  ;;  %v6671_v38 = vcombine.high %v778_v31, %v782_v32 }
 0x1fd   : > { %v1085_v40 = vld [vmem:[%s8374_s17 + $0xa20] sm:$0xff]  ;;  %4014 = vmatpush2.bf16.msra.mxu0 %v6980_v47  ;;  %v910_v35 = vld [vmem:[%s8374_s17 + $0x4a8] sm:$0xff]  ;;  %v6670_v47 = vcombine.low %v778_v31, %v782_v32 }
 0x1fe   : > { %v1209_v41 = vld [vmem:[%s8374_s17 + $0xe00] sm:$0xff]  ;;  %v6973_v50 = vcombine.high %v1081_v39, %v1085_v40  ;;  %4054 = vmatprep.subr.bf16.mxu1 %v7109_v43  ;;  %v6972_v56 = vcombine.low %v1081_v39, %v1085_v40  ;;  %v770_v39 = vld [vmem:[%s8374_s17 + $0x48] sm:$0xff]  ;;  %v6799_v43 = vcombine.high %v906_v33, %v910_v35 }
 0x1ff   : > { %v1213_v44 = vld [vmem:[%s8374_s17 + $0xe20] sm:$0xff]  ;;  %4055 = vmatpush2.bf16.msra.mxu1 %v7108_v49  ;;  %v774_v40 = vld [vmem:[%s8374_s17 + $0x68] sm:$0xff]  ;;  %v6798_v49 = vcombine.low %v906_v33, %v910_v35 }
 0x200   : > { %v7101_v53 = vcombine.high %v1209_v41, %v1213_v44  ;;  %4015 = vmatprep.subr.bf16.mxu0 %v6973_v50  ;;  %v7100_v57 = vcombine.low %v1209_v41, %v1213_v44  ;;  %v898_v41 = vld [vmem:[%s8374_s17 + $0x448] sm:$0xff]  ;;  %v6663_v50 = vcombine.high %v770_v39, %v774_v40 }
 0x201   : > { %4016 = vmatpush2.bf16.msra.mxu0 %v6972_v56  ;;  %v902_v44 = vld [vmem:[%s8374_s17 + $0x468] sm:$0xff]  ;;  %v6662_v56 = vcombine.low %v770_v39, %v774_v40 }
 0x202   : > { %4056 = vmatprep.subr.bf16.mxu1 %v7101_v53  ;;  %4067 = vmatprep.subr.bf16.mxu0 %v6711_v58  ;;  %v762_v15 = vld [vmem:[%s8374_s17 + $0x8] sm:$0xff]  ;;  %v6791_v53 = vcombine.high %v898_v41, %v902_v44 }
 0x203   : > { %4057 = vmatpush2.bf16.msra.mxu1 %v7100_v57  ;;  %v766_v51 = vld [vmem:[%s8374_s17 + $0x28] sm:$0xff]  ;;  %v6790_v57 = vcombine.low %v898_v41, %v902_v44 }
 0x204   : > { %4108 = vmatprep.subr.bf16.mxu1 %v6839_v62  ;;  %4018 = vmatmul.mubr.bf16.vlgmr.msra.gmra.mxu0 %v8573_v0  ;;  %v890_v52 = vld [vmem:[%s8374_s17 + $0x408] sm:$0xff]  ;;  %v6655_v58 = vcombine.high %v762_v15, %v766_v51 }
 0x205   : > { %4068 = vmatpush1.bf16.msra.mxu0 %v6710_v2  ;;  %4099 = vmatprep.mubr.bf16.mxu0 %v8433_v20  ;;  %v894_v54 = vld [vmem:[%s8374_s17 + $0x428] sm:$0xff]  ;;  %v6654_v2 = vcombine.low %v762_v15, %v766_v51 }
 0x206   : > { %4059 = vmatmul.mubr.bf16.vlgmr.msra.gmra.mxu1 %v8577_v1  ;;  %4069 = vmatprep.subr.bf16.mxu0 %v6703_v4  ;;  %v882_v59 = vld [vmem:[%s8374_s17 + $0x3c8] sm:$0xff]  ;;  %v6783_v62 = vcombine.high %v890_v52, %v894_v54 }
 0x207   : > { %4109 = vmatpush1.bf16.msra.mxu1 %v6838_v3  ;;  %4140 = vmatprep.mubr.bf16.mxu1 %v8437_v21  ;;  %v886_v60 = vld [vmem:[%s8374_s17 + $0x3e8] sm:$0xff]  ;;  %v6782_v3 = vcombine.low %v890_v52, %v894_v54 }
 0x208   : > { %4110 = vmatprep.subr.bf16.mxu1 %v6831_v7  ;;  %v1010_v61 = vld [vmem:[%s8374_s17 + $0x7c8] sm:$0xff]  ;;  %v6775_v4 = vcombine.high %v882_v59, %v886_v60 }
 0x209   : > { %4070 = vmatpush1.bf16.msra.mxu0 %v6702_v48  ;;  %v1014_v63 = vld [vmem:[%s8374_s17 + $0x7e8] sm:$0xff]  ;;  %v6774_v48 = vcombine.low %v882_v59, %v886_v60 }
 0x20a   : > { %4071 = vmatprep.subr.bf16.mxu0 %v6695_v10  ;;  %v874_v5 = vld [vmem:[%s8374_s17 + $0x388] sm:$0xff]  ;;  %v6903_v45 = vcombine.high %v1010_v61, %v1014_v63 }
 0x20b   : > { %4111 = vmatpush1.bf16.msra.mxu1 %v6830_v9  ;;  %v878_v6 = vld [vmem:[%s8374_s17 + $0x3a8] sm:$0xff]  ;;  %v6902_v9 = vcombine.low %v1010_v61, %v1014_v63 }
 0x20c   : > { %4112 = vmatprep.subr.bf16.mxu1 %v6823_v14  ;;  %v1002_v7 = vld [vmem:[%s8374_s17 + $0x788] sm:$0xff]  ;;  %v6767_v10 = vcombine.high %v874_v5, %v878_v6 }
 0x20d   : > { %4072 = vmatpush1.bf16.msra.mxu0 %v6694_v18  ;;  %v1006_v8 = vld [vmem:[%s8374_s17 + $0x7a8] sm:$0xff]  ;;  %v6766_v18 = vcombine.low %v874_v5, %v878_v6 }
 0x20e   : > { %4073 = vmatprep.subr.bf16.mxu0 %v6687_v22  ;;  %v866_v11 = vld [vmem:[%s8374_s17 + $0x348] sm:$0xff]  ;;  %v6895_v14 = vcombine.high %v1002_v7, %v1006_v8 }
 0x20f   : > { %4113 = vmatpush1.bf16.msra.mxu1 %v6822_v19  ;;  %v870_v12 = vld [vmem:[%s8374_s17 + $0x368] sm:$0xff]  ;;  %v6894_v19 = vcombine.low %v1002_v7, %v1006_v8 }
 0x210   : > { %4114 = vmatprep.subr.bf16.mxu1 %v6815_v26  ;;  %v994_v13 = vld [vmem:[%s8374_s17 + $0x748] sm:$0xff]  ;;  %v6759_v22 = vcombine.high %v866_v11, %v870_v12 }
 0x211   : > { %4074 = vmatpush1.bf16.msra.mxu0 %v6686_v28  ;;  %v998_v17 = vld [vmem:[%s8374_s17 + $0x768] sm:$0xff]  ;;  %v6758_v28 = vcombine.low %v866_v11, %v870_v12 }
 0x212   : > { %4075 = vmatprep.subr.bf16.mxu0 %v6679_v30  ;;  %v858_v23 = vld [vmem:[%s8374_s17 + $0x308] sm:$0xff]  ;;  %v6887_v26 = vcombine.high %v994_v13, %v998_v17 }
 0x213   : > { %4115 = vmatpush1.bf16.msra.mxu1 %v6814_v29  ;;  %v862_v24 = vld [vmem:[%s8374_s17 + $0x328] sm:$0xff]  ;;  %v6886_v29 = vcombine.low %v994_v13, %v998_v17 }
 0x214   : > { %4116 = vmatprep.subr.bf16.mxu1 %v6807_v34  ;;  %v986_v25 = vld [vmem:[%s8374_s17 + $0x708] sm:$0xff]  ;;  %v6751_v30 = vcombine.high %v858_v23, %v862_v24 }
 0x215   : > { %4076 = vmatpush1.bf16.msra.mxu0 %v6678_v36  ;;  %v990_v27 = vld [vmem:[%s8374_s17 + $0x728] sm:$0xff]  ;;  %v6750_v36 = vcombine.low %v858_v23, %v862_v24 }
 0x216   : > { %4077 = vmatprep.subr.bf16.mxu0 %v6671_v38  ;;  %v850_v31 = vld [vmem:[%s8374_s17 + $0x2c8] sm:$0xff]  ;;  %v6879_v34 = vcombine.high %v986_v25, %v990_v27 }
 0x217   : > { %4117 = vmatpush1.bf16.msra.mxu1 %v6806_v37  ;;  %v854_v32 = vld [vmem:[%s8374_s17 + $0x2e8] sm:$0xff]  ;;  %v6878_v37 = vcombine.low %v986_v25, %v990_v27 }
 0x218   : > { %4118 = vmatprep.subr.bf16.mxu1 %v6799_v43  ;;  %v978_v33 = vld [vmem:[%s8374_s17 + $0x6c8] sm:$0xff]  ;;  %v6743_v38 = vcombine.high %v850_v31, %v854_v32 }
 0x219   : > { %4078 = vmatpush1.bf16.msra.mxu0 %v6670_v47  ;;  %v982_v35 = vld [vmem:[%s8374_s17 + $0x6e8] sm:$0xff]  ;;  %v6742_v47 = vcombine.low %v850_v31, %v854_v32 }
 0x21a   : > { %4079 = vmatprep.subr.bf16.mxu0 %v6663_v50  ;;  %v842_v39 = vld [vmem:[%s8374_s17 + $0x288] sm:$0xff]  ;;  %v6871_v43 = vcombine.high %v978_v33, %v982_v35 }
 0x21b   : > { %4119 = vmatpush1.bf16.msra.mxu1 %v6798_v49  ;;  %v846_v40 = vld [vmem:[%s8374_s17 + $0x2a8] sm:$0xff]  ;;  %v6870_v49 = vcombine.low %v978_v33, %v982_v35 }
 0x21c   : > { %4120 = vmatprep.subr.bf16.mxu1 %v6791_v53  ;;  %v970_v41 = vld [vmem:[%s8374_s17 + $0x688] sm:$0xff]  ;;  %v6735_v50 = vcombine.high %v842_v39, %v846_v40 }
 0x21d   : > { %4080 = vmatpush1.bf16.msra.mxu0 %v6662_v56  ;;  %v974_v44 = vld [vmem:[%s8374_s17 + $0x6a8] sm:$0xff]  ;;  %v6734_v56 = vcombine.low %v842_v39, %v846_v40 }
 0x21e   : > { %4081 = vmatprep.subr.bf16.mxu0 %v6655_v58  ;;  %v834_v15 = vld [vmem:[%s8374_s17 + $0x248] sm:$0xff]  ;;  %v6863_v53 = vcombine.high %v970_v41, %v974_v44 }
 0x21f   : > { %4121 = vmatpush1.bf16.msra.mxu1 %v6790_v57  ;;  %v838_v51 = vld [vmem:[%s8374_s17 + $0x268] sm:$0xff]  ;;  %v6862_v57 = vcombine.low %v970_v41, %v974_v44 }
 0x220   : > { %4122 = vmatprep.subr.bf16.mxu1 %v6783_v62  ;;  %v962_v52 = vld [vmem:[%s8374_s17 + $0x648] sm:$0xff]  ;;  %v6727_v58 = vcombine.high %v834_v15, %v838_v51 }
 0x221   : > { %4082 = vmatpush1.bf16.msra.mxu0 %v6654_v2  ;;  %v966_v54 = vld [vmem:[%s8374_s17 + $0x668] sm:$0xff]  ;;  %v6726_v2 = vcombine.low %v834_v15, %v838_v51 }
 0x222   : > { %4083 = vmatprep.subr.bf16.mxu0 %v6775_v4  ;;  %v826_v59 = vld [vmem:[%s8374_s17 + $0x208] sm:$0xff]  ;;  %v6855_v62 = vcombine.high %v962_v52, %v966_v54 }
 0x223   : > { %4123 = vmatpush1.bf16.msra.mxu1 %v6782_v3  ;;  %v830_v60 = vld [vmem:[%s8374_s17 + $0x228] sm:$0xff]  ;;  %v6854_v3 = vcombine.low %v962_v52, %v966_v54 }
 0x224   : > { %4124 = vmatprep.subr.bf16.mxu1 %v6903_v45  ;;  %v954_v61 = vld [vmem:[%s8374_s17 + $0x608] sm:$0xff]  ;;  %v6719_v4 = vcombine.high %v826_v59, %v830_v60 }
 0x225   : > { %4084 = vmatpush2.bf16.msra.mxu0 %v6774_v48  ;;  %v958_v63 = vld [vmem:[%s8374_s17 + $0x628] sm:$0xff]  ;;  %v6718_v48 = vcombine.low %v826_v59, %v830_v60 }
 0x226   : > { %4085 = vmatprep.subr.bf16.mxu0 %v6767_v10  ;;  %v1074_v5 = vld [vmem:[%s8374_s17 + $0x9c8] sm:$0xff]  ;;  %v6847_v45 = vcombine.high %v954_v61, %v958_v63 }
 0x227   : > { %4125 = vmatpush2.bf16.msra.mxu1 %v6902_v9  ;;  %v1078_v6 = vld [vmem:[%s8374_s17 + $0x9e8] sm:$0xff]  ;;  %v6846_v9 = vcombine.low %v954_v61, %v958_v63 }
 0x228   : > { %4126 = vmatprep.subr.bf16.mxu1 %v6895_v14  ;;  %v1202_v7 = vld [vmem:[%s8374_s17 + $0xdc8] sm:$0xff]  ;;  %v6967_v10 = vcombine.high %v1074_v5, %v1078_v6 }
 0x229   : > { %4086 = vmatpush2.bf16.msra.mxu0 %v6766_v18  ;;  %v1206_v8 = vld [vmem:[%s8374_s17 + $0xde8] sm:$0xff]  ;;  %v6966_v18 = vcombine.low %v1074_v5, %v1078_v6 }
 0x22a   : > { %4087 = vmatprep.subr.bf16.mxu0 %v6759_v22  ;;  %v1066_v11 = vld [vmem:[%s8374_s17 + $0x988] sm:$0xff]  ;;  %v7095_v14 = vcombine.high %v1202_v7, %v1206_v8 }
 0x22b   : > { %4127 = vmatpush2.bf16.msra.mxu1 %v6894_v19  ;;  %v1070_v12 = vld [vmem:[%s8374_s17 + $0x9a8] sm:$0xff]  ;;  %v7094_v19 = vcombine.low %v1202_v7, %v1206_v8 }
 0x22c   : > { %4128 = vmatprep.subr.bf16.mxu1 %v6887_v26  ;;  %v1194_v13 = vld [vmem:[%s8374_s17 + $0xd88] sm:$0xff]  ;;  %v6959_v22 = vcombine.high %v1066_v11, %v1070_v12 }
 0x22d   : > { %4088 = vmatpush2.bf16.msra.mxu0 %v6758_v28  ;;  %v1198_v17 = vld [vmem:[%s8374_s17 + $0xda8] sm:$0xff]  ;;  %v6958_v28 = vcombine.low %v1066_v11, %v1070_v12 }
 0x22e   : > { %4089 = vmatprep.subr.bf16.mxu0 %v6751_v30  ;;  %v1058_v23 = vld [vmem:[%s8374_s17 + $0x948] sm:$0xff]  ;;  %v7087_v24 = vcombine.high %v1194_v13, %v1198_v17 }
 0x22f   : > { %4129 = vmatpush2.bf16.msra.mxu1 %v6886_v29  ;;  %v1062_v25 = vld [vmem:[%s8374_s17 + $0x968] sm:$0xff]  ;;  %v7086_v29 = vcombine.low %v1194_v13, %v1198_v17 }
 0x230   : > { %4130 = vmatprep.subr.bf16.mxu1 %v6879_v34  ;;  %v1186_v26 = vld [vmem:[%s8374_s17 + $0xd48] sm:$0xff]  ;;  %v6951_v30 = vcombine.high %v1058_v23, %v1062_v25 }
 0x231   : > { %4090 = vmatpush2.bf16.msra.mxu0 %v6750_v36  ;;  %v1190_v27 = vld [vmem:[%s8374_s17 + $0xd68] sm:$0xff]  ;;  %v6950_v36 = vcombine.low %v1058_v23, %v1062_v25 }
 0x232   : > { %4091 = vmatprep.subr.bf16.mxu0 %v6743_v38  ;;  %v7079_v31 = vcombine.high %v1186_v26, %v1190_v27  ;;  %v1050_v32 = vld [vmem:[%s8374_s17 + $0x908] sm:$0xff] }
 0x233   : > { %4131 = vmatpush2.bf16.msra.mxu1 %v6878_v37  ;;  %v1054_v33 = vld [vmem:[%s8374_s17 + $0x928] sm:$0xff]  ;;  %v7078_v37 = vcombine.low %v1186_v26, %v1190_v27 }
 0x234   : > { %4132 = vmatprep.subr.bf16.mxu1 %v6871_v43  ;;  %v1178_v34 = vld [vmem:[%s8374_s17 + $0xd08] sm:$0xff]  ;;  %v6943_v38 = vcombine.high %v1050_v32, %v1054_v33 }
 0x235   : > { %4092 = vmatpush2.bf16.msra.mxu0 %v6742_v47  ;;  %v1182_v35 = vld [vmem:[%s8374_s17 + $0xd28] sm:$0xff]  ;;  %v6942_v47 = vcombine.low %v1050_v32, %v1054_v33 }
 0x236   : > { %4093 = vmatprep.subr.bf16.mxu0 %v6735_v50  ;;  %v7071_v39 = vcombine.high %v1178_v34, %v1182_v35  ;;  %v1042_v40 = vld [vmem:[%s8374_s17 + $0x8c8] sm:$0xff] }
 0x237   : > { %4133 = vmatpush2.bf16.msra.mxu1 %v6870_v49  ;;  %v1046_v41 = vld [vmem:[%s8374_s17 + $0x8e8] sm:$0xff]  ;;  %v7070_v49 = vcombine.low %v1178_v34, %v1182_v35 }
 0x238   : > { %4134 = vmatprep.subr.bf16.mxu1 %v6863_v53  ;;  %v1170_v43 = vld [vmem:[%s8374_s17 + $0xcc8] sm:$0xff]  ;;  %v6935_v50 = vcombine.high %v1042_v40, %v1046_v41 }
 0x239   : > { %4094 = vmatpush2.bf16.msra.mxu0 %v6734_v56  ;;  %v1174_v44 = vld [vmem:[%s8374_s17 + $0xce8] sm:$0xff]  ;;  %v6934_v56 = vcombine.low %v1042_v40, %v1046_v41 }
 0x23a   : > { %4095 = vmatprep.subr.bf16.mxu0 %v6727_v58  ;;  %v7063_v15 = vcombine.high %v1170_v43, %v1174_v44  ;;  %v1034_v51 = vld [vmem:[%s8374_s17 + $0x888] sm:$0xff] }
 0x23b   : > { %4135 = vmatpush2.bf16.msra.mxu1 %v6862_v57  ;;  %v1038_v52 = vld [vmem:[%s8374_s17 + $0x8a8] sm:$0xff]  ;;  %v7062_v57 = vcombine.low %v1170_v43, %v1174_v44 }
 0x23c   : > { %4136 = vmatprep.subr.bf16.mxu1 %v6855_v62  ;;  %v1162_v53 = vld [vmem:[%s8374_s17 + $0xc88] sm:$0xff]  ;;  %v6927_v58 = vcombine.high %v1034_v51, %v1038_v52 }
 0x23d   : > { %4096 = vmatpush2.bf16.msra.mxu0 %v6726_v2  ;;  %v1166_v54 = vld [vmem:[%s8374_s17 + $0xca8] sm:$0xff]  ;;  %v6926_v2 = vcombine.low %v1034_v51, %v1038_v52 }
 0x23e   : > { %4097 = vmatprep.subr.bf16.mxu0 %v6719_v4  ;;  %v7055_v59 = vcombine.high %v1162_v53, %v1166_v54  ;;  %v1026_v60 = vld [vmem:[%s8374_s17 + $0x848] sm:$0xff] }
 0x23f   : > { %4137 = vmatpush2.bf16.msra.mxu1 %v6854_v3  ;;  %v1030_v61 = vld [vmem:[%s8374_s17 + $0x868] sm:$0xff]  ;;  %v7054_v3 = vcombine.low %v1162_v53, %v1166_v54 }
 0x240   : > { %4138 = vmatprep.subr.bf16.mxu1 %v6847_v45  ;;  %v1154_v62 = vld [vmem:[%s8374_s17 + $0xc48] sm:$0xff]  ;;  %v6919_v4 = vcombine.high %v1026_v60, %v1030_v61 }
 0x241   : > { %4098 = vmatpush2.bf16.msra.mxu0 %v6718_v48  ;;  %v1158_v63 = vld [vmem:[%s8374_s17 + $0xc68] sm:$0xff]  ;;  %v6918_v48 = vcombine.low %v1026_v60, %v1030_v61 }
 0x242   : > { %4149 = vmatprep.subr.bf16.mxu0 %v6967_v10  ;;  %v7047_v5 = vcombine.high %v1154_v62, %v1158_v63  ;;  %v1018_v6 = vld [vmem:[%s8374_s17 + $0x808] sm:$0xff] }
 0x243   : > { %4139 = vmatpush2.bf16.msra.mxu1 %v6846_v9  ;;  %v1022_v7 = vld [vmem:[%s8374_s17 + $0x828] sm:$0xff]  ;;  %v7046_v9 = vcombine.low %v1154_v62, %v1158_v63 }
 0x244   : > { %4190 = vmatprep.subr.bf16.mxu1 %v7095_v14  ;;  %4100 = vmatmul.mubr.bf16.vlgmr.msra.gmra.mxu0 %v8483_v42  ;;  %v1146_v45 = vld [vmem:[%s8374_s17 + $0xc08] sm:$0xff]  ;;  %v6911_v10 = vcombine.high %v1018_v6, %v1022_v7 }
 0x245   : > { %4150 = vmatpush1.bf16.msra.mxu0 %v6966_v18  ;;  %4181 = vmatprep.mubr.bf16.mxu0 %v8501_v16  ;;  %v1150_v8 = vld [vmem:[%s8374_s17 + $0xc28] sm:$0xff]  ;;  %v6910_v18 = vcombine.low %v1018_v6, %v1022_v7 }
 0x246   : > { %4141 = vmatmul.mubr.bf16.vlgmr.msra.gmra.mxu1 %v8491_v46  ;;  %4151 = vmatprep.subr.bf16.mxu0 %v6959_v22  ;;  %v7039_v11 = vcombine.high %v1146_v45, %v1150_v8  ;;  %v1138_v12 = vld [vmem:[%s8374_s17 + $0xbc8] sm:$0xff] }
 0x247   : > { %4191 = vmatpush1.bf16.msra.mxu1 %v7094_v19  ;;  %4222 = vmatprep.mubr.bf16.mxu1 %v8506_v55  ;;  %v1142_v13 = vld [vmem:[%s8374_s17 + $0xbe8] sm:$0xff]  ;;  %v7038_v19 = vcombine.low %v1146_v45, %v1150_v8 }
 0x248   : > { %4192 = vmatprep.subr.bf16.mxu1 %v7087_v24  ;;  %v1266_v14 = vld [vmem:[%s8374_s17 + $0xfc8] sm:$0xff]  ;;  %v7031_v22 = vcombine.high %v1138_v12, %v1142_v13 }
 0x249   : > { %4152 = vmatpush1.bf16.msra.mxu0 %v6958_v28  ;;  %v1270_v17 = vld [vmem:[%s8374_s17 + $0xfe8] sm:$0xff]  ;;  %v7030_v28 = vcombine.low %v1138_v12, %v1142_v13 }
 0x24a   : > { %4153 = vmatprep.subr.bf16.mxu0 %v6951_v30  ;;  %v7159_v23 = vcombine.high %v1266_v14, %v1270_v17  ;;  %v1130_v24 = vld [vmem:[%s8374_s17 + $0xb88] sm:$0xff] }
 0x24b   : > { %4193 = vmatpush1.bf16.msra.mxu1 %v7086_v29  ;;  %v1134_v25 = vld [vmem:[%s8374_s17 + $0xba8] sm:$0xff]  ;;  %v7158_v29 = vcombine.low %v1266_v14, %v1270_v17 }
 0x24c   : > { %4194 = vmatprep.subr.bf16.mxu1 %v7079_v31  ;;  %v1258_v26 = vld [vmem:[%s8374_s17 + $0xf88] sm:$0xff]  ;;  %v7023_v30 = vcombine.high %v1130_v24, %v1134_v25 }
 0x24d   : > { %4154 = vmatpush1.bf16.msra.mxu0 %v6950_v36  ;;  %v1262_v27 = vld [vmem:[%s8374_s17 + $0xfa8] sm:$0xff]  ;;  %v7022_v36 = vcombine.low %v1130_v24, %v1134_v25 }
 0x24e   : > { %4155 = vmatprep.subr.bf16.mxu0 %v6943_v38  ;;  %v7151_v31 = vcombine.high %v1258_v26, %v1262_v27  ;;  %v1122_v32 = vld [vmem:[%s8374_s17 + $0xb48] sm:$0xff] }
 0x24f   : > { %4195 = vmatpush1.bf16.msra.mxu1 %v7078_v37  ;;  %v1126_v33 = vld [vmem:[%s8374_s17 + $0xb68] sm:$0xff]  ;;  %v7150_v37 = vcombine.low %v1258_v26, %v1262_v27  ;;  %v819_v26 = vld [vmem:[%s8374_s17 + $0x1d0] sm:$0xff] }
 0x250   : > { %4196 = vmatprep.subr.bf16.mxu1 %v7071_v39  ;;  %v1250_v34 = vld [vmem:[%s8374_s17 + $0xf48] sm:$0xff]  ;;  %v7015_v38 = vcombine.high %v1122_v32, %v1126_v33  ;;  %v823_v27 = vld [vmem:[%s8374_s17 + $0x1f0] sm:$0xff] }
 0x251   : > { %4156 = vmatpush1.bf16.msra.mxu0 %v6942_v47  ;;  %v1254_v35 = vld [vmem:[%s8374_s17 + $0xf68] sm:$0xff]  ;;  %v7014_v47 = vcombine.low %v1122_v32, %v1126_v33 }
 0x252   : > { %4157 = vmatprep.subr.bf16.mxu0 %v6935_v50  ;;  %v7143_v39 = vcombine.high %v1250_v34, %v1254_v35  ;;  %v1114_v40 = vld [vmem:[%s8374_s17 + $0xb08] sm:$0xff] }
 0x253   : > { %4197 = vmatpush1.bf16.msra.mxu1 %v7070_v49  ;;  %v1118_v41 = vld [vmem:[%s8374_s17 + $0xb28] sm:$0xff]  ;;  %v7142_v49 = vcombine.low %v1250_v34, %v1254_v35  ;;  %v6713_v34 = vcombine.high %v819_v26, %v823_v27 }
 0x254   : > { %4198 = vmatprep.subr.bf16.mxu1 %v7063_v15  ;;  %v1242_v43 = vld [vmem:[%s8374_s17 + $0xf08] sm:$0xff]  ;;  %v7007_v50 = vcombine.high %v1114_v40, %v1118_v41 }
 0x255   : > { %4158 = vmatpush1.bf16.msra.mxu0 %v6934_v56  ;;  %v1246_v44 = vld [vmem:[%s8374_s17 + $0xf28] sm:$0xff]  ;;  %v7006_v56 = vcombine.low %v1114_v40, %v1118_v41  ;;  %v943_v40 = vld [vmem:[%s8374_s17 + $0x5b0] sm:$0xff] }
 0x256   : > { %4159 = vmatprep.subr.bf16.mxu0 %v6927_v58  ;;  %v7135_v15 = vcombine.high %v1242_v43, %v1246_v44  ;;  %v1106_v51 = vld [vmem:[%s8374_s17 + $0xac8] sm:$0xff] }
 0x257   : > { %4199 = vmatpush1.bf16.msra.mxu1 %v7062_v57  ;;  %v1110_v52 = vld [vmem:[%s8374_s17 + $0xae8] sm:$0xff]  ;;  %v7134_v57 = vcombine.low %v1242_v43, %v1246_v44  ;;  %v6712_v43 = vcombine.low %v819_v26, %v823_v27 }
 0x258   : > { %4200 = vmatprep.subr.bf16.mxu1 %v7055_v59  ;;  %v1234_v53 = vld [vmem:[%s8374_s17 + $0xec8] sm:$0xff]  ;;  %v6999_v58 = vcombine.high %v1106_v51, %v1110_v52 }
 0x259   : > { %4160 = vmatpush1.bf16.msra.mxu0 %v6926_v2  ;;  %v1238_v54 = vld [vmem:[%s8374_s17 + $0xee8] sm:$0xff]  ;;  %v6998_v2 = vcombine.low %v1106_v51, %v1110_v52  ;;  %v807_v51 = vld [vmem:[%s8374_s17 + $0x170] sm:$0xff] }
 0x25a   : > { %4161 = vmatprep.subr.bf16.mxu0 %v6919_v4  ;;  %v7127_v59 = vcombine.high %v1234_v53, %v1238_v54  ;;  %v1098_v60 = vld [vmem:[%s8374_s17 + $0xa88] sm:$0xff] }
 0x25b   : > { %4201 = vmatpush1.bf16.msra.mxu1 %v7054_v3  ;;  %v1102_v61 = vld [vmem:[%s8374_s17 + $0xaa8] sm:$0xff]  ;;  %v7126_v3 = vcombine.low %v1234_v53, %v1238_v54  ;;  %v931_v53 = vld [vmem:[%s8374_s17 + $0x550] sm:$0xff] }
 0x25c   : > { %4202 = vmatprep.subr.bf16.mxu1 %v7047_v5  ;;  %v1226_v62 = vld [vmem:[%s8374_s17 + $0xe88] sm:$0xff]  ;;  %v6991_v4 = vcombine.high %v1098_v60, %v1102_v61  ;;  %v935_v54 = vld [vmem:[%s8374_s17 + $0x570] sm:$0xff] }
 0x25d   : > { %4162 = vmatpush1.bf16.msra.mxu0 %v6918_v48  ;;  %v1230_v63 = vld [vmem:[%s8374_s17 + $0xea8] sm:$0xff]  ;;  %v6990_v48 = vcombine.low %v1098_v60, %v1102_v61 }
 0x25e   : > { %4163 = vmatprep.subr.bf16.mxu0 %v6911_v10  ;;  %v7119_v5 = vcombine.high %v1226_v62, %v1230_v63  ;;  %v1090_v6 = vld [vmem:[%s8374_s17 + $0xa48] sm:$0xff]  ;;  %v7118_v10 = vcombine.low %v1226_v62, %v1230_v63 }
 0x25f   : > { %4203 = vmatpush1.bf16.msra.mxu1 %v7046_v9  ;;  %v1094_v7 = vld [vmem:[%s8374_s17 + $0xa68] sm:$0xff]  ;;  %v1275_v9 = vlaneseq }
 0x260   : > { %4204 = vmatprep.subr.bf16.mxu1 %v7039_v11  ;;  %v1218_v45 = vld [vmem:[%s8374_s17 + $0xe48] sm:$0xff]  ;;  %v6983_v11 = vcombine.high %v1090_v6, %v1094_v7 }
 0x261   : > { %4164 = vmatpush1.bf16.msra.mxu0 %v6910_v18  ;;  %v1222_v8 = vld [vmem:[%s8374_s17 + $0xe68] sm:$0xff] }
 0x262   : > { %4165 = vmatprep.subr.bf16.mxu0 %v7031_v22  ;;  %v7111_v12 = vcombine.high %v1218_v45, %v1222_v8  ;;  %v1082_v13 = vld [vmem:[%s8374_s17 + $0xa08] sm:$0xff]  ;;  %v8707_v22 = vshrl.u32 %v1275_v9, 7 }
 0x263   : > { %4205 = vmatpush1.bf16.msra.mxu1 %v7038_v19  ;;  %v1086_v14 = vld [vmem:[%s8374_s17 + $0xa28] sm:$0xff]  ;;  %v6982_v19 = vcombine.low %v1090_v6, %v1094_v7  ;;  %v923_v7 = vld [vmem:[%s8374_s17 + $0x510] sm:$0xff] }
 0x264   : > { %4206 = vmatprep.subr.bf16.mxu1 %v7159_v23  ;;  %v1210_v17 = vld [vmem:[%s8374_s17 + $0xe08] sm:$0xff]  ;;  %v7110_v23 = vcombine.low %v1218_v45, %v1222_v8  ;;  %v6975_v24 = vcombine.high %v1082_v13, %v1086_v14  ;;  %v927_v45 = vld [vmem:[%s8374_s17 + $0x530] sm:$0xff] }
 0x265   : > { %4166 = vmatpush2.bf16.msra.mxu0 %v7030_v28  ;;  %v1214_v18 = vld [vmem:[%s8374_s17 + $0xe28] sm:$0xff]  ;;  %v947_v28 = vld [vmem:[%s8374_s17 + $0x5d0] sm:$0xff] }
 0x266   : > { %4167 = vmatprep.subr.bf16.mxu0 %v7023_v30  ;;  %v7103_v25 = vcombine.high %v1210_v17, %v1214_v18  ;;  %v6974_v30 = vcombine.low %v1082_v13, %v1086_v14  ;;  %v7102_v32 = vcombine.low %v1210_v17, %v1214_v18  ;;  %v8715_v33 = vld [vmem:[%s8380_s16] sm:$0xff]  ;;  %v6817_v14 = vcombine.high %v923_v7, %v927_v45  ;;  %v787_v17 = vld [vmem:[%s8374_s17 + $0xd0] sm:$0xff] }
 0x267   : > { %4207 = vmatpush2.bf16.msra.mxu1 %v7158_v29  ;;  %v951_v29 = vld [vmem:[%s8374_s17 + $0x5f0] sm:$0xff] }
 0x268   : > { %4208 = vmatprep.subr.bf16.mxu1 %v7151_v31  ;;  %v1277_v31 = vsub.s32 0, %v8707_v22  ;;  %v6841_v35 = vcombine.high %v947_v28, %v951_v29  ;;  %v6840_v44 = vcombine.low %v947_v28, %v951_v29  ;;  %v791_v18 = vld [vmem:[%s8374_s17 + $0xf0] sm:$0xff] }
 0x269   : > { %4168 = vmatpush2.bf16.msra.mxu0 %v7022_v36  ;;  %v1281_v36 = vsub.s32 1, %v8707_v22  ;;  %v6681_v26 = vcombine.high %v787_v17, %v791_v18  ;;  %v779_v28 = vld [vmem:[%s8374_s17 + $0x90] sm:$0xff] }
 0x26a   : > { %4169 = vmatprep.subr.bf16.mxu0 %v7015_v38  ;;  %v815_v38 = vld [vmem:[%s8374_s17 + $0x1b0] sm:$0xff]  ;;  %v1278_v41 = vrot.slane %v8715_v33, %v1277_v31 }
 0x26b   : > { %4209 = vmatpush2.bf16.msra.mxu1 %v7150_v37  ;;  %v811_v37 = vld [vmem:[%s8374_s17 + $0x190] sm:$0xff] }
 0x26c   : > { %4210 = vmatprep.subr.bf16.mxu1 %v7143_v39  ;;  %v939_v39 = vld [vmem:[%s8374_s17 + $0x590] sm:$0xff] }
 0x26d   : > { %4170 = vmatpush2.bf16.msra.mxu0 %v7014_v47  ;;  %v6705_v47 = vcombine.high %v811_v37, %v815_v38  ;;  %v6832_v60 = vcombine.low %v939_v39, %v943_v40  ;;  %v783_v29 = vld [vmem:[%s8374_s17 + $0xb0] sm:$0xff] }
 0x26e   : > { %4171 = vmatprep.subr.bf16.mxu0 %v7007_v50  ;;  %v6833_v50 = vcombine.high %v939_v39, %v943_v40  ;;  %v771_v39 = vld [vmem:[%s8374_s17 + $0x50] sm:$0xff] }
 0x26f   : > { %4211 = vmatpush2.bf16.msra.mxu1 %v7142_v49  ;;  %v1282_v49 = vrot.slane %v8715_v33, %v1281_v36  ;;  %v775_v40 = vld [vmem:[%s8374_s17 + $0x70] sm:$0xff] }
 0x270   : > { %4212 = vmatprep.subr.bf16.mxu1 %v7135_v15  ;;  %v803_v15 = vld [vmem:[%s8374_s17 + $0x150] sm:$0xff] }
 0x271   : > { %4172 = vmatpush2.bf16.msra.mxu0 %v7006_v56  ;;  %v6697_v61 = vcombine.high %v803_v15, %v807_v51  ;;  %v6696_v9 = vcombine.low %v803_v15, %v807_v51  ;;  %v763_v15 = vld [vmem:[%s8374_s17 + $0x10] sm:$0xff] }
 0x272   : > { %4173 = vmatprep.subr.bf16.mxu0 %v6999_v58  ;;  %v6704_v58 = vcombine.low %v811_v37, %v815_v38  ;;  %v6673_v37 = vcombine.high %v779_v28, %v783_v29  ;;  %v767_v51 = vld [vmem:[%s8374_s17 + $0x30] sm:$0xff] }
 0x273   : > { %4213 = vmatpush2.bf16.msra.mxu1 %v7134_v57 }
 0x274   : > { %4214 = vmatprep.subr.bf16.mxu1 %v7127_v59 }
 0x275   : > { %4174 = vmatpush2.bf16.msra.mxu0 %v6998_v2 }
 0x276   : > { %4175 = vmatprep.subr.bf16.mxu0 %v6991_v4  ;;  %v795_v4 = vld [vmem:[%s8374_s17 + $0x110] sm:$0xff] }
 0x277   : > { %4215 = vmatpush2.bf16.msra.mxu1 %v7126_v3  ;;  %v6825_v3 = vcombine.high %v931_v53, %v935_v54 }
 0x278   : > { %4216 = vmatprep.subr.bf16.mxu1 %v7119_v5  ;;  %v799_v5 = vld [vmem:[%s8374_s17 + $0x130] sm:$0xff] }
 0x279   : > { %4176 = vmatpush2.bf16.msra.mxu0 %v6990_v48 }
 0x27a   : > { %4177 = vmatprep.subr.bf16.mxu0 %v6983_v11  ;;  %v6824_v11 = vcombine.low %v931_v53, %v935_v54  ;;  %v895_v53 = vld [vmem:[%s8374_s17 + $0x430] sm:$0xff]  ;;  %v6664_v54 = vcombine.low %v771_v39, %v775_v40 }
 0x27b   : > { %4217 = vmatpush2.bf16.msra.mxu1 %v7118_v10 }
 0x27c   : > { %4218 = vmatprep.subr.bf16.mxu1 %v7111_v12  ;;  %v6689_v12 = vcombine.high %v795_v4, %v799_v5 }
 0x27d   : > { %4178 = vmatpush2.bf16.msra.mxu0 %v6982_v19  ;;  %v915_v19 = vld [vmem:[%s8374_s17 + $0x4d0] sm:$0xff] }
 0x27e   : > { %4179 = vmatprep.subr.bf16.mxu0 %v6975_v24  ;;  %v6688_v24 = vcombine.low %v795_v4, %v799_v5 }
 0x27f   : > { %4219 = vmatpush2.bf16.msra.mxu1 %v7110_v23  ;;  %v919_v23 = vld [vmem:[%s8374_s17 + $0x4f0] sm:$0xff] }
 0x280   : > { %4220 = vmatprep.subr.bf16.mxu1 %v7103_v25  ;;  %v6816_v25 = vcombine.low %v923_v7, %v927_v45  ;;  %v6809_v27 = vcombine.high %v915_v19, %v919_v23  ;;  %v879_v7 = vld [vmem:[%s8374_s17 + $0x3b0] sm:$0xff] }
 0x281   : > { %4180 = vmatpush2.bf16.msra.mxu0 %v6974_v30  ;;  %v907_v30 = vld [vmem:[%s8374_s17 + $0x490] sm:$0xff] }
 0x282   : > { %4231 = vmatprep.subr.bf16.mxu0 %v6713_v34  ;;  %v6680_v34 = vcombine.low %v787_v17, %v791_v18  ;;  %v1003_v45 = vld [vmem:[%s8374_s17 + $0x790] sm:$0xff] }
 0x283   : > { %4221 = vmatpush2.bf16.msra.mxu1 %v7102_v32  ;;  %v3937_v52 = vpop.f32.mrf.mxu0  ;;  %v911_v32 = vld [vmem:[%s8374_s17 + $0x4b0] sm:$0xff] }
 0x284   : > { %4272 = vmatprep.subr.bf16.mxu1 %v6841_v35  ;;  %4182 = vmatmul.mubr.bf16.vlgmr.msra.gmra.mxu0 %v8573_v0  ;;  %v3938_v56 = vadd.f32 %v3937_v52, %v1278_v41  ;;  %v6808_v35 = vcombine.low %v915_v19, %v919_v23  ;;  %v6801_v38 = vcombine.high %v907_v30, %v911_v32  ;;  %v899_v41 = vld [vmem:[%s8374_s17 + $0x450] sm:$0xff] }
 0x285   : > { %v3978_v57 = vpop.f32.mrf.mxu1  ;;  %4232 = vmatpush1.bf16.msra.mxu0 %v6712_v43  ;;  %v3939_v59 = vpop.f32.mrf.mxu0  ;;  %4263 = vmatprep.mubr.bf16.mxu0 %v8433_v20  ;;  %v903_v43 = vld [vmem:[%s8374_s17 + $0x470] sm:$0xff] }
 0x286   : > { %4223 = vmatmul.mubr.bf16.vlgmr.msra.gmra.mxu1 %v8577_v1  ;;  %4233 = vmatprep.subr.bf16.mxu0 %v6705_v47  ;;  %v8734_v62 = vadd.f32 %v3978_v57, %v3938_v56  ;;  %v3940_v63 = vadd.f32 %v3939_v59, %v1282_v49  ;;  %v6800_v47 = vcombine.low %v907_v30, %v911_v32  ;;  %v891_v52 = vld [vmem:[%s8374_s17 + $0x410] sm:$0xff] }
 0x287   : > { %4273 = vmatpush1.bf16.msra.mxu1 %v6840_v44  ;;  %v3980_v2 = vpop.f32.mrf.mxu1  ;;  %v3941_v6 = vpop.f32.mrf.mxu0  ;;  %4304 = vmatprep.mubr.bf16.mxu1 %v8437_v21  ;;  %v6672_v44 = vcombine.low %v779_v28, %v783_v29  ;;  %v6665_v49 = vcombine.high %v771_v39, %v775_v40  ;;  %v6792_v56 = vcombine.low %v899_v41, %v903_v43  ;;  %v883_v59 = vld [vmem:[%s8374_s17 + $0x3d0] sm:$0xff] }
 0x288   : > { %4274 = vmatprep.subr.bf16.mxu1 %v6833_v50  ;;  %v8742_v8 = vadd.f32 %v3980_v2, %v3940_v63  ;;  %v6793_v50 = vcombine.high %v899_v41, %v903_v43  ;;  %v6657_v57 = vcombine.high %v763_v15, %v767_v51  ;;  %v1015_v63 = vld [vmem:[%s8374_s17 + $0x7f0] sm:$0xff]  ;;  %v6656_v2 = vcombine.low %v763_v15, %v767_v51 }
 0x289   : > { %v3982_v48 = vpop.f32.mrf.mxu1  ;;  %4234 = vmatpush1.bf16.msra.mxu0 %v6704_v58  ;;  %v3942_v10 = vpop.f32.mrf.mxu0  ;;  %v6785_v58 = vcombine.high %v891_v52, %v895_v53  ;;  %v875_v6 = vld [vmem:[%s8374_s17 + $0x390] sm:$0xff] }
 0x28a   : > { %4235 = vmatprep.subr.bf16.mxu0 %v6697_v61  ;;  %v1011_v61 = vld [vmem:[%s8374_s17 + $0x7d0] sm:$0xff]  ;;  %v6768_v19 = vcombine.low %v875_v6, %v879_v7 }
 0x28b   : > { %4275 = vmatpush1.bf16.msra.mxu1 %v6832_v60  ;;  %v3983_v13 = vpop.f32.mrf.mxu1  ;;  %v887_v60 = vld [vmem:[%s8374_s17 + $0x3f0] sm:$0xff]  ;;  %v6905_v5 = vcombine.high %v1011_v61, %v1015_v63  ;;  %v6904_v10 = vcombine.low %v1011_v61, %v1015_v63 }
 0x28c   : > { %4276 = vmatprep.subr.bf16.mxu1 %v6825_v3  ;;  %v6784_v3 = vcombine.low %v891_v52, %v895_v53  ;;  %v6777_v4 = vcombine.high %v883_v59, %v887_v60  ;;  %v1007_v48 = vld [vmem:[%s8374_s17 + $0x7b0] sm:$0xff] }
 0x28d   : > { %4236 = vmatpush1.bf16.msra.mxu0 %v6696_v9  ;;  %v6776_v9 = vcombine.low %v883_v59, %v887_v60  ;;  %v867_v13 = vld [vmem:[%s8374_s17 + $0x350] sm:$0xff]  ;;  %v6896_v23 = vcombine.low %v1003_v45, %v1007_v48 }
 0x28e   : > { %4237 = vmatprep.subr.bf16.mxu0 %v6689_v12  ;;  %v6897_v12 = vcombine.high %v1003_v45, %v1007_v48  ;;  %v995_v17 = vld [vmem:[%s8374_s17 + $0x750] sm:$0xff] }
 0x28f   : > { %4277 = vmatpush1.bf16.msra.mxu1 %v6824_v11  ;;  %v6769_v11 = vcombine.high %v875_v6, %v879_v7  ;;  %v999_v18 = vld [vmem:[%s8374_s17 + $0x770] sm:$0xff] }
 0x290   : > { %4278 = vmatprep.subr.bf16.mxu1 %v6817_v14  ;;  %v871_v14 = vld [vmem:[%s8374_s17 + $0x370] sm:$0xff]  ;;  %v6888_v32 = vcombine.low %v995_v17, %v999_v18 }
 0x291   : > { %4238 = vmatpush1.bf16.msra.mxu0 %v6688_v24  ;;  %v6761_v24 = vcombine.high %v867_v13, %v871_v14  ;;  %v987_v28 = vld [vmem:[%s8374_s17 + $0x710] sm:$0xff]  ;;  %v6760_v30 = vcombine.low %v867_v13, %v871_v14 }
 0x292   : > { %4239 = vmatprep.subr.bf16.mxu0 %v6681_v26  ;;  %v859_v26 = vld [vmem:[%s8374_s17 + $0x310] sm:$0xff] }
 0x293   : > { %4279 = vmatpush1.bf16.msra.mxu1 %v6816_v25  ;;  %v6889_v25 = vcombine.high %v995_v17, %v999_v18  ;;  %v991_v29 = vld [vmem:[%s8374_s17 + $0x730] sm:$0xff] }
 0x294   : > { %4280 = vmatprep.subr.bf16.mxu1 %v6809_v27  ;;  %v863_v27 = vld [vmem:[%s8374_s17 + $0x330] sm:$0xff]  ;;  %v6880_v43 = vcombine.low %v987_v28, %v991_v29 }
 0x295   : > { %4240 = vmatpush1.bf16.msra.mxu0 %v6680_v34  ;;  %v6753_v34 = vcombine.high %v859_v26, %v863_v27  ;;  %v979_v39 = vld [vmem:[%s8374_s17 + $0x6d0] sm:$0xff]  ;;  %v6752_v41 = vcombine.low %v859_v26, %v863_v27 }
 0x296   : > { %4241 = vmatprep.subr.bf16.mxu0 %v6673_v37  ;;  %v851_v37 = vld [vmem:[%s8374_s17 + $0x2d0] sm:$0xff] }
 0x297   : > { %4281 = vmatpush1.bf16.msra.mxu1 %v6808_v35  ;;  %v6881_v35 = vcombine.high %v987_v28, %v991_v29  ;;  %v983_v40 = vld [vmem:[%s8374_s17 + $0x6f0] sm:$0xff] }
 0x298   : > { %4282 = vmatprep.subr.bf16.mxu1 %v6801_v38  ;;  %v855_v38 = vld [vmem:[%s8374_s17 + $0x2f0] sm:$0xff]  ;;  %v6872_v53 = vcombine.low %v979_v39, %v983_v40 }
 0x299   : > { %4242 = vmatpush1.bf16.msra.mxu0 %v6672_v44  ;;  %v6745_v44 = vcombine.high %v851_v37, %v855_v38  ;;  %v971_v15 = vld [vmem:[%s8374_s17 + $0x690] sm:$0xff]  ;;  %v6744_v52 = vcombine.low %v851_v37, %v855_v38 }
 0x29a   : > { %4243 = vmatprep.subr.bf16.mxu0 %v6665_v49  ;;  %v843_v49 = vld [vmem:[%s8374_s17 + $0x290] sm:$0xff] }
 0x29b   : > { %4283 = vmatpush1.bf16.msra.mxu1 %v6800_v47  ;;  %v6873_v47 = vcombine.high %v979_v39, %v983_v40  ;;  %v975_v51 = vld [vmem:[%s8374_s17 + $0x6b0] sm:$0xff] }
 0x29c   : > { %4284 = vmatprep.subr.bf16.mxu1 %v6793_v50  ;;  %v847_v50 = vld [vmem:[%s8374_s17 + $0x2b0] sm:$0xff]  ;;  %v6864_v63 = vcombine.low %v971_v15, %v975_v51 }
 0x29d   : > { %4244 = vmatpush1.bf16.msra.mxu0 %v6664_v54  ;;  %v6737_v54 = vcombine.high %v843_v49, %v847_v50  ;;  %v963_v59 = vld [vmem:[%s8374_s17 + $0x650] sm:$0xff]  ;;  %v6736_v61 = vcombine.low %v843_v49, %v847_v50 }
 0x29e   : > { %4245 = vmatprep.subr.bf16.mxu0 %v6657_v57  ;;  %v835_v57 = vld [vmem:[%s8374_s17 + $0x250] sm:$0xff] }
 0x29f   : > { %4285 = vmatpush1.bf16.msra.mxu1 %v6792_v56  ;;  %v6865_v56 = vcombine.high %v971_v15, %v975_v51  ;;  %v967_v60 = vld [vmem:[%s8374_s17 + $0x670] sm:$0xff] }
 0x2a0   : > { %4286 = vmatprep.subr.bf16.mxu1 %v6785_v58  ;;  %v839_v58 = vld [vmem:[%s8374_s17 + $0x270] sm:$0xff]  ;;  %v6856_v48 = vcombine.low %v963_v59, %v967_v60 }
 0x2a1   : > { %4246 = vmatpush1.bf16.msra.mxu0 %v6656_v2  ;;  %v6729_v2 = vcombine.high %v835_v57, %v839_v58  ;;  %v955_v6 = vld [vmem:[%s8374_s17 + $0x610] sm:$0xff]  ;;  %v6728_v45 = vcombine.low %v835_v57, %v839_v58 }
 0x2a2   : > { %4247 = vmatprep.subr.bf16.mxu0 %v6777_v4  ;;  %v827_v4 = vld [vmem:[%s8374_s17 + $0x210] sm:$0xff] }
 0x2a3   : > { %4287 = vmatpush1.bf16.msra.mxu1 %v6784_v3  ;;  %v6857_v3 = vcombine.high %v963_v59, %v967_v60  ;;  %v959_v7 = vld [vmem:[%s8374_s17 + $0x630] sm:$0xff] }
 0x2a4   : > { %4288 = vmatprep.subr.bf16.mxu1 %v6905_v5  ;;  %v831_v5 = vld [vmem:[%s8374_s17 + $0x230] sm:$0xff]  ;;  %v6848_v18 = vcombine.low %v955_v6, %v959_v7 }
 0x2a5   : > { %4248 = vmatpush2.bf16.msra.mxu0 %v6776_v9  ;;  %v6721_v9 = vcombine.high %v827_v4, %v831_v5  ;;  %v1203_v13 = vld [vmem:[%s8374_s17 + $0xdd0] sm:$0xff]  ;;  %v6720_v17 = vcombine.low %v827_v4, %v831_v5 }
 0x2a6   : > { %4249 = vmatprep.subr.bf16.mxu0 %v6769_v11  ;;  %v1075_v11 = vld [vmem:[%s8374_s17 + $0x9d0] sm:$0xff] }
 0x2a7   : > { %4289 = vmatpush2.bf16.msra.mxu1 %v6904_v10  ;;  %v6849_v10 = vcombine.high %v955_v6, %v959_v7  ;;  %v1207_v14 = vld [vmem:[%s8374_s17 + $0xdf0] sm:$0xff] }
 0x2a8   : > { %4290 = vmatprep.subr.bf16.mxu1 %v6897_v12  ;;  %v1079_v12 = vld [vmem:[%s8374_s17 + $0x9f0] sm:$0xff]  ;;  %v7096_v29 = vcombine.low %v1203_v13, %v1207_v14 }
 0x2a9   : > { %4250 = vmatpush2.bf16.msra.mxu0 %v6768_v19  ;;  %v6969_v19 = vcombine.high %v1075_v11, %v1079_v12  ;;  %v1195_v26 = vld [vmem:[%s8374_s17 + $0xd90] sm:$0xff]  ;;  %v6968_v28 = vcombine.low %v1075_v11, %v1079_v12 }
 0x2aa   : > { %4251 = vmatprep.subr.bf16.mxu0 %v6761_v24  ;;  %v1067_v24 = vld [vmem:[%s8374_s17 + $0x990] sm:$0xff] }
 0x2ab   : > { %4291 = vmatpush2.bf16.msra.mxu1 %v6896_v23  ;;  %v7097_v23 = vcombine.high %v1203_v13, %v1207_v14  ;;  %v1199_v27 = vld [vmem:[%s8374_s17 + $0xdb0] sm:$0xff] }
 0x2ac   : > { %4292 = vmatprep.subr.bf16.mxu1 %v6889_v25  ;;  %v1071_v25 = vld [vmem:[%s8374_s17 + $0x9b0] sm:$0xff] }
 0x2ad   : > { %4252 = vmatpush2.bf16.msra.mxu0 %v6760_v30  ;;  %v6961_v30 = vcombine.high %v1067_v24, %v1071_v25  ;;  %v1187_v38 = vld [vmem:[%s8374_s17 + $0xd50] sm:$0xff] }
 0x2ae   : > { %4253 = vmatprep.subr.bf16.mxu0 %v6753_v34  ;;  %v1059_v34 = vld [vmem:[%s8374_s17 + $0x950] sm:$0xff] }
 0x2af   : > { %4293 = vmatpush2.bf16.msra.mxu1 %v6888_v32  ;;  %v7089_v32 = vcombine.high %v1195_v26, %v1199_v27  ;;  %v1191_v39 = vld [vmem:[%s8374_s17 + $0xd70] sm:$0xff] }
 0x2b0   : > { %4294 = vmatprep.subr.bf16.mxu1 %v6881_v35  ;;  %v1063_v35 = vld [vmem:[%s8374_s17 + $0x970] sm:$0xff] }
 0x2b1   : > { %4254 = vmatpush2.bf16.msra.mxu0 %v6752_v41  ;;  %v6953_v49 = vcombine.high %v1059_v34, %v1063_v35  ;;  %v1183_v57 = vld [vmem:[%s8374_s17 + $0xd30] sm:$0xff] }
 0x2b2   : > { %4255 = vmatprep.subr.bf16.mxu0 %v6745_v44  ;;  %v1043_v4 = vld [vmem:[%s8374_s17 + $0x8d0] sm:$0xff] }
 0x2b3   : > { %4295 = vmatpush2.bf16.msra.mxu1 %v6880_v43  ;;  %v6960_v43 = vcombine.low %v1067_v24, %v1071_v25  ;;  %v1047_v5 = vld [vmem:[%s8374_s17 + $0x8f0] sm:$0xff] }
 0x2b4   : > { %4296 = vmatprep.subr.bf16.mxu1 %v6873_v47  ;;  %v7088_v47 = vcombine.low %v1195_v26, %v1199_v27  ;;  %v1171_v6 = vld [vmem:[%s8374_s17 + $0xcd0] sm:$0xff] }
 0x2b5   : > { %4256 = vmatpush2.bf16.msra.mxu0 %v6744_v52  ;;  %v1051_v52 = vld [vmem:[%s8374_s17 + $0x910] sm:$0xff] }
 0x2b6   : > { %4257 = vmatprep.subr.bf16.mxu0 %v6737_v54  ;;  %v1175_v7 = vld [vmem:[%s8374_s17 + $0xcf0] sm:$0xff] }
 0x2b7   : > { %4297 = vmatpush2.bf16.msra.mxu1 %v6872_v53  ;;  %v1055_v53 = vld [vmem:[%s8374_s17 + $0x930] sm:$0xff] }
 0x2b8   : > { %4298 = vmatprep.subr.bf16.mxu1 %v6865_v56  ;;  %v1179_v56 = vld [vmem:[%s8374_s17 + $0xd10] sm:$0xff] }
 0x2b9   : > { %4258 = vmatpush2.bf16.msra.mxu0 %v6736_v61  ;;  %v7080_v61 = vcombine.low %v1187_v38, %v1191_v39  ;;  %v1035_v11 = vld [vmem:[%s8374_s17 + $0x890] sm:$0xff] }
 0x2ba   : > { %4259 = vmatprep.subr.bf16.mxu0 %v6729_v2  ;;  %v1039_v12 = vld [vmem:[%s8374_s17 + $0x8b0] sm:$0xff] }
 0x2bb   : > { %4299 = vmatpush2.bf16.msra.mxu1 %v6864_v63  ;;  %v6945_v63 = vcombine.high %v1051_v52, %v1055_v53  ;;  %v1163_v13 = vld [vmem:[%s8374_s17 + $0xc90] sm:$0xff] }
 0x2bc   : > { %4300 = vmatprep.subr.bf16.mxu1 %v6857_v3  ;;  %v7073_v3 = vcombine.high %v1179_v56, %v1183_v57  ;;  %v1167_v14 = vld [vmem:[%s8374_s17 + $0xcb0] sm:$0xff] }
 0x2bd   : > { %4260 = vmatpush2.bf16.msra.mxu0 %v6728_v45  ;;  %v6944_v45 = vcombine.low %v1051_v52, %v1055_v53  ;;  %v1027_v24 = vld [vmem:[%s8374_s17 + $0x850] sm:$0xff] }
 0x2be   : > { %4261 = vmatprep.subr.bf16.mxu0 %v6721_v9  ;;  %v6937_v9 = vcombine.high %v1043_v4, %v1047_v5  ;;  %v1031_v25 = vld [vmem:[%s8374_s17 + $0x870] sm:$0xff] }
 0x2bf   : > { %4301 = vmatpush2.bf16.msra.mxu1 %v6856_v48  ;;  %v7072_v48 = vcombine.low %v1179_v56, %v1183_v57  ;;  %v1155_v26 = vld [vmem:[%s8374_s17 + $0xc50] sm:$0xff] }
 0x2c0   : > { %4302 = vmatprep.subr.bf16.mxu1 %v6849_v10  ;;  %v7065_v10 = vcombine.high %v1171_v6, %v1175_v7  ;;  %v1159_v27 = vld [vmem:[%s8374_s17 + $0xc70] sm:$0xff] }
 0x2c1   : > { %4262 = vmatpush2.bf16.msra.mxu0 %v6720_v17  ;;  %v6936_v17 = vcombine.low %v1043_v4, %v1047_v5  ;;  %v1135_v56 = vld [vmem:[%s8374_s17 + $0xbb0] sm:$0xff] }
 0x2c2   : > { %4313 = vmatprep.subr.bf16.mxu0 %v6969_v19  ;;  %v6929_v19 = vcombine.high %v1035_v11, %v1039_v12  ;;  %v1259_v57 = vld [vmem:[%s8374_s17 + $0xf90] sm:$0xff] }
 0x2c3   : > { %4303 = vmatpush2.bf16.msra.mxu1 %v6848_v18  ;;  %v7064_v18 = vcombine.low %v1171_v6, %v1175_v7  ;;  %v1251_v4 = vld [vmem:[%s8374_s17 + $0xf50] sm:$0xff] }
 0x2c4   : > { %4354 = vmatprep.subr.bf16.mxu1 %v7097_v23  ;;  %v4019_v37 = vpop.f32.mrf.mxu0  ;;  %4264 = vmatmul.mubr.bf16.vlgmr.msra.gmra.mxu0 %v8483_v42  ;;  %v7057_v23 = vcombine.high %v1163_v13, %v1167_v14  ;;  %v1255_v5 = vld [vmem:[%s8374_s17 + $0xf70] sm:$0xff] }
 0x2c5   : > { %v4020_v40 = vadd.f32 %v4019_v37, %v8734_v62  ;;  %4314 = vmatpush1.bf16.msra.mxu0 %v6968_v28  ;;  %v7081_v62 = vcombine.high %v1187_v38, %v1191_v39  ;;  %4345 = vmatprep.mubr.bf16.mxu0 %v8501_v16  ;;  %v6928_v28 = vcombine.low %v1035_v11, %v1039_v12  ;;  %v1147_v37 = vld [vmem:[%s8374_s17 + $0xc10] sm:$0xff] }
 0x2c6   : > { %v4060_v41 = vpop.f32.mrf.mxu1  ;;  %4305 = vmatmul.mubr.bf16.vlgmr.msra.gmra.mxu1 %v8491_v46  ;;  %v4021_v44 = vpop.f32.mrf.mxu0  ;;  %4315 = vmatprep.subr.bf16.mxu0 %v6961_v30  ;;  %v6921_v30 = vcombine.high %v1027_v24, %v1031_v25  ;;  %v1151_v38 = vld [vmem:[%s8374_s17 + $0xc30] sm:$0xff]  ;;  %v6920_v39 = vcombine.low %v1027_v24, %v1031_v25 }
 0x2c7   : > { %4355 = vmatpush1.bf16.msra.mxu1 %v7096_v29  ;;  %v8807_v50 = vadd.f32 %v4060_v41, %v4020_v40  ;;  %v4022_v15 = vadd.f32 %v4021_v44, %v8742_v8  ;;  %4386 = vmatprep.mubr.bf16.mxu1 %v8506_v55  ;;  %v6952_v8 = vcombine.low %v1059_v34, %v1063_v35  ;;  %v1019_v34 = vld [vmem:[%s8374_s17 + $0x810] sm:$0xff] }
 0x2c8   : > { %v4062_v51 = vpop.f32.mrf.mxu1  ;;  %4356 = vmatprep.subr.bf16.mxu1 %v7089_v32  ;;  %v4023_v54 = vpop.f32.mrf.mxu0  ;;  %v7056_v29 = vcombine.low %v1163_v13, %v1167_v14  ;;  %v7049_v32 = vcombine.high %v1155_v26, %v1159_v27  ;;  %v1023_v35 = vld [vmem:[%s8374_s17 + $0x830] sm:$0xff]  ;;  %v7048_v40 = vcombine.low %v1155_v26, %v1159_v27  ;;  %v7144_v14 = vcombine.low %v1251_v4, %v1255_v5 }
 0x2c9   : > { %v8816_v58 = vadd.f32 %v4062_v51, %v4022_v15  ;;  %4316 = vmatpush1.bf16.msra.mxu0 %v6960_v43  ;;  %v6913_v41 = vcombine.high %v1019_v34, %v1023_v35  ;;  %v7041_v43 = vcombine.high %v1147_v37, %v1151_v38  ;;  %v1139_v44 = vld [vmem:[%s8374_s17 + $0xbd0] sm:$0xff]  ;;  %v6912_v51 = vcombine.low %v1019_v34, %v1023_v35 }
 0x2ca   : > { %v4064_v59 = vpop.f32.mrf.mxu1  ;;  %v4024_v60 = vpop.f32.mrf.mxu0  ;;  %4317 = vmatprep.subr.bf16.mxu0 %v6953_v49  ;;  %v1267_v49 = vld [vmem:[%s8374_s17 + $0xfd0] sm:$0xff] }
 0x2cb   : > { %4357 = vmatpush1.bf16.msra.mxu1 %v7088_v47  ;;  %v1143_v47 = vld [vmem:[%s8374_s17 + $0xbf0] sm:$0xff] }
 0x2cc   : > { %v4065_v2 = vpop.f32.mrf.mxu1  ;;  %4358 = vmatprep.subr.bf16.mxu1 %v7081_v62  ;;  %v1271_v15 = vld [vmem:[%s8374_s17 + $0xff0] sm:$0xff]  ;;  %v7040_v62 = vcombine.low %v1147_v37, %v1151_v38  ;;  %v7033_v52 = vcombine.high %v1139_v44, %v1143_v47 }
 0x2cd   : > { %4318 = vmatpush1.bf16.msra.mxu0 %v6952_v8  ;;  %v7161_v53 = vcombine.high %v1267_v49, %v1271_v15  ;;  %v1131_v54 = vld [vmem:[%s8374_s17 + $0xb90] sm:$0xff]  ;;  %v7032_v8 = vcombine.low %v1139_v44, %v1143_v47  ;;  %v7160_v60 = vcombine.low %v1267_v49, %v1271_v15 }
 0x2ce   : > { %4319 = vmatprep.subr.bf16.mxu0 %v6945_v63  ;;  %v1263_v59 = vld [vmem:[%s8374_s17 + $0xfb0] sm:$0xff]  ;;  %v7024_v6 = vcombine.low %v1131_v54, %v1135_v56 }
 0x2cf   : > { %4359 = vmatpush1.bf16.msra.mxu1 %v7080_v61  ;;  %v7025_v61 = vcombine.high %v1131_v54, %v1135_v56  ;;  %v7153_v63 = vcombine.high %v1259_v57, %v1263_v59  ;;  %v1123_v2 = vld [vmem:[%s8374_s17 + $0xb50] sm:$0xff]  ;;  %v7152_v7 = vcombine.low %v1259_v57, %v1263_v59 }
 0x2d0   : > { %4360 = vmatprep.subr.bf16.mxu1 %v7073_v3  ;;  %v1127_v3 = vld [vmem:[%s8374_s17 + $0xb70] sm:$0xff] }
 0x2d1   : > { %4320 = vmatpush1.bf16.msra.mxu0 %v6944_v45  ;;  %v7017_v45 = vcombine.high %v1123_v2, %v1127_v3  ;;  %v1243_v11 = vld [vmem:[%s8374_s17 + $0xf10] sm:$0xff]  ;;  %v7016_v13 = vcombine.low %v1123_v2, %v1127_v3  ;;  %v948_v2 = vld [vmem:[%s8374_s17 + $0x5d8] sm:$0xff] }
 0x2d2   : > { %4321 = vmatprep.subr.bf16.mxu0 %v6937_v9  ;;  %v1115_v9 = vld [vmem:[%s8374_s17 + $0xb10] sm:$0xff]  ;;  %v952_v3 = vld [vmem:[%s8374_s17 + $0x5f8] sm:$0xff] }
 0x2d3   : > { %4361 = vmatpush1.bf16.msra.mxu1 %v7072_v48  ;;  %v7145_v48 = vcombine.high %v1251_v4, %v1255_v5  ;;  %v1247_v12 = vld [vmem:[%s8374_s17 + $0xf30] sm:$0xff]  ;;  %v1285_v5 = vsub.s32 2, %v8707_v22 }
 0x2d4   : > { %4362 = vmatprep.subr.bf16.mxu1 %v7065_v10  ;;  %v1119_v10 = vld [vmem:[%s8374_s17 + $0xb30] sm:$0xff]  ;;  %v7136_v27 = vcombine.low %v1243_v11, %v1247_v12 }
 0x2d5   : > { %4322 = vmatpush1.bf16.msra.mxu0 %v6936_v17  ;;  %v7009_v17 = vcombine.high %v1115_v9, %v1119_v10  ;;  %v1235_v24 = vld [vmem:[%s8374_s17 + $0xed0] sm:$0xff]  ;;  %v7008_v26 = vcombine.low %v1115_v9, %v1119_v10  ;;  %v812_v9 = vld [vmem:[%s8374_s17 + $0x198] sm:$0xff] }
 0x2d6   : > { %4323 = vmatprep.subr.bf16.mxu0 %v6929_v19  ;;  %v1107_v19 = vld [vmem:[%s8374_s17 + $0xad0] sm:$0xff]  ;;  %v816_v10 = vld [vmem:[%s8374_s17 + $0x1b8] sm:$0xff] }
 0x2d7   : > { %4363 = vmatpush1.bf16.msra.mxu1 %v7064_v18  ;;  %v7137_v18 = vcombine.high %v1243_v11, %v1247_v12  ;;  %v1239_v25 = vld [vmem:[%s8374_s17 + $0xef0] sm:$0xff]  ;;  %v940_v11 = vld [vmem:[%s8374_s17 + $0x598] sm:$0xff] }
 0x2d8   : > { %4364 = vmatprep.subr.bf16.mxu1 %v7057_v23  ;;  %v1111_v23 = vld [vmem:[%s8374_s17 + $0xaf0] sm:$0xff]  ;;  %v7128_v38 = vcombine.low %v1235_v24, %v1239_v25  ;;  %v944_v12 = vld [vmem:[%s8374_s17 + $0x5b8] sm:$0xff] }
 0x2d9   : > { %4324 = vmatpush1.bf16.msra.mxu0 %v6928_v28  ;;  %v7001_v28 = vcombine.high %v1107_v19, %v1111_v23  ;;  %v1227_v34 = vld [vmem:[%s8374_s17 + $0xe90] sm:$0xff]  ;;  %v7000_v37 = vcombine.low %v1107_v19, %v1111_v23  ;;  %v6835_v23 = vcombine.high %v940_v11, %v944_v12 }
 0x2da   : > { %4325 = vmatprep.subr.bf16.mxu0 %v6921_v30  ;;  %v1099_v30 = vld [vmem:[%s8374_s17 + $0xa90] sm:$0xff] }
 0x2db   : > { %4365 = vmatpush1.bf16.msra.mxu1 %v7056_v29  ;;  %v7129_v29 = vcombine.high %v1235_v24, %v1239_v25  ;;  %v1231_v35 = vld [vmem:[%s8374_s17 + $0xeb0] sm:$0xff]  ;;  %v804_v24 = vld [vmem:[%s8374_s17 + $0x158] sm:$0xff] }
 0x2dc   : > { %4366 = vmatprep.subr.bf16.mxu1 %v7049_v32  ;;  %v1103_v32 = vld [vmem:[%s8374_s17 + $0xab0] sm:$0xff]  ;;  %v7120_v15 = vcombine.low %v1227_v34, %v1231_v35  ;;  %v808_v25 = vld [vmem:[%s8374_s17 + $0x178] sm:$0xff] }
 0x2dd   : > { %4326 = vmatpush1.bf16.msra.mxu0 %v6920_v39  ;;  %v6993_v39 = vcombine.high %v1099_v30, %v1103_v32  ;;  %v1219_v44 = vld [vmem:[%s8374_s17 + $0xe50] sm:$0xff]  ;;  %v6992_v49 = vcombine.low %v1099_v30, %v1103_v32  ;;  %v6706_v32 = vcombine.low %v812_v9, %v816_v10 }
 0x2de   : > { %4327 = vmatprep.subr.bf16.mxu0 %v6913_v41  ;;  %v1091_v41 = vld [vmem:[%s8374_s17 + $0xa50] sm:$0xff] }
 0x2df   : > { %4367 = vmatpush1.bf16.msra.mxu1 %v7048_v40  ;;  %v7121_v40 = vcombine.high %v1227_v34, %v1231_v35  ;;  %v1223_v47 = vld [vmem:[%s8374_s17 + $0xe70] sm:$0xff]  ;;  %v6834_v34 = vcombine.low %v940_v11, %v944_v12  ;;  %v6699_v35 = vcombine.high %v804_v24, %v808_v25  ;;  %v772_v12 = vld [vmem:[%s8374_s17 + $0x58] sm:$0xff] }
 0x2e0   : > { %4368 = vmatprep.subr.bf16.mxu1 %v7041_v43  ;;  %v1095_v43 = vld [vmem:[%s8374_s17 + $0xa70] sm:$0xff]  ;;  %v7112_v59 = vcombine.low %v1219_v44, %v1223_v47 }
 0x2e1   : > { %4328 = vmatpush1.bf16.msra.mxu0 %v6912_v51  ;;  %v6985_v51 = vcombine.high %v1091_v41, %v1095_v43  ;;  %v1211_v54 = vld [vmem:[%s8374_s17 + $0xe10] sm:$0xff]  ;;  %v6984_v57 = vcombine.low %v1091_v41, %v1095_v43  ;;  %v796_v41 = vld [vmem:[%s8374_s17 + $0x118] sm:$0xff] }
 0x2e2   : > { %4329 = vmatprep.subr.bf16.mxu0 %v7033_v52  ;;  %v1083_v52 = vld [vmem:[%s8374_s17 + $0xa10] sm:$0xff]  ;;  %v800_v43 = vld [vmem:[%s8374_s17 + $0x138] sm:$0xff] }
 0x2e3   : > { %4369 = vmatpush1.bf16.msra.mxu1 %v7040_v62  ;;  %v7113_v62 = vcombine.high %v1219_v44, %v1223_v47  ;;  %v1215_v56 = vld [vmem:[%s8374_s17 + $0xe30] sm:$0xff]  ;;  %v924_v47 = vld [vmem:[%s8374_s17 + $0x518] sm:$0xff] }
 0x2e4   : > { %4370 = vmatprep.subr.bf16.mxu1 %v7161_v53  ;;  %v1087_v53 = vld [vmem:[%s8374_s17 + $0xa30] sm:$0xff] }
 0x2e5   : > { %4330 = vmatpush2.bf16.msra.mxu0 %v7032_v8  ;;  %v6977_v8 = vcombine.high %v1083_v52, %v1087_v53  ;;  %v6976_v4 = vcombine.low %v1083_v52, %v1087_v53 }
 0x2e6   : > { %4331 = vmatprep.subr.bf16.mxu0 %v7025_v61  ;;  %v820_v61 = vld [vmem:[%s8374_s17 + $0x1d8] sm:$0xff] }
 0x2e7   : > { %4371 = vmatpush2.bf16.msra.mxu1 %v7160_v60  ;;  %v7105_v60 = vcombine.high %v1211_v54, %v1215_v56 }
 0x2e8   : > { %4372 = vmatprep.subr.bf16.mxu1 %v7153_v63  ;;  %v824_v63 = vld [vmem:[%s8374_s17 + $0x1f8] sm:$0xff] }
 0x2e9   : > { %4332 = vmatpush2.bf16.msra.mxu0 %v7024_v6  ;;  %v7104_v6 = vcombine.low %v1211_v54, %v1215_v56  ;;  %v6691_v54 = vcombine.high %v796_v41, %v800_v43 }
 0x2ea   : > { %4333 = vmatprep.subr.bf16.mxu0 %v7017_v45  ;;  %v6843_v45 = vcombine.high %v948_v2, %v952_v3 }
 0x2eb   : > { %4373 = vmatpush2.bf16.msra.mxu1 %v7152_v7  ;;  %v6715_v7 = vcombine.high %v820_v61, %v824_v63 }
 0x2ec   : > { %4374 = vmatprep.subr.bf16.mxu1 %v7145_v48  ;;  %v1289_v48 = vsub.s32 3, %v8707_v22 }
 0x2ed   : > { %4334 = vmatpush2.bf16.msra.mxu0 %v7016_v13  ;;  %v1286_v13 = vrot.slane %v8715_v33, %v1285_v5 }
 0x2ee   : > { %4335 = vmatprep.subr.bf16.mxu0 %v7009_v17  ;;  %v6842_v17 = vcombine.low %v948_v2, %v952_v3  ;;  %v1290_v19 = vrot.slane %v8715_v33, %v1289_v48  ;;  %v780_v3 = vld [vmem:[%s8374_s17 + $0x98] sm:$0xff] }
 0x2ef   : > { %4375 = vmatpush2.bf16.msra.mxu1 %v7144_v14  ;;  %v6714_v14 = vcombine.low %v820_v61, %v824_v63 }
 0x2f0   : > { %4376 = vmatprep.subr.bf16.mxu1 %v7137_v18  ;;  %v6707_v18 = vcombine.high %v812_v9, %v816_v10 }
 0x2f1   : > { %4336 = vmatpush2.bf16.msra.mxu0 %v7008_v26 }
 0x2f2   : > { %4337 = vmatprep.subr.bf16.mxu0 %v7001_v28  ;;  %v936_v28 = vld [vmem:[%s8374_s17 + $0x578] sm:$0xff] }
 0x2f3   : > { %4377 = vmatpush2.bf16.msra.mxu1 %v7136_v27  ;;  %v932_v27 = vld [vmem:[%s8374_s17 + $0x558] sm:$0xff] }
 0x2f4   : > { %4378 = vmatprep.subr.bf16.mxu1 %v7129_v29  ;;  %v6826_v53 = vcombine.low %v932_v27, %v936_v28 }
 0x2f5   : > { %4338 = vmatpush2.bf16.msra.mxu0 %v7000_v37 }
 0x2f6   : > { %4339 = vmatprep.subr.bf16.mxu0 %v6993_v39 }
 0x2f7   : > { %4379 = vmatpush2.bf16.msra.mxu1 %v7128_v38 }
 0x2f8   : > { %4380 = vmatprep.subr.bf16.mxu1 %v7121_v40  ;;  %v6827_v40 = vcombine.high %v932_v27, %v936_v28  ;;  %v892_v27 = vld [vmem:[%s8374_s17 + $0x418] sm:$0xff] }
 0x2f9   : > { %4340 = vmatpush2.bf16.msra.mxu0 %v6992_v49  ;;  %v928_v49 = vld [vmem:[%s8374_s17 + $0x538] sm:$0xff] }
 0x2fa   : > { %4341 = vmatprep.subr.bf16.mxu0 %v6985_v51  ;;  %v6819_v56 = vcombine.high %v924_v47, %v928_v49  ;;  %v6818_v61 = vcombine.low %v924_v47, %v928_v49  ;;  %v896_v28 = vld [vmem:[%s8374_s17 + $0x438] sm:$0xff] }
 0x2fb   : > { %4381 = vmatpush2.bf16.msra.mxu1 %v7120_v15  ;;  %v876_v47 = vld [vmem:[%s8374_s17 + $0x398] sm:$0xff] }
 0x2fc   : > { %4382 = vmatprep.subr.bf16.mxu1 %v7113_v62  ;;  %v6698_v62 = vcombine.low %v804_v24, %v808_v25  ;;  %v764_v25 = vld [vmem:[%s8374_s17 + $0x18] sm:$0xff] }
 0x2fd   : > { %4342 = vmatpush2.bf16.msra.mxu0 %v6984_v57  ;;  %v788_v57 = vld [vmem:[%s8374_s17 + $0xd8] sm:$0xff] }
 0x2fe   : > { %4343 = vmatprep.subr.bf16.mxu0 %v6977_v8  ;;  %v920_v8 = vld [vmem:[%s8374_s17 + $0x4f8] sm:$0xff] }
 0x2ff   : > { %4383 = vmatpush2.bf16.msra.mxu1 %v7112_v59  ;;  %v916_v59 = vld [vmem:[%s8374_s17 + $0x4d8] sm:$0xff] }
 0x300   : > { %4384 = vmatprep.subr.bf16.mxu1 %v7105_v60  ;;  %v6690_v60 = vcombine.low %v796_v41, %v800_v43  ;;  %v6811_v2 = vcombine.high %v916_v59, %v920_v8  ;;  %v6810_v9 = vcombine.low %v916_v59, %v920_v8  ;;  %v6786_v41 = vcombine.low %v892_v27, %v896_v28  ;;  %v880_v49 = vld [vmem:[%s8374_s17 + $0x3b8] sm:$0xff] }
 0x301   : > { %4344 = vmatpush2.bf16.msra.mxu0 %v6976_v4  ;;  %v784_v4 = vld [vmem:[%s8374_s17 + $0xb8] sm:$0xff]  ;;  %v6770_v8 = vcombine.low %v876_v47, %v880_v49 }
 0x302   : > { %4395 = vmatprep.subr.bf16.mxu0 %v6715_v7  ;;  %v912_v7 = vld [vmem:[%s8374_s17 + $0x4b8] sm:$0xff]  ;;  %v6675_v10 = vcombine.high %v780_v3, %v784_v4 }
 0x303   : > { %4385 = vmatpush2.bf16.msra.mxu1 %v7104_v6  ;;  %v908_v6 = vld [vmem:[%s8374_s17 + $0x498] sm:$0xff] }
 0x304   : > { %4436 = vmatprep.subr.bf16.mxu1 %v6843_v45  ;;  %v4101_v26 = vpop.f32.mrf.mxu0  ;;  %4346 = vmatmul.mubr.bf16.vlgmr.msra.gmra.mxu0 %v8573_v0  ;;  %v6803_v11 = vcombine.high %v908_v6, %v912_v7  ;;  %v1000_v59 = vld [vmem:[%s8374_s17 + $0x778] sm:$0xff] }
 0x305   : > { %v4102_v29 = vadd.f32 %v4101_v26, %v1286_v13  ;;  %4396 = vmatpush1.bf16.msra.mxu0 %v6714_v14  ;;  %4427 = vmatprep.mubr.bf16.mxu0 %v8433_v20  ;;  %v776_v13 = vld [vmem:[%s8374_s17 + $0x78] sm:$0xff] }
 0x306   : > { %v4142_v30 = vpop.f32.mrf.mxu1  ;;  %4387 = vmatmul.mubr.bf16.vlgmr.msra.gmra.mxu1 %v8577_v1  ;;  %v4103_v33 = vpop.f32.mrf.mxu0  ;;  %4397 = vmatprep.subr.bf16.mxu0 %v6707_v18  ;;  %v900_v14 = vld [vmem:[%s8374_s17 + $0x458] sm:$0xff]  ;;  %v6674_v18 = vcombine.low %v780_v3, %v784_v4 }
 0x307   : > { %4437 = vmatpush1.bf16.msra.mxu1 %v6842_v17  ;;  %v8888_v37 = vadd.f32 %v4142_v30, %v4102_v29  ;;  %v4104_v38 = vadd.f32 %v4103_v33, %v1290_v19  ;;  %4468 = vmatprep.mubr.bf16.mxu1 %v8437_v21  ;;  %v792_v21 = vld [vmem:[%s8374_s17 + $0xf8] sm:$0xff]  ;;  %v6802_v19 = vcombine.low %v908_v6, %v912_v7 }
 0x308   : > { %v4144_v39 = vpop.f32.mrf.mxu1  ;;  %4438 = vmatprep.subr.bf16.mxu1 %v6835_v23  ;;  %v4105_v44 = vpop.f32.mrf.mxu0  ;;  %v6683_v63 = vcombine.high %v788_v57, %v792_v21  ;;  %v6682_v45 = vcombine.low %v788_v57, %v792_v21  ;;  %v904_v17 = vld [vmem:[%s8374_s17 + $0x478] sm:$0xff]  ;;  %v6667_v23 = vcombine.high %v772_v12, %v776_v13  ;;  %v6666_v29 = vcombine.low %v772_v12, %v776_v13 }
 0x309   : > { %v8896_v15 = vadd.f32 %v4144_v39, %v4104_v38  ;;  %4398 = vmatpush1.bf16.msra.mxu0 %v6706_v32  ;;  %v6795_v24 = vcombine.high %v900_v14, %v904_v17  ;;  %v768_v26 = vld [vmem:[%s8374_s17 + $0x38] sm:$0xff]  ;;  %v6794_v30 = vcombine.low %v900_v14, %v904_v17  ;;  %v6787_v33 = vcombine.high %v892_v27, %v896_v28 }
 0x30a   : > { %v4146_v51 = vpop.f32.mrf.mxu1  ;;  %v4106_v52 = vpop.f32.mrf.mxu0  ;;  %4399 = vmatprep.subr.bf16.mxu0 %v6699_v35  ;;  %v6659_v32 = vcombine.high %v764_v25, %v768_v26  ;;  %v888_v35 = vld [vmem:[%s8374_s17 + $0x3f8] sm:$0xff] }
 0x30b   : > { %4439 = vmatpush1.bf16.msra.mxu1 %v6834_v34  ;;  %v884_v34 = vld [vmem:[%s8374_s17 + $0x3d8] sm:$0xff] }
 0x30c   : > { %v4147_v20 = vpop.f32.mrf.mxu1  ;;  %4440 = vmatprep.subr.bf16.mxu1 %v6827_v40  ;;  %v1012_v38 = vld [vmem:[%s8374_s17 + $0x7d8] sm:$0xff]  ;;  %v6658_v40 = vcombine.low %v764_v25, %v768_v26  ;;  %v6779_v43 = vcombine.high %v884_v34, %v888_v35  ;;  %v6778_v52 = vcombine.low %v884_v34, %v888_v35 }
 0x30d   : > { %4400 = vmatpush1.bf16.msra.mxu0 %v6698_v62  ;;  %v1016_v39 = vld [vmem:[%s8374_s17 + $0x7f8] sm:$0xff] }
 0x30e   : > { %4401 = vmatprep.subr.bf16.mxu0 %v6691_v54  ;;  %v6907_v44 = vcombine.high %v1012_v38, %v1016_v39  ;;  %v1004_v51 = vld [vmem:[%s8374_s17 + $0x798] sm:$0xff]  ;;  %v6771_v54 = vcombine.high %v876_v47, %v880_v49 }
 0x30f   : > { %4441 = vmatpush1.bf16.msra.mxu1 %v6826_v53  ;;  %v1008_v62 = vld [vmem:[%s8374_s17 + $0x7b8] sm:$0xff]  ;;  %v6906_v53 = vcombine.low %v1012_v38, %v1016_v39 }
 0x310   : > { %4442 = vmatprep.subr.bf16.mxu1 %v6819_v56  ;;  %v6899_v20 = vcombine.high %v1004_v51, %v1008_v62  ;;  %v868_v56 = vld [vmem:[%s8374_s17 + $0x358] sm:$0xff] }
 0x311   : > { %4402 = vmatpush1.bf16.msra.mxu0 %v6690_v60  ;;  %v872_v57 = vld [vmem:[%s8374_s17 + $0x378] sm:$0xff]  ;;  %v6898_v60 = vcombine.low %v1004_v51, %v1008_v62 }
 0x312   : > { %4403 = vmatprep.subr.bf16.mxu0 %v6683_v63  ;;  %v996_v21 = vld [vmem:[%s8374_s17 + $0x758] sm:$0xff]  ;;  %v6762_v7 = vcombine.low %v868_v56, %v872_v57 }
 0x313   : > { %4443 = vmatpush1.bf16.msra.mxu1 %v6818_v61  ;;  %v6763_v61 = vcombine.high %v868_v56, %v872_v57  ;;  %v6891_v63 = vcombine.high %v996_v21, %v1000_v59  ;;  %v864_v3 = vld [vmem:[%s8374_s17 + $0x338] sm:$0xff] }
 0x314   : > { %4444 = vmatprep.subr.bf16.mxu1 %v6811_v2  ;;  %v860_v2 = vld [vmem:[%s8374_s17 + $0x318] sm:$0xff] }
 0x315   : > { %4404 = vmatpush1.bf16.msra.mxu0 %v6682_v45  ;;  %v988_v4 = vld [vmem:[%s8374_s17 + $0x718] sm:$0xff]  ;;  %v6890_v45 = vcombine.low %v996_v21, %v1000_v59  ;;  %v6754_v17 = vcombine.low %v860_v2, %v864_v3 }
 0x316   : > { %4405 = vmatprep.subr.bf16.mxu0 %v6675_v10  ;;  %v992_v6 = vld [vmem:[%s8374_s17 + $0x738] sm:$0xff] }
 0x317   : > { %4445 = vmatpush1.bf16.msra.mxu1 %v6810_v9  ;;  %v6755_v9 = vcombine.high %v860_v2, %v864_v3  ;;  %v6883_v10 = vcombine.high %v988_v4, %v992_v6  ;;  %v856_v12 = vld [vmem:[%s8374_s17 + $0x2f8] sm:$0xff] }
 0x318   : > { %4446 = vmatprep.subr.bf16.mxu1 %v6803_v11  ;;  %v852_v11 = vld [vmem:[%s8374_s17 + $0x2d8] sm:$0xff] }
 0x319   : > { %4406 = vmatpush1.bf16.msra.mxu0 %v6674_v18  ;;  %v980_v13 = vld [vmem:[%s8374_s17 + $0x6d8] sm:$0xff]  ;;  %v6882_v18 = vcombine.low %v988_v4, %v992_v6  ;;  %v6746_v28 = vcombine.low %v852_v11, %v856_v12 }
 0x31a   : > { %4407 = vmatprep.subr.bf16.mxu0 %v6667_v23  ;;  %v984_v14 = vld [vmem:[%s8374_s17 + $0x6f8] sm:$0xff] }
 0x31b   : > { %4447 = vmatpush1.bf16.msra.mxu1 %v6802_v19  ;;  %v6747_v19 = vcombine.high %v852_v11, %v856_v12  ;;  %v6875_v23 = vcombine.high %v980_v13, %v984_v14  ;;  %v848_v25 = vld [vmem:[%s8374_s17 + $0x2b8] sm:$0xff] }
 0x31c   : > { %4448 = vmatprep.subr.bf16.mxu1 %v6795_v24  ;;  %v844_v24 = vld [vmem:[%s8374_s17 + $0x298] sm:$0xff] }
 0x31d   : > { %4408 = vmatpush1.bf16.msra.mxu0 %v6666_v29  ;;  %v972_v26 = vld [vmem:[%s8374_s17 + $0x698] sm:$0xff]  ;;  %v6874_v29 = vcombine.low %v980_v13, %v984_v14  ;;  %v6738_v39 = vcombine.low %v844_v24, %v848_v25 }
 0x31e   : > { %4409 = vmatprep.subr.bf16.mxu0 %v6659_v32  ;;  %v976_v27 = vld [vmem:[%s8374_s17 + $0x6b8] sm:$0xff] }
 0x31f   : > { %4449 = vmatpush1.bf16.msra.mxu1 %v6794_v30  ;;  %v6739_v30 = vcombine.high %v844_v24, %v848_v25  ;;  %v6867_v32 = vcombine.high %v972_v26, %v976_v27  ;;  %v840_v34 = vld [vmem:[%s8374_s17 + $0x278] sm:$0xff] }
 0x320   : > { %4450 = vmatprep.subr.bf16.mxu1 %v6787_v33  ;;  %v836_v33 = vld [vmem:[%s8374_s17 + $0x258] sm:$0xff] }
 0x321   : > { %4410 = vmatpush1.bf16.msra.mxu0 %v6658_v40  ;;  %v964_v35 = vld [vmem:[%s8374_s17 + $0x658] sm:$0xff]  ;;  %v6866_v40 = vcombine.low %v972_v26, %v976_v27  ;;  %v6730_v62 = vcombine.low %v836_v33, %v840_v34 }
 0x322   : > { %4411 = vmatprep.subr.bf16.mxu0 %v6779_v43  ;;  %v968_v38 = vld [vmem:[%s8374_s17 + $0x678] sm:$0xff] }
 0x323   : > { %4451 = vmatpush1.bf16.msra.mxu1 %v6786_v41  ;;  %v6731_v41 = vcombine.high %v836_v33, %v840_v34  ;;  %v6859_v43 = vcombine.high %v964_v35, %v968_v38  ;;  %v832_v47 = vld [vmem:[%s8374_s17 + $0x238] sm:$0xff] }
 0x324   : > { %4452 = vmatprep.subr.bf16.mxu1 %v6907_v44  ;;  %v828_v44 = vld [vmem:[%s8374_s17 + $0x218] sm:$0xff] }
 0x325   : > { %4412 = vmatpush2.bf16.msra.mxu0 %v6778_v52  ;;  %v956_v49 = vld [vmem:[%s8374_s17 + $0x618] sm:$0xff]  ;;  %v6858_v52 = vcombine.low %v964_v35, %v968_v38  ;;  %v6722_v59 = vcombine.low %v828_v44, %v832_v47 }
 0x326   : > { %4413 = vmatprep.subr.bf16.mxu0 %v6771_v54  ;;  %v960_v51 = vld [vmem:[%s8374_s17 + $0x638] sm:$0xff] }
 0x327   : > { %4453 = vmatpush2.bf16.msra.mxu1 %v6906_v53  ;;  %v6723_v53 = vcombine.high %v828_v44, %v832_v47  ;;  %v6851_v54 = vcombine.high %v956_v49, %v960_v51  ;;  %v1080_v56 = vld [vmem:[%s8374_s17 + $0x9f8] sm:$0xff] }
 0x328   : > { %4454 = vmatprep.subr.bf16.mxu1 %v6899_v20  ;;  %v1076_v20 = vld [vmem:[%s8374_s17 + $0x9d8] sm:$0xff] }
 0x329   : > { %4414 = vmatpush2.bf16.msra.mxu0 %v6770_v8  ;;  %v1204_v57 = vld [vmem:[%s8374_s17 + $0xdd8] sm:$0xff]  ;;  %v6850_v8 = vcombine.low %v956_v49, %v960_v51  ;;  %v6970_v6 = vcombine.low %v1076_v20, %v1080_v56 }
 0x32a   : > { %4415 = vmatprep.subr.bf16.mxu0 %v6763_v61  ;;  %v1208_v21 = vld [vmem:[%s8374_s17 + $0xdf8] sm:$0xff] }
 0x32b   : > { %4455 = vmatpush2.bf16.msra.mxu1 %v6898_v60  ;;  %v6971_v60 = vcombine.high %v1076_v20, %v1080_v56  ;;  %v7099_v61 = vcombine.high %v1204_v57, %v1208_v21  ;;  %v1072_v2 = vld [vmem:[%s8374_s17 + $0x9b8] sm:$0xff] }
 0x32c   : > { %4456 = vmatprep.subr.bf16.mxu1 %v6891_v63  ;;  %v1068_v63 = vld [vmem:[%s8374_s17 + $0x998] sm:$0xff] }
 0x32d   : > { %4416 = vmatpush2.bf16.msra.mxu0 %v6762_v7  ;;  %v1196_v3 = vld [vmem:[%s8374_s17 + $0xd98] sm:$0xff]  ;;  %v7098_v7 = vcombine.low %v1204_v57, %v1208_v21 }
 0x32e   : > { %4417 = vmatprep.subr.bf16.mxu0 %v6755_v9  ;;  %v1200_v4 = vld [vmem:[%s8374_s17 + $0xdb8] sm:$0xff] }
 0x32f   : > { %4457 = vmatpush2.bf16.msra.mxu1 %v6890_v45  ;;  %v6963_v45 = vcombine.high %v1068_v63, %v1072_v2  ;;  %v7091_v9 = vcombine.high %v1196_v3, %v1200_v4  ;;  %v1064_v11 = vld [vmem:[%s8374_s17 + $0x978] sm:$0xff]  ;;  %v7090_v24 = vcombine.low %v1196_v3, %v1200_v4 }
 0x330   : > { %4458 = vmatprep.subr.bf16.mxu1 %v6883_v10  ;;  %v1060_v10 = vld [vmem:[%s8374_s17 + $0x958] sm:$0xff] }
 0x331   : > { %4418 = vmatpush2.bf16.msra.mxu0 %v6754_v17  ;;  %v1188_v13 = vld [vmem:[%s8374_s17 + $0xd58] sm:$0xff]  ;;  %v6955_v25 = vcombine.high %v1060_v10, %v1064_v11  ;;  %v6954_v33 = vcombine.low %v1060_v10, %v1064_v11 }
 0x332   : > { %4419 = vmatprep.subr.bf16.mxu0 %v6747_v19  ;;  %v1192_v14 = vld [vmem:[%s8374_s17 + $0xd78] sm:$0xff]  ;;  %v6962_v19 = vcombine.low %v1068_v63, %v1072_v2 }
 0x333   : > { %4459 = vmatpush2.bf16.msra.mxu1 %v6882_v18  ;;  %v7083_v27 = vcombine.high %v1188_v13, %v1192_v14  ;;  %v7082_v35 = vcombine.low %v1188_v13, %v1192_v14  ;;  %v1176_v44 = vld [vmem:[%s8374_s17 + $0xcf8] sm:$0xff] }
 0x334   : > { %4460 = vmatprep.subr.bf16.mxu1 %v6875_v23  ;;  %v1140_v14 = vld [vmem:[%s8374_s17 + $0xbd8] sm:$0xff] }
 0x335   : > { %4420 = vmatpush2.bf16.msra.mxu0 %v6746_v28  ;;  %v1056_v28 = vld [vmem:[%s8374_s17 + $0x938] sm:$0xff] }
 0x336   : > { %4421 = vmatprep.subr.bf16.mxu0 %v6739_v30  ;;  %v1184_v30 = vld [vmem:[%s8374_s17 + $0xd38] sm:$0xff] }
 0x337   : > { %4461 = vmatpush2.bf16.msra.mxu1 %v6874_v29  ;;  %v1180_v29 = vld [vmem:[%s8374_s17 + $0xd18] sm:$0xff] }
 0x338   : > { %4462 = vmatprep.subr.bf16.mxu1 %v6867_v32  ;;  %v7074_v47 = vcombine.low %v1180_v29, %v1184_v30 }
 0x339   : > { %4422 = vmatpush2.bf16.msra.mxu0 %v6738_v39 }
 0x33a   : > { %4423 = vmatprep.subr.bf16.mxu0 %v6731_v41  ;;  %v1048_v41 = vld [vmem:[%s8374_s17 + $0x8f8] sm:$0xff] }
 0x33b   : > { %4463 = vmatpush2.bf16.msra.mxu1 %v6866_v40  ;;  %v1044_v40 = vld [vmem:[%s8374_s17 + $0x8d8] sm:$0xff] }
 0x33c   : > { %4464 = vmatprep.subr.bf16.mxu1 %v6859_v43  ;;  %v1172_v43 = vld [vmem:[%s8374_s17 + $0xcd8] sm:$0xff]  ;;  %v6939_v49 = vcombine.high %v1044_v40, %v1048_v41  ;;  %v6938_v20 = vcombine.low %v1044_v40, %v1048_v41 }
 0x33d   : > { %4424 = vmatpush2.bf16.msra.mxu0 %v6730_v62  ;;  %v7067_v51 = vcombine.high %v1172_v43, %v1176_v44  ;;  %v1036_v62 = vld [vmem:[%s8374_s17 + $0x898] sm:$0xff]  ;;  %v7066_v56 = vcombine.low %v1172_v43, %v1176_v44 }
 0x33e   : > { %4425 = vmatprep.subr.bf16.mxu0 %v6723_v53  ;;  %v1164_v53 = vld [vmem:[%s8374_s17 + $0xc98] sm:$0xff] }
 0x33f   : > { %4465 = vmatpush2.bf16.msra.mxu1 %v6858_v52  ;;  %v1040_v52 = vld [vmem:[%s8374_s17 + $0x8b8] sm:$0xff] }
 0x340   : > { %4466 = vmatprep.subr.bf16.mxu1 %v6851_v54  ;;  %v1168_v54 = vld [vmem:[%s8374_s17 + $0xcb8] sm:$0xff]  ;;  %v6931_v57 = vcombine.high %v1036_v62, %v1040_v52  ;;  %v6930_v63 = vcombine.low %v1036_v62, %v1040_v52 }
 0x341   : > { %4426 = vmatpush2.bf16.msra.mxu0 %v6722_v59  ;;  %v7059_v21 = vcombine.high %v1164_v53, %v1168_v54  ;;  %v1028_v59 = vld [vmem:[%s8374_s17 + $0x858] sm:$0xff]  ;;  %v7058_v2 = vcombine.low %v1164_v53, %v1168_v54 }
 0x342   : > { %4477 = vmatprep.subr.bf16.mxu0 %v6971_v60  ;;  %v1156_v60 = vld [vmem:[%s8374_s17 + $0xc58] sm:$0xff] }
 0x343   : > { %4467 = vmatpush2.bf16.msra.mxu1 %v6850_v8  ;;  %v1032_v8 = vld [vmem:[%s8374_s17 + $0x878] sm:$0xff] }
 0x344   : > { %4518 = vmatprep.subr.bf16.mxu1 %v7099_v61  ;;  %v4183_v12 = vpop.f32.mrf.mxu0  ;;  %4428 = vmatmul.mubr.bf16.vlgmr.msra.gmra.mxu0 %v8483_v42  ;;  %v1160_v61 = vld [vmem:[%s8374_s17 + $0xc78] sm:$0xff]  ;;  %v6923_v3 = vcombine.high %v1028_v59, %v1032_v8  ;;  %v6922_v10 = vcombine.low %v1028_v59, %v1032_v8 }
 0x345   : > { %v4184_v17 = vadd.f32 %v4183_v12, %v8888_v37  ;;  %4478 = vmatpush1.bf16.msra.mxu0 %v6970_v6  ;;  %v1052_v37 = vld [vmem:[%s8374_s17 + $0x918] sm:$0xff]  ;;  %4509 = vmatprep.mubr.bf16.mxu0 %v8501_v16  ;;  %v7075_v16 = vcombine.high %v1180_v29, %v1184_v30  ;;  %v7051_v4 = vcombine.high %v1156_v60, %v1160_v61 }
 0x346   : > { %v4224_v18 = vpop.f32.mrf.mxu1  ;;  %4469 = vmatmul.mubr.bf16.vlgmr.msra.gmra.mxu1 %v8491_v46  ;;  %v8961_v23 = vpop.f32.mrf.mxu0  ;;  %4479 = vmatprep.subr.bf16.mxu0 %v6963_v45  ;;  %v6947_v38 = vcombine.high %v1052_v37, %v1056_v28  ;;  %v1020_v6 = vld [vmem:[%s8374_s17 + $0x818] sm:$0xff]  ;;  %v7050_v11 = vcombine.low %v1156_v60, %v1160_v61 }
 0x347   : > { %4519 = vmatpush1.bf16.msra.mxu1 %v7098_v7  ;;  %v8963_v42 = vadd.f32 %v4224_v18, %v4184_v17  ;;  %4550 = vmatprep.mubr.bf16.mxu1 %v8506_v55  ;;  %v6946_v55 = vcombine.low %v1052_v37, %v1056_v28  ;;  %v1024_v7 = vld [vmem:[%s8374_s17 + $0x838] sm:$0xff] }
 0x348   : > { %v8965_v26 = vpop.f32.mrf.mxu1  ;;  %4520 = vmatprep.subr.bf16.mxu1 %v7091_v9  ;;  %v4187_v46 = vpop.f32.mrf.mxu0  ;;  %v1148_v45 = vld [vmem:[%s8374_s17 + $0xc18] sm:$0xff]  ;;  %v6915_v12 = vcombine.high %v1020_v6, %v1024_v7 }
 0x349   : > { %4480 = vmatpush1.bf16.msra.mxu0 %v6962_v19  ;;  %v1152_v9 = vld [vmem:[%s8374_s17 + $0xc38] sm:$0xff] }
 0x34a   : > { %v4228_v32 = vpop.f32.mrf.mxu1  ;;  %v4188_v34 = vpop.f32.mrf.mxu0  ;;  %4481 = vmatprep.subr.bf16.mxu0 %v6955_v25  ;;  %v7043_v13 = vcombine.high %v1148_v45, %v1152_v9  ;;  %v1144_v17 = vld [vmem:[%s8374_s17 + $0xbf8] sm:$0xff]  ;;  %v7042_v25 = vcombine.low %v1148_v45, %v1152_v9 }
 0x34b   : > { %4521 = vmatpush1.bf16.msra.mxu1 %v7090_v24  ;;  %v1268_v18 = vld [vmem:[%s8374_s17 + $0xfd8] sm:$0xff]  ;;  %v6914_v24 = vcombine.low %v1020_v6, %v1024_v7  ;;  %v7034_v32 = vcombine.low %v1140_v14, %v1144_v17 }
 0x34c   : > { %v4229_v39 = vpop.f32.mrf.mxu1  ;;  %4522 = vmatprep.subr.bf16.mxu1 %v7083_v27  ;;  %v1272_v19 = vld [vmem:[%s8374_s17 + $0xff8] sm:$0xff]  ;;  %v7035_v27 = vcombine.high %v1140_v14, %v1144_v17 }
 0x34d   : > { %4482 = vmatpush1.bf16.msra.mxu0 %v6954_v33  ;;  %v7163_v37 = vcombine.high %v1268_v18, %v1272_v19  ;;  %v1132_v28 = vld [vmem:[%s8374_s17 + $0xb98] sm:$0xff]  ;;  %v7162_v33 = vcombine.low %v1268_v18, %v1272_v19 }
 0x34e   : > { %4483 = vmatprep.subr.bf16.mxu0 %v6947_v38  ;;  %v1136_v46 = vld [vmem:[%s8374_s17 + $0xbb8] sm:$0xff] }
 0x34f   : > { %4523 = vmatpush1.bf16.msra.mxu1 %v7082_v35  ;;  %v1260_v29 = vld [vmem:[%s8374_s17 + $0xf98] sm:$0xff]  ;;  %v7027_v34 = vcombine.high %v1132_v28, %v1136_v46  ;;  %v7026_v41 = vcombine.low %v1132_v28, %v1136_v46  ;;  %v4186_v46 = vadd.f32 %v8961_v23, %v8896_v15  ;;  %v7528_v23 = vld [vmem:[%s8382_s10 + $0xe4] ss:$16 sps:$4 sm:$0xff]  }
 0x350   : > { %4524 = vmatprep.subr.bf16.mxu1 %v7075_v16  ;;  %v1264_v30 = vld [vmem:[%s8374_s17 + $0xfb8] sm:$0xff] }
 0x351   : > { %4484 = vmatpush1.bf16.msra.mxu0 %v6946_v55  ;;  %v7155_v35 = vcombine.high %v1260_v29, %v1264_v30  ;;  %v1124_v38 = vld [vmem:[%s8374_s17 + $0xb58] sm:$0xff]  ;;  %v7154_v43 = vcombine.low %v1260_v29, %v1264_v30 }
 0x352   : > { %4485 = vmatprep.subr.bf16.mxu0 %v6939_v49  ;;  %v1128_v39 = vld [vmem:[%s8374_s17 + $0xb78] sm:$0xff] }
 0x353   : > { %4525 = vmatpush1.bf16.msra.mxu1 %v7074_v47  ;;  %v1252_v16 = vld [vmem:[%s8374_s17 + $0xf58] sm:$0xff]  ;;  %v7019_v44 = vcombine.high %v1124_v38, %v1128_v39  ;;  %v7018_v52 = vcombine.low %v1124_v38, %v1128_v39  ;;  %v1293_v38 = vsub.s32 4, %v8707_v22  ;;  %v7531_v39 = vld [vmem:[%s8382_s10 + $0x2e4] ss:$16 sps:$4 sm:$0xff]  }
 0x354   : > { %4526 = vmatprep.subr.bf16.mxu1 %v7067_v51  ;;  %v1256_v40 = vld [vmem:[%s8374_s17 + $0xf78] sm:$0xff] }
 0x355   : > { %4486 = vmatpush1.bf16.msra.mxu0 %v6938_v20  ;;  %v7147_v55 = vcombine.high %v1252_v16, %v1256_v40  ;;  %v1116_v47 = vld [vmem:[%s8374_s17 + $0xb18] sm:$0xff]  ;;  %v7146_v53 = vcombine.low %v1252_v16, %v1256_v40  ;;  %v4560_v16 = vmax.f32 %v8816_v58, 0.0  ;;  %v7537_v58 = vld [vmem:[%s8382_s10 + $0x2c4] ss:$16 sps:$4 sm:$0xff]  }
 0x356   : > { %4487 = vmatprep.subr.bf16.mxu0 %v6931_v57  ;;  %v1120_v49 = vld [vmem:[%s8374_s17 + $0xb38] sm:$0xff] }
 0x357   : > { %4527 = vmatpush1.bf16.msra.mxu1 %v7066_v56  ;;  %v1244_v51 = vld [vmem:[%s8374_s17 + $0xf18] sm:$0xff]  ;;  %v7011_v54 = vcombine.high %v1116_v47, %v1120_v49  ;;  %v7010_v8 = vcombine.low %v1116_v47, %v1120_v49  ;;  %v9035_v47 = vpack.c.bf16 %v4560_v16, %v4560_v16  ;;  %v7589_v16 = vld [vmem:[%s8382_s10 + $0x3a0] ss:$16 sps:$4 sm:$0xff]  }
 0x358   : > { %4528 = vmatprep.subr.bf16.mxu1 %v7059_v21  ;;  %v1248_v62 = vld [vmem:[%s8374_s17 + $0xf38] sm:$0xff] }
 0x359   : > { %4488 = vmatpush1.bf16.msra.mxu0 %v6930_v63  ;;  %v7139_v20 = vcombine.high %v1244_v51, %v1248_v62  ;;  %v1108_v56 = vld [vmem:[%s8374_s17 + $0xad8] sm:$0xff]  ;;  %v7138_v60 = vcombine.low %v1244_v51, %v1248_v62 }
 0x35a   : > { %4489 = vmatprep.subr.bf16.mxu0 %v6923_v3  ;;  %v1112_v57 = vld [vmem:[%s8374_s17 + $0xaf8] sm:$0xff] }
 0x35b   : > { %4529 = vmatpush1.bf16.msra.mxu1 %v7058_v2  ;;  %v1236_v21 = vld [vmem:[%s8374_s17 + $0xed8] sm:$0xff]  ;;  %v7003_v61 = vcombine.high %v1108_v56, %v1112_v57  ;;  %v7002_v7 = vcombine.low %v1108_v56, %v1112_v57 }
 0x35c   : > { %4530 = vmatprep.subr.bf16.mxu1 %v7051_v4  ;;  %v1240_v59 = vld [vmem:[%s8374_s17 + $0xef8] sm:$0xff] }
 0x35d   : > { %4490 = vmatpush1.bf16.msra.mxu0 %v6922_v10  ;;  %v7131_v63 = vcombine.high %v1236_v21, %v1240_v59  ;;  %v1100_v2 = vld [vmem:[%s8374_s17 + $0xa98] sm:$0xff]  ;;  %v7130_v45 = vcombine.low %v1236_v21, %v1240_v59 }
 0x35e   : > { %4491 = vmatprep.subr.bf16.mxu0 %v6915_v12  ;;  %v1104_v3 = vld [vmem:[%s8374_s17 + $0xab8] sm:$0xff] }
 0x35f   : > { %4531 = vmatpush1.bf16.msra.mxu1 %v7050_v11  ;;  %v1228_v4 = vld [vmem:[%s8374_s17 + $0xe98] sm:$0xff]  ;;  %v6995_v9 = vcombine.high %v1100_v2, %v1104_v3  ;;  %v6994_v17 = vcombine.low %v1100_v2, %v1104_v3  ;;  %v7549_v3 = vld [vmem:[%s8382_s10 + $0x284] ss:$16 sps:$4 sm:$0xff]  }
 0x360   : > { %4532 = vmatprep.subr.bf16.mxu1 %v7043_v13  ;;  %v1232_v6 = vld [vmem:[%s8374_s17 + $0xeb8] sm:$0xff] }
 0x361   : > { %4492 = vmatpush1.bf16.msra.mxu0 %v6914_v24  ;;  %v7123_v10 = vcombine.high %v1228_v4, %v1232_v6  ;;  %v1092_v11 = vld [vmem:[%s8374_s17 + $0xa58] sm:$0xff]  ;;  %v7122_v18 = vcombine.low %v1228_v4, %v1232_v6  ;;  %v7544_v4 = vld [vmem:[%s8382_s10 + $0x80] ss:$16 sps:$4 sm:$0xff]  }
 0x362   : > { %4493 = vmatprep.subr.bf16.mxu0 %v7035_v27  ;;  %v1096_v12 = vld [vmem:[%s8374_s17 + $0xa78] sm:$0xff]  ;;  %v7547_v6 = vld [vmem:[%s8382_s10 + $0x280] ss:$16 sps:$4 sm:$0xff]  }
 0x363   : > { %4533 = vmatpush1.bf16.msra.mxu1 %v7042_v25  ;;  %v1220_v13 = vld [vmem:[%s8374_s17 + $0xe58] sm:$0xff]  ;;  %v6987_v19 = vcombine.high %v1092_v11, %v1096_v12  ;;  %v6986_v29 = vcombine.low %v1092_v11, %v1096_v12  ;;  %v7558_v11 = vld [vmem:[%s8382_s10 + $0x44] ss:$16 sps:$4 sm:$0xff]  }
 0x364   : > { %4534 = vmatprep.subr.bf16.mxu1 %v7163_v37  ;;  %v1224_v14 = vld [vmem:[%s8374_s17 + $0xe78] sm:$0xff]  ;;  %v7561_v12 = vld [vmem:[%s8382_s10 + $0x244] ss:$16 sps:$4 sm:$0xff]  }
 0x365   : > { %4494 = vmatpush2.bf16.msra.mxu0 %v7034_v32  ;;  %v7115_v24 = vcombine.high %v1220_v13, %v1224_v14  ;;  %v1084_v25 = vld [vmem:[%s8374_s17 + $0xa18] sm:$0xff]  ;;  %v7114_v30 = vcombine.low %v1220_v13, %v1224_v14  ;;  %v7556_v13 = vld [vmem:[%s8382_s10 + $0x40] ss:$16 sps:$4 sm:$0xff]  }
 0x366   : > { %4495 = vmatprep.subr.bf16.mxu0 %v7027_v34  ;;  %v1088_v27 = vld [vmem:[%s8374_s17 + $0xa38] sm:$0xff]  ;;  %v4227_v34 = vadd.f32 %v8965_v26, %v4186_v46  ;;  %v7559_v14 = vld [vmem:[%s8382_s10 + $0x240] ss:$16 sps:$4 sm:$0xff]   ;;  %v7576_v46 = vld [vmem:[%s8382_s10 + $0x1e4] ss:$16 sps:$4 sm:$0xff]  }
 0x367   : > { %4535 = vmatpush2.bf16.msra.mxu1 %v7162_v33  ;;  %v1212_v37 = vld [vmem:[%s8374_s17 + $0xe18] sm:$0xff]  ;;  %v6979_v32 = vcombine.high %v1084_v25, %v1088_v27 }
 0x368   : > { %4536 = vmatprep.subr.bf16.mxu1 %v7155_v35  ;;  %v1216_v28 = vld [vmem:[%s8374_s17 + $0xe38] sm:$0xff]  ;;  %v6978_v35 = vcombine.low %v1084_v25, %v1088_v27  ;;  %v4562_v40 = vmax.f32 %v4227_v34, 0.0  ;;  %v7570_v25 = vld [vmem:[%s8382_s10 + $0x4] ss:$16 sps:$4 sm:$0xff]  }
 0x369   : > { %4496 = vmatpush2.bf16.msra.mxu0 %v7026_v41  ;;  %v7107_v33 = vcombine.high %v1212_v37, %v1216_v28  ;;  %v7106_v15 = vcombine.low %v1212_v37, %v1216_v28  ;;  %v9029_v41 = vld [vmem:[%s8380_s16] sm:$0xff] }
 0x36a   : > { %4497 = vmatprep.subr.bf16.mxu0 %v7019_v44  ;;  %v1294_v26 = vrot.slane %v9029_v41, %v1293_v38  ;;  %v7529_v44 = vld [vmem:[%s8382_s10 + $0x2e0] ss:$16 sps:$4 sm:$0xff]   ;;  %v9039_v51 = vpack.c.bf16 %v4562_v40, %v4562_v40  ;;  %v7573_v27 = vld [vmem:[%s8382_s10 + $0x204] ss:$16 sps:$4 sm:$0xff]  }
 0x36b   : > { %4537 = vmatpush2.bf16.msra.mxu1 %v7154_v43  ;;  %v7526_v43 = vld [vmem:[%s8382_s10 + $0xe0] ss:$16 sps:$4 sm:$0xff]   ;;  %v7585_v34 = vld [vmem:[%s8382_s10 + $0x3c4] ss:$16 sps:$4 sm:$0xff]  }
 0x36c   : > { %4538 = vmatprep.subr.bf16.mxu1 %v7147_v55  ;;  %v7534_v55 = vld [vmem:[%s8382_s10 + $0xc4] ss:$16 sps:$4 sm:$0xff]   ;;  %v7568_v37 = vld [vmem:[%s8382_s10] ss:$16 sps:$4 sm:$0xff]  }
 0x36d   : > { %4498 = vmatpush2.bf16.msra.mxu0 %v7018_v52  ;;  %v7571_v28 = vld [vmem:[%s8382_s10 + $0x200] ss:$16 sps:$4 sm:$0xff]   ;;  %v7594_v40 = vld [vmem:[%s8382_s10 + $0x184] ss:$16 sps:$4 sm:$0xff]  }
 0x36e   : > { %4499 = vmatprep.subr.bf16.mxu0 %v7011_v54  ;;  %v7583_v38 = vld [vmem:[%s8382_s10 + $0x3c0] ss:$16 sps:$4 sm:$0xff]  }
 0x36f   : > { %4539 = vmatpush2.bf16.msra.mxu1 %v7146_v53  ;;  %v7532_v53 = vld [vmem:[%s8382_s10 + $0xc0] ss:$16 sps:$4 sm:$0xff]  }
 0x370   : > { %4540 = vmatprep.subr.bf16.mxu1 %v7139_v20  ;;  %v7535_v20 = vld [vmem:[%s8382_s10 + $0x2c0] ss:$16 sps:$4 sm:$0xff]  }
 0x371   : > { %4500 = vmatpush2.bf16.msra.mxu0 %v7010_v8  ;;  %v7538_v8 = vld [vmem:[%s8382_s10 + $0xa0] ss:$16 sps:$4 sm:$0xff]  }
 0x372   : > { %4501 = vmatprep.subr.bf16.mxu0 %v7003_v61  ;;  %v7541_v61 = vld [vmem:[%s8382_s10 + $0x2a0] ss:$16 sps:$4 sm:$0xff]  }
 0x373   : > { %4541 = vmatpush2.bf16.msra.mxu1 %v7138_v60 }
 0x374   : > { %4542 = vmatprep.subr.bf16.mxu1 %v7131_v63  ;;  %v7546_v63 = vld [vmem:[%s8382_s10 + $0x84] ss:$16 sps:$4 sm:$0xff]  }
 0x375   : > { %4502 = vmatpush2.bf16.msra.mxu0 %v7002_v7  ;;  %v7552_v7 = vld [vmem:[%s8382_s10 + $0x64] ss:$16 sps:$4 sm:$0xff]  }
 0x376   : > { %4503 = vmatprep.subr.bf16.mxu0 %v6995_v9  ;;  %v7550_v9 = vld [vmem:[%s8382_s10 + $0x60] ss:$16 sps:$4 sm:$0xff]  }
 0x377   : > { %4543 = vmatpush2.bf16.msra.mxu1 %v7130_v45  ;;  %v7555_v45 = vld [vmem:[%s8382_s10 + $0x264] ss:$16 sps:$4 sm:$0xff]  }
 0x378   : > { %4544 = vmatprep.subr.bf16.mxu1 %v7123_v10  ;;  %v7553_v10 = vld [vmem:[%s8382_s10 + $0x260] ss:$16 sps:$4 sm:$0xff]  }
 0x379   : > { %4504 = vmatpush2.bf16.msra.mxu0 %v6994_v17  ;;  %v7564_v17 = vld [vmem:[%s8382_s10 + $0x24] ss:$16 sps:$4 sm:$0xff]  }
 0x37a   : > { %4505 = vmatprep.subr.bf16.mxu0 %v6987_v19  ;;  %v7562_v19 = vld [vmem:[%s8382_s10 + $0x20] ss:$16 sps:$4 sm:$0xff]  }
 0x37b   : > { %4545 = vmatpush2.bf16.msra.mxu1 %v7122_v18  ;;  %v7567_v18 = vld [vmem:[%s8382_s10 + $0x224] ss:$16 sps:$4 sm:$0xff]  }
 0x37c   : > { %4546 = vmatprep.subr.bf16.mxu1 %v7115_v24  ;;  %v7565_v24 = vld [vmem:[%s8382_s10 + $0x220] ss:$16 sps:$4 sm:$0xff]  }
 0x37d   : > { %4506 = vmatpush2.bf16.msra.mxu0 %v6986_v29  ;;  %v7579_v29 = vld [vmem:[%s8382_s10 + $0x3e4] ss:$16 sps:$4 sm:$0xff]  }
 0x37e   : > { %4507 = vmatprep.subr.bf16.mxu0 %v6979_v32  ;;  %v7577_v32 = vld [vmem:[%s8382_s10 + $0x3e0] ss:$16 sps:$4 sm:$0xff]  }
 0x37f   : > { %4547 = vmatpush2.bf16.msra.mxu1 %v7114_v30  ;;  %v7574_v30 = vld [vmem:[%s8382_s10 + $0x1e0] ss:$16 sps:$4 sm:$0xff]  }
 0x380   : > { %4548 = vmatprep.subr.bf16.mxu1 %v7107_v33  ;;  %v7582_v33 = vld [vmem:[%s8382_s10 + $0x1c4] ss:$16 sps:$4 sm:$0xff]  }
 0x381   : > { %4508 = vmatpush2.bf16.msra.mxu0 %v6978_v35  ;;  %v7580_v35 = vld [vmem:[%s8382_s10 + $0x1c0] ss:$16 sps:$4 sm:$0xff]  }
 0x382   : > { %6115 = vmatprep.subr.bf16.mxu0 %v7528_v23  ;;  %v7591_v23 = vld [vmem:[%s8382_s10 + $0x3a4] ss:$16 sps:$4 sm:$0xff]  }
 0x383   : > { %4549 = vmatpush2.bf16.msra.mxu1 %v7106_v15  ;;  %v7588_v15 = vld [vmem:[%s8382_s10 + $0x1a4] ss:$16 sps:$4 sm:$0xff]  }
 0x384   : > { %6156 = vmatprep.subr.bf16.mxu1 %v7531_v39  ;;  %v4265_v49 = vpop.f32.mrf.mxu0  ;;  %4510 = vmatmul.mubr.bf16.vlgmr.msra.gmra.mxu0 %v8573_v0  ;;  %v7540_v0 = vld [vmem:[%s8382_s10 + $0xa4] ss:$16 sps:$4 sm:$0xff]   ;;  %v7586_v39 = vld [vmem:[%s8382_s10 + $0x1a0] ss:$16 sps:$4 sm:$0xff]  }
 0x385   : > { %v4266_v62 = vadd.f32 %v4265_v49, %v1294_v26  ;;  %6116 = vmatpush1.bf16.msra.mxu0 %v7526_v43  ;;  %6147 = vmatprep.mubr.bf16.mxu0 %v9035_v47  ;;  %v7597_v26 = vld [vmem:[%s8382_s10 + $0x384] ss:$16 sps:$4 sm:$0xff]   ;;  %v7592_v43 = vld [vmem:[%s8382_s10 + $0x180] ss:$16 sps:$4 sm:$0xff]  }
 0x386   : > { %v4306_v52 = vpop.f32.mrf.mxu1  ;;  %4551 = vmatmul.mubr.bf16.vlgmr.msra.gmra.mxu1 %v8577_v1  ;;  %v9044_v54 = vpop.f32.mrf.mxu0  ;;  %6117 = vmatprep.subr.bf16.mxu0 %v7534_v55  ;;  %v7543_v1 = vld [vmem:[%s8382_s10 + $0x2a4] ss:$16 sps:$4 sm:$0xff]  }
 0x387   : > { %6157 = vmatpush1.bf16.msra.mxu1 %v7529_v44  ;;  %v9048_v56 = vadd.f32 %v4306_v52, %v4266_v62  ;;  %6188 = vmatprep.mubr.bf16.mxu1 %v9039_v51  ;;  %v7595_v44 = vld [vmem:[%s8382_s10 + $0x380] ss:$16 sps:$4 sm:$0xff]   ;;  %v7600_v55 = vld [vmem:[%s8382_s10 + $0x164] ss:$16 sps:$4 sm:$0xff]  }
 0x388   : > { %v9051_v57 = vpop.f32.mrf.mxu1  ;;  %v4269_v21 = vpop.f32.mrf.mxu0  ;;  %6158 = vmatprep.subr.bf16.mxu1 %v7537_v58  ;;  %v7603_v49 = vld [vmem:[%s8382_s10 + $0x364] ss:$16 sps:$4 sm:$0xff]   ;;  %v7598_v58 = vld [vmem:[%s8382_s10 + $0x160] ss:$16 sps:$4 sm:$0xff]  }
 0x389   : > { %6118 = vmatpush1.bf16.msra.mxu0 %v7532_v53  ;;  %v7601_v62 = vld [vmem:[%s8382_s10 + $0x360] ss:$16 sps:$4 sm:$0xff]   ;;  %v7606_v52 = vld [vmem:[%s8382_s10 + $0x144] ss:$16 sps:$4 sm:$0xff]  }
 0x38a   : > { %v4310_v59 = vpop.f32.mrf.mxu1  ;;  %v4270_v60 = vpop.f32.mrf.mxu0  ;;  %6119 = vmatprep.subr.bf16.mxu0 %v7540_v0  ;;  %v7609_v53 = vld [vmem:[%s8382_s10 + $0x344] ss:$16 sps:$4 sm:$0xff]   ;;  %v7607_v0 = vld [vmem:[%s8382_s10 + $0x340] ss:$16 sps:$4 sm:$0xff]  }
 0x38b   : > { %6159 = vmatpush1.bf16.msra.mxu1 %v7535_v20  ;;  %v7604_v20 = vld [vmem:[%s8382_s10 + $0x140] ss:$16 sps:$4 sm:$0xff]   ;;  %v7615_v21 = vld [vmem:[%s8382_s10 + $0x324] ss:$16 sps:$4 sm:$0xff]   ;;  %v1297_v59 = vsub.s32 5, %v8707_v22 }
 0x38c   : > { %v4311_v2 = vpop.f32.mrf.mxu1  ;;  %6160 = vmatprep.subr.bf16.mxu1 %v7543_v1  ;;  %v7612_v1 = vld [vmem:[%s8382_s10 + $0x124] ss:$16 sps:$4 sm:$0xff]   ;;  %v7613_v60 = vld [vmem:[%s8382_s10 + $0x320] ss:$16 sps:$4 sm:$0xff]  }
 0x38d   : > { %6120 = vmatpush1.bf16.msra.mxu0 %v7538_v8  ;;  %v7610_v8 = vld [vmem:[%s8382_s10 + $0x120] ss:$16 sps:$4 sm:$0xff]   ;;  %v1298_v2 = vrot.slane %v9029_v41, %v1297_v59  ;;  %v7723_v59 = vld [vmem:[%s8382_s10 + $0x604] ss:$16 sps:$4 sm:$0xff]  }
 0x38e   : > { %6121 = vmatprep.subr.bf16.mxu0 %v7546_v63  ;;  %v7621_v63 = vld [vmem:[%s8382_s10 + $0x304] ss:$16 sps:$4 sm:$0xff]  }
 0x38f   : > { %6161 = vmatpush1.bf16.msra.mxu1 %v7541_v61  ;;  %v7618_v61 = vld [vmem:[%s8382_s10 + $0x104] ss:$16 sps:$4 sm:$0xff]  }
 0x390   : > { %6162 = vmatprep.subr.bf16.mxu1 %v7549_v3  ;;  %v7616_v3 = vld [vmem:[%s8382_s10 + $0x100] ss:$16 sps:$4 sm:$0xff]  }
 0x391   : > { %6122 = vmatpush1.bf16.msra.mxu0 %v7544_v4  ;;  %v4559_v4 = vmax.f32 %v8807_v50, 0.0  ;;  %v7627_v50 = vld [vmem:[%s8382_s10 + $0x4c4] ss:$16 sps:$4 sm:$0xff]  }
 0x392   : > { %6123 = vmatprep.subr.bf16.mxu0 %v7552_v7  ;;  %v7624_v7 = vld [vmem:[%s8382_s10 + $0x4e4] ss:$16 sps:$4 sm:$0xff]  }
 0x393   : > { %6163 = vmatpush1.bf16.msra.mxu1 %v7547_v6  ;;  %v7619_v6 = vld [vmem:[%s8382_s10 + $0x300] ss:$16 sps:$4 sm:$0xff]  }
 0x394   : > { %6164 = vmatprep.subr.bf16.mxu1 %v7555_v45  ;;  %v4561_v45 = vmax.f32 %v8963_v42, 0.0 }
 0x395   : > { %6124 = vmatpush1.bf16.msra.mxu0 %v7550_v9  ;;  %v7681_v9 = vld [vmem:[%s8382_s10 + $0x6e4] ss:$16 sps:$4 sm:$0xff]  }
 0x396   : > { %6125 = vmatprep.subr.bf16.mxu0 %v7558_v11  ;;  %v7622_v11 = vld [vmem:[%s8382_s10 + $0x4e0] ss:$16 sps:$4 sm:$0xff]  }
 0x397   : > { %6165 = vmatpush1.bf16.msra.mxu1 %v7553_v10  ;;  %v4268_v10 = vadd.f32 %v9044_v54, %v1298_v2  ;;  %v7646_v2 = vld [vmem:[%s8382_s10 + $0x5e0] ss:$16 sps:$4 sm:$0xff]  }
 0x398   : > { %6166 = vmatprep.subr.bf16.mxu1 %v7561_v12  ;;  %v9116_v12 = vpack.c.bf16 %v4559_v4, %v4559_v4  ;;  %v7727_v4 = vld [vmem:[%s8382_s10 + $0x7e0] ss:$16 sps:$4 sm:$0xff]  }
 0x399   : > { %6126 = vmatpush1.bf16.msra.mxu0 %v7556_v13  ;;  %v7679_v13 = vld [vmem:[%s8382_s10 + $0x6e0] ss:$16 sps:$4 sm:$0xff]   ;;  %v4309_v54 = vadd.f32 %v9051_v57, %v4268_v10  ;;  %v7741_v10 = vld [vmem:[%s8382_s10 + $0x7a4] ss:$16 sps:$4 sm:$0xff]  }
 0x39a   : > { %6127 = vmatprep.subr.bf16.mxu0 %v7564_v17  ;;  %v7687_v17 = vld [vmem:[%s8382_s10 + $0x6c4] ss:$16 sps:$4 sm:$0xff]  }
 0x39b   : > { %6167 = vmatpush1.bf16.msra.mxu1 %v7559_v14  ;;  %v9120_v14 = vpack.c.bf16 %v4561_v45, %v4561_v45  ;;  %v7654_v45 = vld [vmem:[%s8382_s10 + $0x5a4] ss:$16 sps:$4 sm:$0xff]  }
 0x39c   : > { %6168 = vmatprep.subr.bf16.mxu1 %v7567_v18 }
 0x39d   : > { %6128 = vmatpush1.bf16.msra.mxu0 %v7562_v19  ;;  %v7625_v19 = vld [vmem:[%s8382_s10 + $0x4c0] ss:$16 sps:$4 sm:$0xff]  }
 0x39e   : > { %6129 = vmatprep.subr.bf16.mxu0 %v7570_v25  ;;  %v7630_v25 = vld [vmem:[%s8382_s10 + $0x4a4] ss:$16 sps:$4 sm:$0xff]  }
 0x39f   : > { %6169 = vmatpush1.bf16.msra.mxu1 %v7565_v24 }
 0x3a0   : > { %6170 = vmatprep.subr.bf16.mxu1 %v7573_v27  ;;  %v7685_v27 = vld [vmem:[%s8382_s10 + $0x6c0] ss:$16 sps:$4 sm:$0xff]  }
 0x3a1   : > { %6130 = vmatpush1.bf16.msra.mxu0 %v7568_v37 }
 0x3a2   : > { %6131 = vmatprep.subr.bf16.mxu0 %v7576_v46  ;;  %v7693_v46 = vld [vmem:[%s8382_s10 + $0x6a4] ss:$16 sps:$4 sm:$0xff]  }
 0x3a3   : > { %6171 = vmatpush1.bf16.msra.mxu1 %v7571_v28 }
 0x3a4   : > { %6172 = vmatprep.subr.bf16.mxu1 %v7579_v29 }
 0x3a5   : > { %6132 = vmatpush2.bf16.msra.mxu0 %v7574_v30 }
 0x3a6   : > { %6133 = vmatprep.subr.bf16.mxu0 %v7582_v33 }
 0x3a7   : > { %6173 = vmatpush2.bf16.msra.mxu1 %v7577_v32  ;;  %v7628_v32 = vld [vmem:[%s8382_s10 + $0x4a0] ss:$16 sps:$4 sm:$0xff]  }
 0x3a8   : > { %6174 = vmatprep.subr.bf16.mxu1 %v7585_v34  ;;  %v7633_v34 = vld [vmem:[%s8382_s10 + $0x484] ss:$16 sps:$4 sm:$0xff]  }
 0x3a9   : > { %6134 = vmatpush2.bf16.msra.mxu0 %v7580_v35  ;;  %v7691_v35 = vld [vmem:[%s8382_s10 + $0x6a0] ss:$16 sps:$4 sm:$0xff]  }
 0x3aa   : > { %6135 = vmatprep.subr.bf16.mxu0 %v7588_v15 }
 0x3ab   : > { %6175 = vmatpush2.bf16.msra.mxu1 %v7583_v38 }
 0x3ac   : > { %6176 = vmatprep.subr.bf16.mxu1 %v7591_v23  ;;  %v7699_v23 = vld [vmem:[%s8382_s10 + $0x684] ss:$16 sps:$4 sm:$0xff]  }
 0x3ad   : > { %6136 = vmatpush2.bf16.msra.mxu0 %v7586_v39 }
 0x3ae   : > { %6137 = vmatprep.subr.bf16.mxu0 %v7594_v40  ;;  %v7636_v40 = vld [vmem:[%s8382_s10 + $0x464] ss:$16 sps:$4 sm:$0xff]  }
 0x3af   : > { %6177 = vmatpush2.bf16.msra.mxu1 %v7589_v16  ;;  %v7631_v16 = vld [vmem:[%s8382_s10 + $0x480] ss:$16 sps:$4 sm:$0xff]  }
 0x3b0   : > { %6178 = vmatprep.subr.bf16.mxu1 %v7597_v26  ;;  %v7697_v26 = vld [vmem:[%s8382_s10 + $0x680] ss:$16 sps:$4 sm:$0xff]  }
 0x3b1   : > { %6138 = vmatpush2.bf16.msra.mxu0 %v7592_v43  ;;  %v7705_v43 = vld [vmem:[%s8382_s10 + $0x664] ss:$16 sps:$4 sm:$0xff]  }
 0x3b2   : > { %6139 = vmatprep.subr.bf16.mxu0 %v7600_v55  ;;  %v7639_v55 = vld [vmem:[%s8382_s10 + $0x444] ss:$16 sps:$4 sm:$0xff]  }
 0x3b3   : > { %6179 = vmatpush2.bf16.msra.mxu1 %v7595_v44  ;;  %v7634_v44 = vld [vmem:[%s8382_s10 + $0x460] ss:$16 sps:$4 sm:$0xff]  }
 0x3b4   : > { %6180 = vmatprep.subr.bf16.mxu1 %v7603_v49  ;;  %v7703_v49 = vld [vmem:[%s8382_s10 + $0x660] ss:$16 sps:$4 sm:$0xff]  }
 0x3b5   : > { %6140 = vmatpush2.bf16.msra.mxu0 %v7598_v58  ;;  %v7711_v58 = vld [vmem:[%s8382_s10 + $0x644] ss:$16 sps:$4 sm:$0xff]  }
 0x3b6   : > { %6141 = vmatprep.subr.bf16.mxu0 %v7606_v52  ;;  %v7642_v52 = vld [vmem:[%s8382_s10 + $0x424] ss:$16 sps:$4 sm:$0xff]  }
 0x3b7   : > { %6181 = vmatpush2.bf16.msra.mxu1 %v7601_v62  ;;  %v7637_v62 = vld [vmem:[%s8382_s10 + $0x440] ss:$16 sps:$4 sm:$0xff]  }
 0x3b8   : > { %6182 = vmatprep.subr.bf16.mxu1 %v7609_v53  ;;  %v7709_v53 = vld [vmem:[%s8382_s10 + $0x640] ss:$16 sps:$4 sm:$0xff]  }
 0x3b9   : > { %6142 = vmatpush2.bf16.msra.mxu0 %v7604_v20  ;;  %v7717_v20 = vld [vmem:[%s8382_s10 + $0x624] ss:$16 sps:$4 sm:$0xff]  }
 0x3ba   : > { %6143 = vmatprep.subr.bf16.mxu0 %v7612_v1  ;;  %v7645_v1 = vld [vmem:[%s8382_s10 + $0x404] ss:$16 sps:$4 sm:$0xff]  }
 0x3bb   : > { %6183 = vmatpush2.bf16.msra.mxu1 %v7607_v0  ;;  %v7640_v0 = vld [vmem:[%s8382_s10 + $0x420] ss:$16 sps:$4 sm:$0xff]  }
 0x3bc   : > { %6184 = vmatprep.subr.bf16.mxu1 %v7615_v21  ;;  %v7715_v21 = vld [vmem:[%s8382_s10 + $0x620] ss:$16 sps:$4 sm:$0xff]  }
 0x3bd   : > { %6144 = vmatpush2.bf16.msra.mxu0 %v7610_v8  ;;  %v7643_v8 = vld [vmem:[%s8382_s10 + $0x400] ss:$16 sps:$4 sm:$0xff]  }
 0x3be   : > { %6145 = vmatprep.subr.bf16.mxu0 %v7618_v61  ;;  %v7721_v61 = vld [vmem:[%s8382_s10 + $0x600] ss:$16 sps:$4 sm:$0xff]  }
 0x3bf   : > { %6185 = vmatpush2.bf16.msra.mxu1 %v7613_v60  ;;  %v7648_v60 = vld [vmem:[%s8382_s10 + $0x5e4] ss:$16 sps:$4 sm:$0xff]  }
 0x3c0   : > { %6186 = vmatprep.subr.bf16.mxu1 %v7621_v63  ;;  %v7729_v63 = vld [vmem:[%s8382_s10 + $0x7e4] ss:$16 sps:$4 sm:$0xff]  }
 0x3c1   : > { %6146 = vmatpush2.bf16.msra.mxu0 %v7616_v3  ;;  %v7651_v3 = vld [vmem:[%s8382_s10 + $0x5c4] ss:$16 sps:$4 sm:$0xff]  }
 0x3c2   : > { %6197 = vmatprep.subr.bf16.mxu0 %v7624_v7  ;;  %v7649_v7 = vld [vmem:[%s8382_s10 + $0x5c0] ss:$16 sps:$4 sm:$0xff]  }
 0x3c3   : > { %6187 = vmatpush2.bf16.msra.mxu1 %v7619_v6  ;;  %v7735_v6 = vld [vmem:[%s8382_s10 + $0x7c4] ss:$16 sps:$4 sm:$0xff]  }
 0x3c4   : > { %6238 = vmatprep.subr.bf16.mxu1 %v7681_v9  ;;  %v9123_v42 = vpop.f32.mrf.mxu0  ;;  %6148 = vmatmul.mubr.bf16.vlgmr.msra.gmra.mxu0 %v9116_v12  ;;  %v7733_v9 = vld [vmem:[%s8382_s10 + $0x7c0] ss:$16 sps:$4 sm:$0xff]  }
 0x3c5   : > { %6198 = vmatpush1.bf16.msra.mxu0 %v7622_v11  ;;  %v7652_v11 = vld [vmem:[%s8382_s10 + $0x5a0] ss:$16 sps:$4 sm:$0xff]  }
 0x3c6   : > { %v9127_v18 = vpop.f32.mrf.mxu1  ;;  %6189 = vmatmul.mubr.bf16.vlgmr.msra.gmra.mxu1 %v9120_v14  ;;  %v4349_v24 = vpop.f32.mrf.mxu0  ;;  %6199 = vmatprep.subr.bf16.mxu0 %v7627_v50  ;;  %v7657_v50 = vld [vmem:[%s8382_s10 + $0x584] ss:$16 sps:$4 sm:$0xff]  }
 0x3c7   : > { %6239 = vmatpush1.bf16.msra.mxu1 %v7679_v13  ;;  %v4350_v37 = vadd.f32 %v4349_v24, %v4309_v54  ;;  %v7739_v13 = vld [vmem:[%s8382_s10 + $0x7a0] ss:$16 sps:$4 sm:$0xff]  }
 0x3c8   : > { %v4390_v28 = vpop.f32.mrf.mxu1  ;;  %6240 = vmatprep.subr.bf16.mxu1 %v7687_v17  ;;  %v4351_v57 = vpop.f32.mrf.mxu0  ;;  %v7747_v17 = vld [vmem:[%s8382_s10 + $0x784] ss:$16 sps:$4 sm:$0xff]   ;;  %v7655_v54 = vld [vmem:[%s8382_s10 + $0x580] ss:$16 sps:$4 sm:$0xff]  }
 0x3c9   : > { %v4391_v29 = vadd.f32 %v4390_v28, %v4350_v37  ;;  %6200 = vmatpush1.bf16.msra.mxu0 %v7625_v19  ;;  %v7660_v19 = vld [vmem:[%s8382_s10 + $0x564] ss:$16 sps:$4 sm:$0xff]   ;;  %v7745_v24 = vld [vmem:[%s8382_s10 + $0x780] ss:$16 sps:$4 sm:$0xff]  }
 0x3ca   : > { %v4392_v30 = vpop.f32.mrf.mxu1  ;;  %v4352_v33 = vpop.f32.mrf.mxu0  ;;  %6201 = vmatprep.subr.bf16.mxu0 %v7630_v25  ;;  %v7753_v25 = vld [vmem:[%s8382_s10 + $0x764] ss:$16 sps:$4 sm:$0xff]   ;;  %v7751_v28 = vld [vmem:[%s8382_s10 + $0x760] ss:$16 sps:$4 sm:$0xff]  }
 0x3cb   : > { %6241 = vmatpush1.bf16.msra.mxu1 %v7685_v27  ;;  %v4564_v38 = vmax.f32 %v4391_v29, 0.0  ;;  %v7658_v27 = vld [vmem:[%s8382_s10 + $0x560] ss:$16 sps:$4 sm:$0xff]   ;;  %v7663_v37 = vld [vmem:[%s8382_s10 + $0x544] ss:$16 sps:$4 sm:$0xff]   ;;  %v4348_v29 = vadd.f32 %v9123_v42, %v9048_v56 }
 0x3cc   : > { %v4393_v15 = vpop.f32.mrf.mxu1  ;;  %6242 = vmatprep.subr.bf16.mxu1 %v7693_v46  ;;  %v7759_v46 = vld [vmem:[%s8382_s10 + $0x744] ss:$16 sps:$4 sm:$0xff]   ;;  %v7661_v57 = vld [vmem:[%s8382_s10 + $0x540] ss:$16 sps:$4 sm:$0xff]  }
 0x3cd   : > { %v9138_v39 = vpack.c.bf16 %v4564_v38, %v4564_v38  ;;  %6202 = vmatpush1.bf16.msra.mxu0 %v7628_v32  ;;  %v7666_v30 = vld [vmem:[%s8382_s10 + $0x524] ss:$16 sps:$4 sm:$0xff]   ;;  %v7757_v32 = vld [vmem:[%s8382_s10 + $0x740] ss:$16 sps:$4 sm:$0xff]  }
 0x3ce   : > { %6203 = vmatprep.subr.bf16.mxu0 %v7633_v34  ;;  %v7765_v33 = vld [vmem:[%s8382_s10 + $0x724] ss:$16 sps:$4 sm:$0xff]   ;;  %v7664_v34 = vld [vmem:[%s8382_s10 + $0x520] ss:$16 sps:$4 sm:$0xff]  }
 0x3cf   : > { %6243 = vmatpush1.bf16.msra.mxu1 %v7691_v35  ;;  %6229 = vmatprep.mubr.bf16.mxu0 %v9138_v39  ;;  %v4389_v35 = vadd.f32 %v9127_v18, %v4348_v29  ;;  %v7669_v38 = vld [vmem:[%s8382_s10 + $0x504] ss:$16 sps:$4 sm:$0xff]   ;;  %v7763_v15 = vld [vmem:[%s8382_s10 + $0x720] ss:$16 sps:$4 sm:$0xff]   ;;  %v7670_v18 = vld [vmem:[%s8382_s10 + $0xe8] ss:$16 sps:$4 sm:$0xff]  }
 0x3d0   : > { %6244 = vmatprep.subr.bf16.mxu1 %v7699_v23  ;;  %v7771_v56 = vld [vmem:[%s8382_s10 + $0x704] ss:$16 sps:$4 sm:$0xff]   ;;  %v7667_v42 = vld [vmem:[%s8382_s10 + $0x500] ss:$16 sps:$4 sm:$0xff]   ;;  %v7756_v29 = vld [vmem:[%s8382_s10 + $0x10c] ss:$16 sps:$4 sm:$0xff]  }
 0x3d1   : > { %6204 = vmatpush1.bf16.msra.mxu0 %v7631_v16  ;;  %v4563_v23 = vmax.f32 %v4389_v35, 0.0  ;;  %v7672_v16 = vld [vmem:[%s8382_s10 + $0xec] ss:$16 sps:$4 sm:$0xff]  }
 0x3d2   : > { %6205 = vmatprep.subr.bf16.mxu0 %v7636_v40  ;;  %v7769_v40 = vld [vmem:[%s8382_s10 + $0x700] ss:$16 sps:$4 sm:$0xff]  }
 0x3d3   : > { %6245 = vmatpush1.bf16.msra.mxu1 %v7697_v26  ;;  %v7777_v26 = vld [vmem:[%s8382_s10 + $0x2ec] ss:$16 sps:$4 sm:$0xff]  }
 0x3d4   : > { %6246 = vmatprep.subr.bf16.mxu1 %v7705_v43  ;;  %v9197_v43 = vpack.c.bf16 %v4563_v23, %v4563_v23 }
 0x3d5   : > { %6206 = vmatpush1.bf16.msra.mxu0 %v7634_v44  ;;  %v7675_v44 = vld [vmem:[%s8382_s10 + $0xcc] ss:$16 sps:$4 sm:$0xff]  }
 0x3d6   : > { %6207 = vmatprep.subr.bf16.mxu0 %v7639_v55 }
 0x3d7   : > { %6247 = vmatpush1.bf16.msra.mxu1 %v7703_v49 }
 0x3d8   : > { %6248 = vmatprep.subr.bf16.mxu1 %v7711_v58  ;;  %v7673_v58 = vld [vmem:[%s8382_s10 + $0xc8] ss:$16 sps:$4 sm:$0xff]  }
 0x3d9   : > { %6208 = vmatpush1.bf16.msra.mxu0 %v7637_v62 }
 0x3da   : > { %6209 = vmatprep.subr.bf16.mxu0 %v7642_v52  ;;  %v7678_v52 = vld [vmem:[%s8382_s10 + $0xac] ss:$16 sps:$4 sm:$0xff]  }
 0x3db   : > { %6249 = vmatpush1.bf16.msra.mxu1 %v7709_v53 }
 0x3dc   : > { %6250 = vmatprep.subr.bf16.mxu1 %v7717_v20 }
 0x3dd   : > { %6210 = vmatpush1.bf16.msra.mxu0 %v7640_v0 }
 0x3de   : > { %6211 = vmatprep.subr.bf16.mxu0 %v7645_v1  ;;  %v7676_v1 = vld [vmem:[%s8382_s10 + $0xa8] ss:$16 sps:$4 sm:$0xff]  }
 0x3df   : > { %6251 = vmatpush1.bf16.msra.mxu1 %v7715_v21 }
 0x3e0   : > { %6252 = vmatprep.subr.bf16.mxu1 %v7723_v59 }
 0x3e1   : > { %6212 = vmatpush1.bf16.msra.mxu0 %v7643_v8  ;;  %v7682_v8 = vld [vmem:[%s8382_s10 + $0x88] ss:$16 sps:$4 sm:$0xff]  }
 0x3e2   : > { %6213 = vmatprep.subr.bf16.mxu0 %v7648_v60  ;;  %v7690_v60 = vld [vmem:[%s8382_s10 + $0x6c] ss:$16 sps:$4 sm:$0xff]  }
 0x3e3   : > { %6253 = vmatpush1.bf16.msra.mxu1 %v7721_v61  ;;  %v7688_v61 = vld [vmem:[%s8382_s10 + $0x68] ss:$16 sps:$4 sm:$0xff]  }
 0x3e4   : > { %6254 = vmatprep.subr.bf16.mxu1 %v7729_v63  ;;  %v7696_v63 = vld [vmem:[%s8382_s10 + $0x4c] ss:$16 sps:$4 sm:$0xff]  }
 0x3e5   : > { %6214 = vmatpush2.bf16.msra.mxu0 %v7646_v2  ;;  %v7694_v2 = vld [vmem:[%s8382_s10 + $0x48] ss:$16 sps:$4 sm:$0xff]  }
 0x3e6   : > { %6215 = vmatprep.subr.bf16.mxu0 %v7651_v3  ;;  %v7702_v3 = vld [vmem:[%s8382_s10 + $0x2c] ss:$16 sps:$4 sm:$0xff]  }
 0x3e7   : > { %6255 = vmatpush2.bf16.msra.mxu1 %v7727_v4  ;;  %v7700_v4 = vld [vmem:[%s8382_s10 + $0x28] ss:$16 sps:$4 sm:$0xff]  }
 0x3e8   : > { %6256 = vmatprep.subr.bf16.mxu1 %v7735_v6  ;;  %v7708_v6 = vld [vmem:[%s8382_s10 + $0xc] ss:$16 sps:$4 sm:$0xff]  }
 0x3e9   : > { %6216 = vmatpush2.bf16.msra.mxu0 %v7649_v7  ;;  %v7706_v7 = vld [vmem:[%s8382_s10 + $0x8] ss:$16 sps:$4 sm:$0xff]  }
 0x3ea   : > { %6217 = vmatprep.subr.bf16.mxu0 %v7654_v45  ;;  %v7714_v45 = vld [vmem:[%s8382_s10 + $0x1ec] ss:$16 sps:$4 sm:$0xff]  }
 0x3eb   : > { %6257 = vmatpush2.bf16.msra.mxu1 %v7733_v9  ;;  %v7712_v9 = vld [vmem:[%s8382_s10 + $0x1e8] ss:$16 sps:$4 sm:$0xff]  }
 0x3ec   : > { %6258 = vmatprep.subr.bf16.mxu1 %v7741_v10  ;;  %v7720_v10 = vld [vmem:[%s8382_s10 + $0x1cc] ss:$16 sps:$4 sm:$0xff]  }
 0x3ed   : > { %6218 = vmatpush2.bf16.msra.mxu0 %v7652_v11  ;;  %v7718_v11 = vld [vmem:[%s8382_s10 + $0x1c8] ss:$16 sps:$4 sm:$0xff]  }
 0x3ee   : > { %6219 = vmatprep.subr.bf16.mxu0 %v7657_v50  ;;  %v7726_v50 = vld [vmem:[%s8382_s10 + $0x1ac] ss:$16 sps:$4 sm:$0xff]  }
 0x3ef   : > { %6259 = vmatpush2.bf16.msra.mxu1 %v7739_v13  ;;  %v7724_v13 = vld [vmem:[%s8382_s10 + $0x1a8] ss:$16 sps:$4 sm:$0xff]  }
 0x3f0   : > { %6260 = vmatprep.subr.bf16.mxu1 %v7747_v17  ;;  %v7732_v17 = vld [vmem:[%s8382_s10 + $0x18c] ss:$16 sps:$4 sm:$0xff]  }
 0x3f1   : > { %6220 = vmatpush2.bf16.msra.mxu0 %v7655_v54  ;;  %v7730_v54 = vld [vmem:[%s8382_s10 + $0x188] ss:$16 sps:$4 sm:$0xff]  }
 0x3f2   : > { %6221 = vmatprep.subr.bf16.mxu0 %v7660_v19  ;;  %v7738_v19 = vld [vmem:[%s8382_s10 + $0x16c] ss:$16 sps:$4 sm:$0xff]  }
 0x3f3   : > { %6261 = vmatpush2.bf16.msra.mxu1 %v7745_v24  ;;  %v7736_v24 = vld [vmem:[%s8382_s10 + $0x168] ss:$16 sps:$4 sm:$0xff]  }
 0x3f4   : > { %6262 = vmatprep.subr.bf16.mxu1 %v7753_v25  ;;  %v7744_v25 = vld [vmem:[%s8382_s10 + $0x14c] ss:$16 sps:$4 sm:$0xff]  }
 0x3f5   : > { %6222 = vmatpush2.bf16.msra.mxu0 %v7658_v27  ;;  %v7742_v27 = vld [vmem:[%s8382_s10 + $0x148] ss:$16 sps:$4 sm:$0xff]  }
 0x3f6   : > { %6223 = vmatprep.subr.bf16.mxu0 %v7663_v37  ;;  %v7750_v37 = vld [vmem:[%s8382_s10 + $0x12c] ss:$16 sps:$4 sm:$0xff]  }
 0x3f7   : > { %6263 = vmatpush2.bf16.msra.mxu1 %v7751_v28  ;;  %v1301_v28 = vsub.s32 6, %v8707_v22 }
 0x3f8   : > { %6264 = vmatprep.subr.bf16.mxu1 %v7759_v46  ;;  %v1305_v46 = vsub.s32 7, %v8707_v22 }
 0x3f9   : > { %6224 = vmatpush2.bf16.msra.mxu0 %v7661_v57  ;;  %v7748_v57 = vld [vmem:[%s8382_s10 + $0x128] ss:$16 sps:$4 sm:$0xff]  }
 0x3fa   : > { %6225 = vmatprep.subr.bf16.mxu0 %v7666_v30  ;;  %v1302_v30 = vrot.slane %v9029_v41, %v1301_v28  ;;  %v7816_v28 = vld [vmem:[%s8382_s10 + $0x5cc] ss:$16 sps:$4 sm:$0xff]  }
 0x3fb   : > { %6265 = vmatpush2.bf16.msra.mxu1 %v7757_v32  ;;  %v1306_v32 = vrot.slane %v9029_v41, %v1305_v46  ;;  %v7811_v46 = vld [vmem:[%s8382_s10 + $0x228] ss:$16 sps:$4 sm:$0xff]  }
 0x3fc   : > { %6266 = vmatprep.subr.bf16.mxu1 %v7765_v33  ;;  %v7754_v33 = vld [vmem:[%s8382_s10 + $0x108] ss:$16 sps:$4 sm:$0xff]  }
 0x3fd   : > { %6226 = vmatpush2.bf16.msra.mxu0 %v7664_v34  ;;  %v7762_v34 = vld [vmem:[%s8382_s10 + $0x4ec] ss:$16 sps:$4 sm:$0xff]  }
 0x3fe   : > { %6227 = vmatprep.subr.bf16.mxu0 %v7669_v38 }
 0x3ff   : > { %6267 = vmatpush2.bf16.msra.mxu1 %v7763_v15  ;;  %v7760_v15 = vld [vmem:[%s8382_s10 + $0x4e8] ss:$16 sps:$4 sm:$0xff]  }
 0x400   : > { %6268 = vmatprep.subr.bf16.mxu1 %v7771_v56  ;;  %v7768_v56 = vld [vmem:[%s8382_s10 + $0x4cc] ss:$16 sps:$4 sm:$0xff]  }
 0x401   : > { %6228 = vmatpush2.bf16.msra.mxu0 %v7667_v42 }
 0x402   : > { %6279 = vmatprep.subr.bf16.mxu0 %v7672_v16 }
 0x403   : > { %6269 = vmatpush2.bf16.msra.mxu1 %v7769_v40 }
 0x404   : > { %6320 = vmatprep.subr.bf16.mxu1 %v7777_v26  ;;  %v9200_v55 = vpop.f32.mrf.mxu0  ;;  %6230 = vmatmul.mubr.bf16.vlgmr.msra.gmra.mxu0 %v9197_v43  ;;  %v7766_v26 = vld [vmem:[%s8382_s10 + $0x4c8] ss:$16 sps:$4 sm:$0xff]  }
 0x405   : > { %6280 = vmatpush1.bf16.msra.mxu0 %v7670_v18  ;;  %6311 = vmatprep.mubr.bf16.mxu0 %v9035_v47  ;;  %v7684_v47 = vld [vmem:[%s8382_s10 + $0x8c] ss:$16 sps:$4 sm:$0xff]   ;;  %v4430_v35 = vadd.f32 %v9200_v55, %v1302_v30 }
 0x406   : > { %v9203_v49 = vpop.f32.mrf.mxu1  ;;  %v9207_v62 = vpop.f32.mrf.mxu0  ;;  %6281 = vmatprep.subr.bf16.mxu0 %v7675_v44  ;;  %v7774_v44 = vld [vmem:[%s8382_s10 + $0x4ac] ss:$16 sps:$4 sm:$0xff]  }
 0x407   : > { %v4432_v38 = vadd.f32 %v9207_v62, %v1306_v32  ;;  %v4471_v42 = vadd.f32 %v9203_v49, %v4430_v35  ;;  %v7822_v30 = vld [vmem:[%s8382_s10 + $0x5ac] ss:$16 sps:$4 sm:$0xff]   ;;  %v7817_v32 = vld [vmem:[%s8382_s10 + $0x208] ss:$16 sps:$4 sm:$0xff]  }
 0x408   : > { %v9210_v53 = vpop.f32.mrf.mxu1  ;;  %v4433_v20 = vpop.f32.mrf.mxu0  ;;  %v7828_v35 = vld [vmem:[%s8382_s10 + $0x58c] ss:$16 sps:$4 sm:$0xff]  }
 0x409   : > { %6282 = vmatpush1.bf16.msra.mxu0 %v7673_v58  ;;  %v4473_v41 = vadd.f32 %v9210_v53, %v4432_v38  ;;  %v7772_v53 = vld [vmem:[%s8382_s10 + $0x4a8] ss:$16 sps:$4 sm:$0xff]  }
 0x40a   : > { %v4474_v0 = vpop.f32.mrf.mxu1  ;;  %v4434_v21 = vpop.f32.mrf.mxu0  ;;  %6283 = vmatprep.subr.bf16.mxu0 %v7678_v52  ;;  %v7823_v38 = vld [vmem:[%s8382_s10 + $0x3e8] ss:$16 sps:$4 sm:$0xff]  }
 0x40c   : > { %v4475_v59 = vpop.f32.mrf.mxu1 }
 0x40d   : > { %6284 = vmatpush1.bf16.msra.mxu0 %v7676_v1  ;;  %v7775_v59 = vld [vmem:[%s8382_s10 + $0x2e8] ss:$16 sps:$4 sm:$0xff]  }
 0x40e   : > { %6285 = vmatprep.subr.bf16.mxu0 %v7684_v47 }
 0x411   : > { %6286 = vmatpush1.bf16.msra.mxu0 %v7682_v8 }
 0x412   : > { %6287 = vmatprep.subr.bf16.mxu0 %v7690_v60  ;;  %v7778_v60 = vld [vmem:[%s8382_s10 + $0x488] ss:$16 sps:$4 sm:$0xff]  }
 0x415   : > { %6288 = vmatpush1.bf16.msra.mxu0 %v7688_v61  ;;  %v7783_v61 = vld [vmem:[%s8382_s10 + $0x2cc] ss:$16 sps:$4 sm:$0xff]  }
 0x416   : > { %6289 = vmatprep.subr.bf16.mxu0 %v7696_v63  ;;  %v7786_v63 = vld [vmem:[%s8382_s10 + $0x46c] ss:$16 sps:$4 sm:$0xff]  }
 0x419   : > { %6290 = vmatpush1.bf16.msra.mxu0 %v7694_v2  ;;  %v7781_v2 = vld [vmem:[%s8382_s10 + $0x2c8] ss:$16 sps:$4 sm:$0xff]  }
 0x41a   : > { %6291 = vmatprep.subr.bf16.mxu0 %v7702_v3  ;;  %v7784_v3 = vld [vmem:[%s8382_s10 + $0x468] ss:$16 sps:$4 sm:$0xff]  }
 0x41d   : > { %6292 = vmatpush1.bf16.msra.mxu0 %v7700_v4  ;;  %v7789_v4 = vld [vmem:[%s8382_s10 + $0x2ac] ss:$16 sps:$4 sm:$0xff]  }
 0x41e   : > { %6293 = vmatprep.subr.bf16.mxu0 %v7708_v6  ;;  %v7792_v6 = vld [vmem:[%s8382_s10 + $0x44c] ss:$16 sps:$4 sm:$0xff]  }
 0x421   : > { %6294 = vmatpush1.bf16.msra.mxu0 %v7706_v7  ;;  %v7787_v7 = vld [vmem:[%s8382_s10 + $0x2a8] ss:$16 sps:$4 sm:$0xff]  }
 0x422   : > { %6295 = vmatprep.subr.bf16.mxu0 %v7714_v45  ;;  %v7790_v45 = vld [vmem:[%s8382_s10 + $0x448] ss:$16 sps:$4 sm:$0xff]  }
 0x425   : > { %6296 = vmatpush2.bf16.msra.mxu0 %v7712_v9  ;;  %v7795_v9 = vld [vmem:[%s8382_s10 + $0x28c] ss:$16 sps:$4 sm:$0xff]  }
 0x426   : > { %6297 = vmatprep.subr.bf16.mxu0 %v7720_v10  ;;  %v7793_v10 = vld [vmem:[%s8382_s10 + $0x288] ss:$16 sps:$4 sm:$0xff]  }
 0x429   : > { %6298 = vmatpush2.bf16.msra.mxu0 %v7718_v11  ;;  %v7796_v11 = vld [vmem:[%s8382_s10 + $0x428] ss:$16 sps:$4 sm:$0xff]  }
 0x42a   : > { %6299 = vmatprep.subr.bf16.mxu0 %v7726_v50  ;;  %v7801_v50 = vld [vmem:[%s8382_s10 + $0x26c] ss:$16 sps:$4 sm:$0xff]  }
 0x42d   : > { %6300 = vmatpush2.bf16.msra.mxu0 %v7724_v13  ;;  %v7804_v13 = vld [vmem:[%s8382_s10 + $0x40c] ss:$16 sps:$4 sm:$0xff]  }
 0x42e   : > { %6301 = vmatprep.subr.bf16.mxu0 %v7732_v17  ;;  %v7799_v17 = vld [vmem:[%s8382_s10 + $0x268] ss:$16 sps:$4 sm:$0xff]  }
 0x431   : > { %6302 = vmatpush2.bf16.msra.mxu0 %v7730_v54  ;;  %v7802_v54 = vld [vmem:[%s8382_s10 + $0x408] ss:$16 sps:$4 sm:$0xff]  }
 0x432   : > { %6303 = vmatprep.subr.bf16.mxu0 %v7738_v19  ;;  %v7807_v19 = vld [vmem:[%s8382_s10 + $0x24c] ss:$16 sps:$4 sm:$0xff]  }
 0x435   : > { %6304 = vmatpush2.bf16.msra.mxu0 %v7736_v24  ;;  %v7810_v24 = vld [vmem:[%s8382_s10 + $0x5ec] ss:$16 sps:$4 sm:$0xff]  }
 0x436   : > { %6305 = vmatprep.subr.bf16.mxu0 %v7744_v25  ;;  %v7805_v25 = vld [vmem:[%s8382_s10 + $0x248] ss:$16 sps:$4 sm:$0xff]  }
 0x439   : > { %6306 = vmatpush2.bf16.msra.mxu0 %v7742_v27  ;;  %v7808_v27 = vld [vmem:[%s8382_s10 + $0x5e8] ss:$16 sps:$4 sm:$0xff]  }
 0x43a   : > { %6307 = vmatprep.subr.bf16.mxu0 %v7750_v37  ;;  %v7813_v37 = vld [vmem:[%s8382_s10 + $0x22c] ss:$16 sps:$4 sm:$0xff]  }
 0x43d   : > { %6308 = vmatpush2.bf16.msra.mxu0 %v7748_v57  ;;  %v7814_v57 = vld [vmem:[%s8382_s10 + $0x5c8] ss:$16 sps:$4 sm:$0xff]  }
 0x43e   : > { %6309 = vmatprep.subr.bf16.mxu0 %v7756_v29  ;;  %v7819_v29 = vld [vmem:[%s8382_s10 + $0x20c] ss:$16 sps:$4 sm:$0xff]  }
 0x441   : > { %6310 = vmatpush2.bf16.msra.mxu0 %v7754_v33  ;;  %v7820_v33 = vld [vmem:[%s8382_s10 + $0x5a8] ss:$16 sps:$4 sm:$0xff]  }
 0x442   : > { %6361 = vmatprep.subr.bf16.mxu0 %v7762_v34  ;;  %v7825_v34 = vld [vmem:[%s8382_s10 + $0x3ec] ss:$16 sps:$4 sm:$0xff]  }
 0x444   : > { %v4511_v23 = vpop.f32.mrf.mxu0  ;;  %6312 = vmatmul.mubr.bf16.vlgmr.msra.gmra.mxu0 %v9116_v12 }
 0x445   : > { %v4512_v16 = vadd.f32 %v4511_v23, %v4471_v42  ;;  %6362 = vmatpush1.bf16.msra.mxu0 %v7760_v15  ;;  %6393 = vmatprep.mubr.bf16.mxu0 %v9138_v39  ;;  %v7780_v39 = vld [vmem:[%s8382_s10 + $0x48c] ss:$16 sps:$4 sm:$0xff]   ;;  %v7826_v15 = vld [vmem:[%s8382_s10 + $0x588] ss:$16 sps:$4 sm:$0xff]  }
 0x446   : > { %v4552_v40 = vpop.f32.mrf.mxu1  ;;  %v4513_v18 = vpop.f32.mrf.mxu0  ;;  %6363 = vmatprep.subr.bf16.mxu0 %v7768_v56  ;;  %v7831_v56 = vld [vmem:[%s8382_s10 + $0x3cc] ss:$16 sps:$4 sm:$0xff]   ;;  %v7829_v23 = vld [vmem:[%s8382_s10 + $0x3c8] ss:$16 sps:$4 sm:$0xff]  }
 0x447   : > { %v4553_v55 = vadd.f32 %v4552_v40, %v4512_v16  ;;  %v4514_v58 = vadd.f32 %v4513_v18, %v4473_v41  ;;  %v7834_v42 = vld [vmem:[%s8382_s10 + $0x56c] ss:$16 sps:$4 sm:$0xff]   ;;  %v7832_v41 = vld [vmem:[%s8382_s10 + $0x568] ss:$16 sps:$4 sm:$0xff]  }
 0x448   : > { %v4554_v49 = vpop.f32.mrf.mxu1  ;;  %v4515_v62 = vpop.f32.mrf.mxu0  ;;  %v7837_v16 = vld [vmem:[%s8382_s10 + $0x3ac] ss:$16 sps:$4 sm:$0xff]   ;;  %v7838_v18 = vld [vmem:[%s8382_s10 + $0x548] ss:$16 sps:$4 sm:$0xff]  }
 0x449   : > { %v4555_v12 = vadd.f32 %v4554_v49, %v4514_v58  ;;  %6364 = vmatpush1.bf16.msra.mxu0 %v7766_v26  ;;  %v4565_v20 = vmax.f32 %v4553_v55, 0.0  ;;  %v7840_v40 = vld [vmem:[%s8382_s10 + $0x54c] ss:$16 sps:$4 sm:$0xff]   ;;  %v7835_v26 = vld [vmem:[%s8382_s10 + $0x3a8] ss:$16 sps:$4 sm:$0xff]  }
 0x44a   : > { %v4556_v52 = vpop.f32.mrf.mxu1  ;;  %v4516_v0 = vpop.f32.mrf.mxu0  ;;  %6365 = vmatprep.subr.bf16.mxu0 %v7774_v44  ;;  %v7843_v44 = vld [vmem:[%s8382_s10 + $0x38c] ss:$16 sps:$4 sm:$0xff]   ;;  %v7841_v58 = vld [vmem:[%s8382_s10 + $0x388] ss:$16 sps:$4 sm:$0xff]  }
 0x44b   : > { %v4566_v1 = vmax.f32 %v4555_v12, 0.0  ;;  %v9259_v8 = vpack.c.bf16 %v4565_v20, %v4565_v20  ;;  %v7846_v55 = vld [vmem:[%s8382_s10 + $0x52c] ss:$16 sps:$4 sm:$0xff]   ;;  %v7844_v49 = vld [vmem:[%s8382_s10 + $0x528] ss:$16 sps:$4 sm:$0xff]  }
 0x44c   : > { %v4557_v21 = vpop.f32.mrf.mxu1  ;;  %v7849_v62 = vld [vmem:[%s8382_s10 + $0x36c] ss:$16 sps:$4 sm:$0xff]   ;;  %v7847_v52 = vld [vmem:[%s8382_s10 + $0x368] ss:$16 sps:$4 sm:$0xff]  }
 0x44d   : > { %v9256_v47 = vpack.c.bf16 %v4566_v1, %v4566_v1  ;;  %6366 = vmatpush1.bf16.msra.mxu0 %v7772_v53  ;;  %v7852_v12 = vld [vmem:[%s8382_s10 + $0x50c] ss:$16 sps:$4 sm:$0xff]   ;;  %v7850_v53 = vld [vmem:[%s8382_s10 + $0x508] ss:$16 sps:$4 sm:$0xff]  }
 0x44e   : > { %6367 = vmatprep.subr.bf16.mxu0 %v7780_v39  ;;  %v7855_v20 = vld [vmem:[%s8382_s10 + $0x34c] ss:$16 sps:$4 sm:$0xff]   ;;  %v7853_v0 = vld [vmem:[%s8382_s10 + $0x348] ss:$16 sps:$4 sm:$0xff]  }
 0x44f   : > { %6270 = vmatprep.mubr.bf16.mxu1 %v9256_v47  ;;  %v7858_v39 = vld [vmem:[%s8382_s10 + $0x32c] ss:$16 sps:$4 sm:$0xff]  }
 0x450   : > { %6271 = vmatmul.mubr.bf16.vlgmr.msra.gmra.mxu1 %v9259_v8 }
 0x451   : > { %6321 = vmatpush1.bf16.msra.mxu1 %v7775_v59  ;;  %6352 = vmatprep.mubr.bf16.mxu1 %v9039_v51  ;;  %v7798_v51 = vld [vmem:[%s8382_s10 + $0x42c] ss:$16 sps:$4 sm:$0xff]   ;;  %v7856_v59 = vld [vmem:[%s8382_s10 + $0x328] ss:$16 sps:$4 sm:$0xff]  }
 0x452   : > { %6368 = vmatpush1.bf16.msra.mxu0 %v7778_v60  ;;  %6322 = vmatprep.subr.bf16.mxu1 %v7783_v61 }
 0x453   : > { %6369 = vmatprep.subr.bf16.mxu0 %v7786_v63  ;;  %v7861_v63 = vld [vmem:[%s8382_s10 + $0x30c] ss:$16 sps:$4 sm:$0xff]  }
 0x455   : > { %6323 = vmatpush1.bf16.msra.mxu1 %v7781_v2 }
 0x456   : > { %6370 = vmatpush1.bf16.msra.mxu0 %v7784_v3  ;;  %6324 = vmatprep.subr.bf16.mxu1 %v7789_v4 }
 0x457   : > { %6371 = vmatprep.subr.bf16.mxu0 %v7792_v6 }
 0x459   : > { %6325 = vmatpush1.bf16.msra.mxu1 %v7787_v7  ;;  %v7859_v7 = vld [vmem:[%s8382_s10 + $0x308] ss:$16 sps:$4 sm:$0xff]  }
 0x45a   : > { %6372 = vmatpush1.bf16.msra.mxu0 %v7790_v45  ;;  %6326 = vmatprep.subr.bf16.mxu1 %v7795_v9 }
 0x45b   : > { %6373 = vmatprep.subr.bf16.mxu0 %v7798_v51  ;;  %v7862_v51 = vld [vmem:[%s8382_s10 + $0x6e8] ss:$16 sps:$4 sm:$0xff]  }
 0x45d   : > { %6327 = vmatpush1.bf16.msra.mxu1 %v7793_v10  ;;  %v7867_v10 = vld [vmem:[%s8382_s10 + $0x6cc] ss:$16 sps:$4 sm:$0xff]  }
 0x45e   : > { %6374 = vmatpush1.bf16.msra.mxu0 %v7796_v11  ;;  %6328 = vmatprep.subr.bf16.mxu1 %v7801_v50  ;;  %v7865_v11 = vld [vmem:[%s8382_s10 + $0x6c8] ss:$16 sps:$4 sm:$0xff]   ;;  %v7870_v50 = vld [vmem:[%s8382_s10 + $0x6ac] ss:$16 sps:$4 sm:$0xff]  }
 0x45f   : > { %6375 = vmatprep.subr.bf16.mxu0 %v7804_v13  ;;  %v7868_v13 = vld [vmem:[%s8382_s10 + $0x6a8] ss:$16 sps:$4 sm:$0xff]  }
 0x461   : > { %6329 = vmatpush1.bf16.msra.mxu1 %v7799_v17  ;;  %v7873_v17 = vld [vmem:[%s8382_s10 + $0x68c] ss:$16 sps:$4 sm:$0xff]  }
 0x462   : > { %6376 = vmatpush1.bf16.msra.mxu0 %v7802_v54  ;;  %6330 = vmatprep.subr.bf16.mxu1 %v7807_v19  ;;  %v7871_v54 = vld [vmem:[%s8382_s10 + $0x688] ss:$16 sps:$4 sm:$0xff]  }
 0x463   : > { %6377 = vmatprep.subr.bf16.mxu0 %v7810_v24  ;;  %v7874_v19 = vld [vmem:[%s8382_s10 + $0x668] ss:$16 sps:$4 sm:$0xff]  }
 0x464   : > { %v7877_v24 = vld [vmem:[%s8382_s10 + $0x648] ss:$16 sps:$4 sm:$0xff]  }
 0x465   : > { %6331 = vmatpush1.bf16.msra.mxu1 %v7805_v25  ;;  %v7882_v25 = vld [vmem:[%s8382_s10 + $0x62c] ss:$16 sps:$4 sm:$0xff]  }
 0x466   : > { %6378 = vmatpush2.bf16.msra.mxu0 %v7808_v27  ;;  %6332 = vmatprep.subr.bf16.mxu1 %v7813_v37  ;;  %v7880_v27 = vld [vmem:[%s8382_s10 + $0x628] ss:$16 sps:$4 sm:$0xff]   ;;  %v7885_v37 = vld [vmem:[%s8382_s10 + $0x60c] ss:$16 sps:$4 sm:$0xff]  }
 0x467   : > { %6379 = vmatprep.subr.bf16.mxu0 %v7816_v28  ;;  %v7883_v28 = vld [vmem:[%s8382_s10 + $0x608] ss:$16 sps:$4 sm:$0xff]  }
 0x469   : > { %6333 = vmatpush1.bf16.msra.mxu1 %v7811_v46  ;;  %v7888_v46 = vld [vmem:[%s8382_s10 + $0x7ec] ss:$16 sps:$4 sm:$0xff]  }
 0x46a   : > { %6380 = vmatpush2.bf16.msra.mxu0 %v7814_v57  ;;  %6334 = vmatprep.subr.bf16.mxu1 %v7819_v29  ;;  %v7886_v57 = vld [vmem:[%s8382_s10 + $0x7e8] ss:$16 sps:$4 sm:$0xff]   ;;  %v7891_v29 = vld [vmem:[%s8382_s10 + $0x7cc] ss:$16 sps:$4 sm:$0xff]  }
 0x46b   : > { %6381 = vmatprep.subr.bf16.mxu0 %v7822_v30  ;;  %v7889_v30 = vld [vmem:[%s8382_s10 + $0x7c8] ss:$16 sps:$4 sm:$0xff]  }
 0x46d   : > { %6335 = vmatpush1.bf16.msra.mxu1 %v7817_v32  ;;  %v7894_v32 = vld [vmem:[%s8382_s10 + $0x7ac] ss:$16 sps:$4 sm:$0xff]  }
 0x46e   : > { %6382 = vmatpush2.bf16.msra.mxu0 %v7820_v33  ;;  %6336 = vmatprep.subr.bf16.mxu1 %v7825_v34  ;;  %v7892_v33 = vld [vmem:[%s8382_s10 + $0x7a8] ss:$16 sps:$4 sm:$0xff]   ;;  %v7897_v34 = vld [vmem:[%s8382_s10 + $0x78c] ss:$16 sps:$4 sm:$0xff]  }
 0x46f   : > { %6383 = vmatprep.subr.bf16.mxu0 %v7828_v35  ;;  %v7895_v35 = vld [vmem:[%s8382_s10 + $0x788] ss:$16 sps:$4 sm:$0xff]  }
 0x471   : > { %6337 = vmatpush2.bf16.msra.mxu1 %v7823_v38  ;;  %v7900_v38 = vld [vmem:[%s8382_s10 + $0x76c] ss:$16 sps:$4 sm:$0xff]  }
 0x472   : > { %6384 = vmatpush2.bf16.msra.mxu0 %v7826_v15  ;;  %6338 = vmatprep.subr.bf16.mxu1 %v7831_v56  ;;  %v7898_v15 = vld [vmem:[%s8382_s10 + $0x768] ss:$16 sps:$4 sm:$0xff]   ;;  %v7903_v56 = vld [vmem:[%s8382_s10 + $0x74c] ss:$16 sps:$4 sm:$0xff]  }
 0x473   : > { %6385 = vmatprep.subr.bf16.mxu0 %v7834_v42  ;;  %v7901_v42 = vld [vmem:[%s8382_s10 + $0x748] ss:$16 sps:$4 sm:$0xff]  }
 0x475   : > { %6339 = vmatpush2.bf16.msra.mxu1 %v7829_v23  ;;  %v7906_v23 = vld [vmem:[%s8382_s10 + $0x72c] ss:$16 sps:$4 sm:$0xff]  }
 0x476   : > { %6386 = vmatpush2.bf16.msra.mxu0 %v7832_v41  ;;  %6340 = vmatprep.subr.bf16.mxu1 %v7837_v16 }
 0x477   : > { %6387 = vmatprep.subr.bf16.mxu0 %v7840_v40  ;;  %v7904_v40 = vld [vmem:[%s8382_s10 + $0x728] ss:$16 sps:$4 sm:$0xff]  }
 0x479   : > { %6341 = vmatpush2.bf16.msra.mxu1 %v7835_v26 }
 0x47a   : > { %6388 = vmatpush2.bf16.msra.mxu0 %v7838_v18  ;;  %6342 = vmatprep.subr.bf16.mxu1 %v7843_v44  ;;  %v7909_v18 = vld [vmem:[%s8382_s10 + $0x70c] ss:$16 sps:$4 sm:$0xff]  }
 0x47b   : > { %6389 = vmatprep.subr.bf16.mxu0 %v7846_v55 }
 0x47d   : > { %6343 = vmatpush2.bf16.msra.mxu1 %v7841_v58  ;;  %v7907_v58 = vld [vmem:[%s8382_s10 + $0x708] ss:$16 sps:$4 sm:$0xff]  }
 0x47e   : > { %6390 = vmatpush2.bf16.msra.mxu0 %v7844_v49  ;;  %6344 = vmatprep.subr.bf16.mxu1 %v7849_v62 }
 0x47f   : > { %6391 = vmatprep.subr.bf16.mxu0 %v7852_v12 }
 0x481   : > { %6345 = vmatpush2.bf16.msra.mxu1 %v7847_v52 }
 0x482   : > { %6392 = vmatpush2.bf16.msra.mxu0 %v7850_v53  ;;  %6346 = vmatprep.subr.bf16.mxu1 %v7855_v20  ;;  %v4567_v20 = vld [vmem:[#allocation3] sm:$0xff] }
 0x484   : > { %v6149_v1 = vpop.f32.mrf.mxu0 }
 0x485   : > { %6347 = vmatpush2.bf16.msra.mxu1 %v7853_v0  ;;  %6394 = vmatmul.mubr.bf16.vlgmr.msra.gmra.mxu0 %v9197_v43  ;;  %v7864_v43 = vld [vmem:[%s8382_s10 + $0x6ec] ss:$16 sps:$4 sm:$0xff]  }
 0x486   : > { %v6190_v21 = vpop.f32.mrf.mxu1  ;;  %v6151_v61 = vpop.f32.mrf.mxu0  ;;  %6348 = vmatprep.subr.bf16.mxu1 %v7858_v39 }
 0x487   : > { %v9318_v60 = vadd.f32 %v6190_v21, %v6149_v1  ;;  %v4568_v1 = vld [vmem:[#allocation3 + $0x18] sm:$0xff] }
 0x488   : > { %v6192_v2 = vpop.f32.mrf.mxu1  ;;  %v6153_v4 = vpop.f32.mrf.mxu0 }
 0x489   : > { %v9321_v3 = vadd.f32 %v6192_v2, %v6151_v61  ;;  %6349 = vmatpush2.bf16.msra.mxu1 %v7856_v59 }
 0x48a   : > { %v6194_v6 = vpop.f32.mrf.mxu1  ;;  %v6154_v45 = vpop.f32.mrf.mxu0  ;;  %6350 = vmatprep.subr.bf16.mxu1 %v7861_v63 }
 0x48c   : > { %v6195_v9 = vpop.f32.mrf.mxu1 }
 0x48d   : > { %6351 = vmatpush2.bf16.msra.mxu1 %v7859_v7 }
 0x48e   : > { %6402 = vmatprep.subr.bf16.mxu1 %v7864_v43 }
 0x490   : > { %6353 = vmatmul.mubr.bf16.vlgmr.msra.gmra.mxu1 %v9120_v14  ;;  %v7876_v14 = vld [vmem:[%s8382_s10 + $0x66c] ss:$16 sps:$4 sm:$0xff]  }
 0x491   : > { %6403 = vmatpush1.bf16.msra.mxu1 %v7862_v51  ;;  %6434 = vmatprep.mubr.bf16.mxu1 %v9256_v47  ;;  %v7879_v47 = vld [vmem:[%s8382_s10 + $0x64c] ss:$16 sps:$4 sm:$0xff]  }
 0x492   : > { %6404 = vmatprep.subr.bf16.mxu1 %v7867_v10 }
 0x495   : > { %6405 = vmatpush1.bf16.msra.mxu1 %v7865_v11 }
 0x496   : > { %6406 = vmatprep.subr.bf16.mxu1 %v7870_v50  ;;  %v4569_v50 = vld [vmem:[#allocation3 + $0x8] sm:$0xff] }
 0x499   : > { %6407 = vmatpush1.bf16.msra.mxu1 %v7868_v13 }
 0x49a   : > { %6408 = vmatprep.subr.bf16.mxu1 %v7873_v17 }
 0x49d   : > { %6409 = vmatpush1.bf16.msra.mxu1 %v7871_v54 }
 0x49e   : > { %6410 = vmatprep.subr.bf16.mxu1 %v7876_v14  ;;  %v4570_v14 = vld [vmem:[#allocation3 + $0x10] sm:$0xff] }
 0x4a1   : > { %6411 = vmatpush1.bf16.msra.mxu1 %v7874_v19 }
 0x4a2   : > { %6412 = vmatprep.subr.bf16.mxu1 %v7879_v47 }
 0x4a5   : > { %6413 = vmatpush1.bf16.msra.mxu1 %v7877_v24 }
 0x4a6   : > { %6414 = vmatprep.subr.bf16.mxu1 %v7882_v25 }
 0x4a9   : > { %6415 = vmatpush1.bf16.msra.mxu1 %v7880_v27 }
 0x4aa   : > { %6416 = vmatprep.subr.bf16.mxu1 %v7885_v37 }
 0x4ad   : > { %6417 = vmatpush1.bf16.msra.mxu1 %v7883_v28 }
 0x4ae   : > { %6418 = vmatprep.subr.bf16.mxu1 %v7888_v46 }
 0x4b1   : > { %6419 = vmatpush2.bf16.msra.mxu1 %v7886_v57 }
 0x4b2   : > { %6420 = vmatprep.subr.bf16.mxu1 %v7891_v29 }
 0x4b5   : > { %6421 = vmatpush2.bf16.msra.mxu1 %v7889_v30 }
 0x4b6   : > { %6422 = vmatprep.subr.bf16.mxu1 %v7894_v32 }
 0x4b9   : > { %6423 = vmatpush2.bf16.msra.mxu1 %v7892_v33 }
 0x4ba   : > { %6424 = vmatprep.subr.bf16.mxu1 %v7897_v34 }
 0x4bd   : > { %6425 = vmatpush2.bf16.msra.mxu1 %v7895_v35 }
 0x4be   : > { %6426 = vmatprep.subr.bf16.mxu1 %v7900_v38 }
 0x4c1   : > { %6427 = vmatpush2.bf16.msra.mxu1 %v7898_v15 }
 0x4c2   : > { %6428 = vmatprep.subr.bf16.mxu1 %v7903_v56 }
 0x4c4   : > { %v6231_v41 = vpop.f32.mrf.mxu0 }
 0x4c5   : > { %v6232_v16 = vadd.f32 %v6231_v41, %v9318_v60  ;;  %6429 = vmatpush2.bf16.msra.mxu1 %v7901_v42 }
 0x4c6   : > { %v6233_v26 = vpop.f32.mrf.mxu0  ;;  %6430 = vmatprep.subr.bf16.mxu1 %v7906_v23 }
 0x4c7   : > { %v6234_v44 = vadd.f32 %v6233_v26, %v9321_v3 }
 0x4c8   : > { %v6235_v55 = vpop.f32.mrf.mxu0 }
 0x4c9   : > { %6431 = vmatpush2.bf16.msra.mxu1 %v7904_v40 }
 0x4ca   : > { %v6236_v49 = vpop.f32.mrf.mxu0  ;;  %6432 = vmatprep.subr.bf16.mxu1 %v7909_v18 }
 0x4cd   : > { %6433 = vmatpush2.bf16.msra.mxu1 %v7907_v58 }
 0x4d0   : > { %6435 = vmatmul.mubr.bf16.vlgmr.msra.gmra.mxu1 %v9259_v8 }
 0x504   : > { %v6313_v62 = vpop.f32.mrf.mxu0 }
 0x506   : > { %v6315_v12 = vpop.f32.mrf.mxu0 }
 0x508   : > { %v6317_v52 = vpop.f32.mrf.mxu0 }
 0x50a   : > { %v6318_v53 = vpop.f32.mrf.mxu0 }
 0x510   : > { %v6272_v0 = vpop.f32.mrf.mxu1 }
 0x511   : > { %v6273_v39 = vadd.f32 %v6272_v0, %v6232_v16 }
 0x512   : > { %v6274_v21 = vpop.f32.mrf.mxu1 }
 0x513   : > { %v6443_v59 = vadd.f32 %v6273_v39, %v4567_v20  ;;  %v6275_v60 = vadd.f32 %v6274_v21, %v6234_v44 }
 0x514   : > { %v6276_v61 = vpop.f32.mrf.mxu1 }
 0x515   : > { %6447 = vst [vmem:[#allocation3] sm:$0xff] %v6443_v59  ;;  %v6444_v63 = vadd.f32 %v6275_v60, %v4568_v1 }
 0x516   : > { %v6277_v2 = vpop.f32.mrf.mxu1 }
 0x517   : > { %6448 = vst [vmem:[#allocation3 + $0x18] sm:$0xff] %v6444_v63 }
 0x545   : > { %v6395_v3 = vpop.f32.mrf.mxu0 }
 0x547   : > { %v6397_v4 = vpop.f32.mrf.mxu0 }
 0x549   : > { %v6399_v6 = vpop.f32.mrf.mxu0 }
 0x54b   : > { %v6400_v8 = vpop.f32.mrf.mxu0 }
 0x550   : > { %v6354_v7 = vpop.f32.mrf.mxu1 }
 0x551   : > { %v6355_v51 = vadd.f32 %v6354_v7, %v6313_v62 }
 0x552   : > { %v6356_v45 = vpop.f32.mrf.mxu1 }
 0x553   : > { %v6357_v10 = vadd.f32 %v6356_v45, %v6315_v12  ;;  %v6396_v11 = vadd.f32 %v6395_v3, %v6355_v51 }
 0x554   : > { %v6358_v43 = vpop.f32.mrf.mxu1 }
 0x555   : > { %v6398_v54 = vadd.f32 %v6397_v4, %v6357_v10 }
 0x556   : > { %v6359_v9 = vpop.f32.mrf.mxu1 }
 0x590   : > { %v6436_v13 = vpop.f32.mrf.mxu1 }
 0x591   : > { %v6437_v17 = vadd.f32 %v6436_v13, %v6396_v11 }
 0x592   : > { %v6438_v19 = vpop.f32.mrf.mxu1 }
 0x593   : > { %v6445_v47 = vadd.f32 %v6437_v17, %v4569_v50  ;;  %v6439_v24 = vadd.f32 %v6438_v19, %v6398_v54  ;;  %6454 = sbr.rel (%p7420_p8) target bundleno = 1442 (0x5a2), region = 80 }
 0x594   : > { %v6440_v25 = vpop.f32.mrf.mxu1 }
 0x595   : > { %6449 = vst [vmem:[#allocation3 + $0x8] sm:$0xff] %v6445_v47  ;;  %v6446_v27 = vadd.f32 %v6439_v24, %v4570_v14 }
 0x596   : > { %v6441_v37 = vpop.f32.mrf.mxu1 }
 0x597   : > { %6450 = vst [vmem:[#allocation3 + $0x10] sm:$0xff] %v6446_v27 }
 0x598   : > { %v6455_v28 = vld [vmem:[#allocation3] sm:$0xff]  ;;  %v6459_v46 = vld [vmem:[#allocation11] sm:$0xf] }
 0x599   : > { %v6456_v57 = vld [vmem:[#allocation3 + $0x18] sm:$0xff]  ;;  %v6464_v29 = vrot.slane %v6459_v46, %v1277_v31  ;;  %v6468_v30 = vrot.slane %v6459_v46, %v1281_v36  ;;  %v6472_v33 = vrot.slane %v6459_v46, %v1285_v5  ;;  %v6476_v35 = vrot.slane %v6459_v46, %v1289_v48 }
 0x59b   : > { %v6481_v38 = vadd.f32 %v6464_v29, %v6455_v28  ;;  %v6482_v15 = vadd.f32 %v6468_v30, %v6456_v57 }
 0x59c   : > { %v6457_v32 = vld [vmem:[#allocation3 + $0x8] sm:$0xff] }
 0x59d   : > { %v6483_v56 = vadd.f32 %v6472_v33, %v6457_v32  ;;  %6485 = vst [vmem:[%s9402_s7] sm:$0xff] %v6481_v38  ;;  %6486 = vst [vmem:[%s9402_s7 + $0x8] sm:$0xff] %v6482_v15 }
 0x59e   : > { %v6458_v34 = vld [vmem:[#allocation3 + $0x10] sm:$0xff] }
 0x59f   : > { %v6484_v42 = vadd.f32 %v6476_v35, %v6458_v34  ;;  %6487 = vst [vmem:[%s9402_s7 + $0x10] sm:$0xff] %v6483_v56 }
 0x5a1   : > { %6488 = vst [vmem:[%s9402_s7 + $0x18] sm:$0xff] %v6484_v42 }
 0x5a2 PF: > { %s9437_s27 = sld [smem:[#allocation17_spill]]  ;;  %s9440_s24 = smov %s8111_s25 }
 0x5a3   : > { %s9438_s29 = sld [smem:[#allocation16_spill]] }
 0x5a4   : > { %s9439_s26 = sld [smem:[#allocation18_spill]] }
 0x5a8   : > { %p16_p3 = scmp.ge.s32.totalorder %s9437_s27, 4  }
 0x5a9   : > { %s9441_s25 = smov %s9438_s29 }
 0x5aa   :  { %18 = sbr.rel (!%p16_p3) target bundleno = 5 (0x5), region = 125 }
 0x5af   :  { %6500 = vsyncpa [#allocation5], 1 }
 0x5b0   :  { %6502 = vsyncpa [#allocation5 + $0x1], 1 }
 0x5b1   :  { %6503 = vsyncpa [#allocation7], 1 }

</bundles_post_ra>
